<compile_context>
chip_gen: v7x
topology: tpu7x:2x2x1
jax: 0.10.0
libtpu: 0.0.40
codegen_flags: <defaults>
</compile_context>

<pallas_src>
import jax
import jax.numpy as jnp
from jax.experimental import pallas as pl
from jax.experimental.pallas import tpu as pltpu

L = 6
POS_DIM = 3
ENC_DIM = POS_DIM + L * 2 * POS_DIM  # 39
HIDDEN = 256
OUT_DIM = 4


def positional_encoding(p):
    # glue: matches PositionalEncoding(L=6).forward exactly
    elems = [p]
    for i in range(L):
        elems.append(jnp.sin((2.0 ** i) * jnp.pi * p))
        elems.append(jnp.cos((2.0 ** i) * jnp.pi * p))
    return jnp.concatenate(elems, axis=1)  # (N, 39)


def tinynerf_kernel(x_ref,
                    w1x5, b1, w2, b2, w3, b3, w4, b4,
                    w5h, b5, w6, b6, w7, b7, w8, b8,
                    wo, bo,
                    out_ref):
    x = x_ref[...]  # (tm, ENC_DIM) bf16

    def lin_relu(v, w, b):
        # bf16 MXU matmul, f32 accumulation, f32 bias + ReLU epilogue, bf16 out.
        acc = jnp.dot(v, w[...], preferred_element_type=jnp.float32) + b[...]
        return jax.nn.relu(acc).astype(jnp.bfloat16)

    # Fused head: x @ [w1 | w5x] -> (tm, 2*HIDDEN). Left half is layer-1's
    # pre-activation, right half is the x-contribution to layer 5 (the folded
    # concat([block_1(x), x]) term), carried in f32.
    xw = jnp.dot(x, w1x5[...], preferred_element_type=jnp.float32)
    h = jax.nn.relu(xw[:, :HIDDEN] + b1[...]).astype(jnp.bfloat16)
    x5 = xw[:, HIDDEN:]  # (tm, HIDDEN) f32

    # rest of block_1
    h = lin_relu(h, w2, b2)
    h = lin_relu(h, w3, b3)
    h = lin_relu(h, w4, b4)

    # block_2 first layer on concat([h, x]) = h @ W_h + x @ W_x (x-part precomputed)
    acc5 = jnp.dot(h, w5h[...], preferred_element_type=jnp.float32) + x5 + b5[...]
    h2 = jax.nn.relu(acc5).astype(jnp.bfloat16)
    h2 = lin_relu(h2, w6, b6)
    h2 = lin_relu(h2, w7, b7)
    h2 = lin_relu(h2, w8, b8)

    # output layer -> single combined (tm, 4) store:
    #   lane 3     -> relu(z)    (sigma)
    #   lanes 0..2 -> sigmoid(z) (rgb)
    z = jnp.dot(h2, wo[...], preferred_element_type=jnp.float32) + bo[...]
    lane = jax.lax.broadcasted_iota(jnp.int32, z.shape, 1)
    out_ref[...] = jnp.where(lane == OUT_DIM - 1, jax.nn.relu(z), jax.nn.sigmoid(z))


def init_params(key):
    """Deterministic PyTorch-Linear-style init: W (out, in), b (out,)."""
    dims = [
        (ENC_DIM, HIDDEN), (HIDDEN, HIDDEN), (HIDDEN, HIDDEN), (HIDDEN, HIDDEN),           # block_1
        (HIDDEN + ENC_DIM, HIDDEN), (HIDDEN, HIDDEN), (HIDDEN, HIDDEN), (HIDDEN, HIDDEN),  # block_2
        (HIDDEN, OUT_DIM),                                                                 # output_layer
    ]
    params = []
    for i, (din, dout) in enumerate(dims):
        kw, kb = jax.random.split(jax.random.fold_in(key, i))
        bound = 1.0 / jnp.sqrt(float(din))
        w = jax.random.uniform(kw, (dout, din), jnp.float32, -bound, bound)
        b = jax.random.uniform(kb, (dout,), jnp.float32, -bound, bound)
        params.append((w, b))
    return params


def _pick_tm(n, tm_max=1024):
    """Largest tile <= tm_max (multiple of 128); keep >=2 grid steps if possible
    so v7x's two TensorCores both get work under dimension_semantics=('parallel',)."""
    n128 = ((n + 127) // 128) * 128
    tm = min(tm_max, n128)
    if n128 // tm < 2 and n128 >= 256:
        tm = max(128, ((n128 // 2) // 128) * 128)
    return tm


def tinynerf_forward(position, direction, params, *, tm_max=1024):
    # `direction` is accepted but unused, matching the reference forward().
    del direction
    x = positional_encoding(position).astype(jnp.float32)  # (N, 39)
    N = x.shape[0]
    tm = _pick_tm(N, tm_max)
    n_pad = pl.cdiv(N, tm) * tm

    # Pad batch only (no lane padding); MXU operand in bf16.
    x = jnp.pad(x, ((0, n_pad - N), (0, 0))).astype(jnp.bfloat16)  # (n_pad, 39)

    # Re-layout params for the kernel: W -> (in, out) bf16, b -> (1, out) f32.
    (w1, b1), (w2, b2), (w3, b3), (w4, b4), (w5, b5), (w6, b6), (w7, b7), (w8, b8), (wo, bo) = params
    w5h = w5[:, :HIDDEN]    # acts on block_1 output
    w5x = w5[:, HIDDEN:]    # acts on encoded position (concat order: [block_1(x), x])

    def prep_w(w):
        return w.T.astype(jnp.bfloat16)

    def prep_b(b):
        return b.reshape(1, -1).astype(jnp.float32)

    # Fused head weight: [w1.T | w5x.T] -> (ENC_DIM, 2*HIDDEN)
    w1x5 = jnp.concatenate([w1.T, w5x.T], axis=1).astype(jnp.bfloat16)

    kin = [
        w1x5, prep_b(b1),
        prep_w(w2), prep_b(b2),
        prep_w(w3), prep_b(b3),
        prep_w(w4), prep_b(b4),
        prep_w(w5h), prep_b(b5),
        prep_w(w6), prep_b(b6),
        prep_w(w7), prep_b(b7),
        prep_w(w8), prep_b(b8),
        prep_w(wo), prep_b(bo),
    ]

    # Grid-invariant index maps: each weight/bias is DMA'd once and stays resident
    # (Mosaic skips re-DMA for blocks whose index does not change across steps).
    def full_spec(p):
        nd = p.ndim
        return pl.BlockSpec(p.shape, lambda i, _nd=nd: (0,) * _nd)

    param_specs = [full_spec(p) for p in kin]

    # Cost hint for XLA's scheduler around the custom call.
    per_row_macs = (ENC_DIM * HIDDEN
                    + 3 * HIDDEN * HIDDEN
                    + (HIDDEN + ENC_DIM) * HIDDEN
                    + 3 * HIDDEN * HIDDEN
                    + HIDDEN * OUT_DIM)
    cost = pl.CostEstimate(
        flops=2 * per_row_macs * n_pad,
        transcendentals=OUT_DIM * n_pad,
        bytes_accessed=(int(x.size) * x.dtype.itemsize
                        + sum(int(p.size) * p.dtype.itemsize for p in kin)
                        + n_pad * OUT_DIM * 4),
    )

    out = pl.pallas_call(
        tinynerf_kernel,
        out_shape=jax.ShapeDtypeStruct((n_pad, OUT_DIM), jnp.float32),
        grid_spec=pltpu.PrefetchScalarGridSpec(
            num_scalar_prefetch=0,
            grid=(n_pad // tm,),
            in_specs=[pl.BlockSpec((tm, ENC_DIM), lambda i: (i, 0))] + param_specs,
            out_specs=pl.BlockSpec((tm, OUT_DIM), lambda i: (i, 0)),
        ),
        compiler_params=pltpu.CompilerParams(dimension_semantics=("parallel",)),
        cost_estimate=cost,
    )(x, *kin)

    out = out[:N]
    # (relu(z[:, 3]), sigmoid(z[:, :3])) — activations already applied in-kernel.
    return out[:, OUT_DIM - 1], out[:, :3]


def _reference_forward_bf16(position, params):
    """Pure-JAX reference mimicking the kernel numerics (bf16 matmuls, f32 epilogue)."""
    x = positional_encoding(position).astype(jnp.bfloat16)

    def lin(v, w, b):
        return jnp.dot(v, w.T.astype(jnp.bfloat16),
                       preferred_element_type=jnp.float32) + b

    h = x
    for (w, b) in params[0:4]:
        h = jax.nn.relu(lin(h, w, b)).astype(jnp.bfloat16)
    y = jnp.concatenate([h, x], axis=1)
    h2 = y
    for (w, b) in params[4:8]:
        h2 = jax.nn.relu(lin(h2, w, b)).astype(jnp.bfloat16)
    wo, bo = params[8]
    z = lin(h2, wo, bo)
    return jax.nn.relu(z[:, 3]), jax.nn.sigmoid(z[:, :3])


def _reference_forward_f32(position, params):
    """True f32 reference matching the PyTorch module exactly."""
    x = positional_encoding(position)
    h = x
    for (w, b) in params[0:4]:
        h = jax.nn.relu(h @ w.T + b)
    y = jnp.concatenate([h, x], axis=1)
    h2 = y
    for (w, b) in params[4:8]:
        h2 = jax.nn.relu(h2 @ w.T + b)
    wo, bo = params[8]
    z = h2 @ wo.T + bo
    return jax.nn.relu(z[:, 3]), jax.nn.sigmoid(z[:, :3])


if __name__ == "__main__":
    key = jax.random.PRNGKey(0)
    k_pos, k_dir, k_par = jax.random.split(key, 3)

    N = 512
    position = jax.random.normal(k_pos, (N, POS_DIM), jnp.float32)
    direction = jax.random.normal(k_dir, (N, POS_DIM), jnp.float32)  # unused by forward
    params = init_params(k_par)

    sigma, rgb = tinynerf_forward(position, direction, params)
    jax.block_until_ready((sigma, rgb))

    assert sigma.shape == (N,) and rgb.shape == (N, 3)

    # Tight check against the bf16-mimicking reference (same arithmetic path).
    sigma_bf, rgb_bf = _reference_forward_bf16(position, params)
    assert jnp.allclose(sigma, sigma_bf, atol=1e-2, rtol=1e-2)
    assert jnp.allclose(rgb, rgb_bf, atol=1e-2, rtol=1e-2)

    # Loose check against the true f32 reference (bounds bf16 drift over 9 layers).
    sigma_f32, rgb_f32 = _reference_forward_f32(position, params)
    assert jnp.allclose(sigma, sigma_f32, atol=5e-2, rtol=5e-2)
    assert jnp.allclose(rgb, rgb_f32, atol=5e-2, rtol=5e-2)

    print("KERNEL_OK")
</pallas_src>

<mosaic_0001>
module attributes {stable_mosaic.version = 11 : i64} {
  func.func @tinynerf_kernel(%arg0: i32, %arg1: memref<256x39xbf16, #tpu.memory_space<vmem>>, %arg2: memref<39x512xbf16, #tpu.memory_space<vmem>>, %arg3: memref<1x256xf32, #tpu.memory_space<vmem>>, %arg4: memref<256x256xbf16, #tpu.memory_space<vmem>>, %arg5: memref<1x256xf32, #tpu.memory_space<vmem>>, %arg6: memref<256x256xbf16, #tpu.memory_space<vmem>>, %arg7: memref<1x256xf32, #tpu.memory_space<vmem>>, %arg8: memref<256x256xbf16, #tpu.memory_space<vmem>>, %arg9: memref<1x256xf32, #tpu.memory_space<vmem>>, %arg10: memref<256x256xbf16, #tpu.memory_space<vmem>>, %arg11: memref<1x256xf32, #tpu.memory_space<vmem>>, %arg12: memref<256x256xbf16, #tpu.memory_space<vmem>>, %arg13: memref<1x256xf32, #tpu.memory_space<vmem>>, %arg14: memref<256x256xbf16, #tpu.memory_space<vmem>>, %arg15: memref<1x256xf32, #tpu.memory_space<vmem>>, %arg16: memref<256x256xbf16, #tpu.memory_space<vmem>>, %arg17: memref<1x256xf32, #tpu.memory_space<vmem>>, %arg18: memref<256x4xbf16, #tpu.memory_space<vmem>>, %arg19: memref<1x4xf32, #tpu.memory_space<vmem>>, %arg20: memref<256x4xf32, #tpu.memory_space<vmem>>) attributes {dimension_semantics = [#tpu.dimension_semantics<parallel>], iteration_bounds = array<i64: 2>, scalar_prefetch = 0 : i64, scratch_operands = 0 : i64, tpu.core_type = #tpu.core_type<tc>, window_params = [{transform_indices = @transform_0, window_bounds = array<i64: 256, 39>}, {pipeline_mode = #tpu.pipeline_mode<synchronous>, transform_indices = @transform_1, window_bounds = array<i64: 39, 512>}, {pipeline_mode = #tpu.pipeline_mode<synchronous>, transform_indices = @transform_2, window_bounds = array<i64: 1, 256>}, {pipeline_mode = #tpu.pipeline_mode<synchronous>, transform_indices = @transform_3, window_bounds = array<i64: 256, 256>}, {pipeline_mode = #tpu.pipeline_mode<synchronous>, transform_indices = @transform_4, window_bounds = array<i64: 1, 256>}, {pipeline_mode = #tpu.pipeline_mode<synchronous>, transform_indices = @transform_5, window_bounds = array<i64: 256, 256>}, {pipeline_mode = #tpu.pipeline_mode<synchronous>, transform_indices = @transform_6, window_bounds = array<i64: 1, 256>}, {pipeline_mode = #tpu.pipeline_mode<synchronous>, transform_indices = @transform_7, window_bounds = array<i64: 256, 256>}, {pipeline_mode = #tpu.pipeline_mode<synchronous>, transform_indices = @transform_8, window_bounds = array<i64: 1, 256>}, {pipeline_mode = #tpu.pipeline_mode<synchronous>, transform_indices = @transform_9, window_bounds = array<i64: 256, 256>}, {pipeline_mode = #tpu.pipeline_mode<synchronous>, transform_indices = @transform_10, window_bounds = array<i64: 1, 256>}, {pipeline_mode = #tpu.pipeline_mode<synchronous>, transform_indices = @transform_11, window_bounds = array<i64: 256, 256>}, {pipeline_mode = #tpu.pipeline_mode<synchronous>, transform_indices = @transform_12, window_bounds = array<i64: 1, 256>}, {pipeline_mode = #tpu.pipeline_mode<synchronous>, transform_indices = @transform_13, window_bounds = array<i64: 256, 256>}, {pipeline_mode = #tpu.pipeline_mode<synchronous>, transform_indices = @transform_14, window_bounds = array<i64: 1, 256>}, {pipeline_mode = #tpu.pipeline_mode<synchronous>, transform_indices = @transform_15, window_bounds = array<i64: 256, 256>}, {pipeline_mode = #tpu.pipeline_mode<synchronous>, transform_indices = @transform_16, window_bounds = array<i64: 1, 256>}, {pipeline_mode = #tpu.pipeline_mode<synchronous>, transform_indices = @transform_17, window_bounds = array<i64: 256, 4>}, {pipeline_mode = #tpu.pipeline_mode<synchronous>, transform_indices = @transform_18, window_bounds = array<i64: 1, 4>}, {transform_indices = @transform_19, window_bounds = array<i64: 256, 4>}]} {
    %c0 = arith.constant 0 : index
    %c0_0 = arith.constant 0 : index
    %0 = vector.load %arg1[%c0, %c0_0] : memref<256x39xbf16, #tpu.memory_space<vmem>>, vector<256x39xbf16>
    %c0_1 = arith.constant 0 : index
    %c0_2 = arith.constant 0 : index
    %1 = vector.load %arg2[%c0_1, %c0_2] : memref<39x512xbf16, #tpu.memory_space<vmem>>, vector<39x512xbf16>
    %cst = arith.constant dense<0.000000e+00> : vector<256x512xf32>
    %2 = tpu.matmul %0, %1, %cst {dimension_numbers = #tpu.dot_dimension_numbers<[1], [0], [0], [1], [0, 0, 1, 1], [], []>} : vector<256x39xbf16>, vector<39x512xbf16>, vector<256x512xf32> -> vector<256x512xf32>
    %3 = vector.extract_strided_slice %2 {offsets = [0, 0], sizes = [256, 256], strides = [1, 1]} : vector<256x512xf32> to vector<256x256xf32>
    %c0_3 = arith.constant 0 : index
    %c0_4 = arith.constant 0 : index
    %4 = vector.load %arg3[%c0_3, %c0_4] : memref<1x256xf32, #tpu.memory_space<vmem>>, vector<1x256xf32>
    %5 = vector.broadcast %4 : vector<1x256xf32> to vector<256x256xf32>
    %6 = arith.addf %3, %5 : vector<256x256xf32>
    %cst_5 = arith.constant 0.000000e+00 : f32
    %7 = vector.broadcast %cst_5 : f32 to vector<256x256xf32>
    %8 = arith.maximumf %6, %7 : vector<256x256xf32>
    %9 = arith.truncf %8 : vector<256x256xf32> to vector<256x256xbf16>
    %10 = vector.extract_strided_slice %2 {offsets = [0, 256], sizes = [256, 256], strides = [1, 1]} : vector<256x512xf32> to vector<256x256xf32>
    %c0_6 = arith.constant 0 : index
    %c0_7 = arith.constant 0 : index
    %11 = vector.load %arg4[%c0_6, %c0_7] : memref<256x256xbf16, #tpu.memory_space<vmem>>, vector<256x256xbf16>
    %cst_8 = arith.constant dense<0.000000e+00> : vector<256x256xf32>
    %12 = tpu.matmul %9, %11, %cst_8 {dimension_numbers = #tpu.dot_dimension_numbers<[1], [0], [0], [1], [0, 0, 1, 1], [], []>} : vector<256x256xbf16>, vector<256x256xbf16>, vector<256x256xf32> -> vector<256x256xf32>
    %c0_9 = arith.constant 0 : index
    %c0_10 = arith.constant 0 : index
    %13 = vector.load %arg5[%c0_9, %c0_10] : memref<1x256xf32, #tpu.memory_space<vmem>>, vector<1x256xf32>
    %14 = vector.broadcast %13 : vector<1x256xf32> to vector<256x256xf32>
    %15 = arith.addf %12, %14 : vector<256x256xf32>
    %cst_11 = arith.constant 0.000000e+00 : f32
    %16 = vector.broadcast %cst_11 : f32 to vector<256x256xf32>
    %17 = arith.maximumf %15, %16 : vector<256x256xf32>
    %18 = arith.truncf %17 : vector<256x256xf32> to vector<256x256xbf16>
    %c0_12 = arith.constant 0 : index
    %c0_13 = arith.constant 0 : index
    %19 = vector.load %arg6[%c0_12, %c0_13] : memref<256x256xbf16, #tpu.memory_space<vmem>>, vector<256x256xbf16>
    %cst_14 = arith.constant dense<0.000000e+00> : vector<256x256xf32>
    %20 = tpu.matmul %18, %19, %cst_14 {dimension_numbers = #tpu.dot_dimension_numbers<[1], [0], [0], [1], [0, 0, 1, 1], [], []>} : vector<256x256xbf16>, vector<256x256xbf16>, vector<256x256xf32> -> vector<256x256xf32>
    %c0_15 = arith.constant 0 : index
    %c0_16 = arith.constant 0 : index
    %21 = vector.load %arg7[%c0_15, %c0_16] : memref<1x256xf32, #tpu.memory_space<vmem>>, vector<1x256xf32>
    %22 = vector.broadcast %21 : vector<1x256xf32> to vector<256x256xf32>
    %23 = arith.addf %20, %22 : vector<256x256xf32>
    %cst_17 = arith.constant 0.000000e+00 : f32
    %24 = vector.broadcast %cst_17 : f32 to vector<256x256xf32>
    %25 = arith.maximumf %23, %24 : vector<256x256xf32>
    %26 = arith.truncf %25 : vector<256x256xf32> to vector<256x256xbf16>
    %c0_18 = arith.constant 0 : index
    %c0_19 = arith.constant 0 : index
    %27 = vector.load %arg8[%c0_18, %c0_19] : memref<256x256xbf16, #tpu.memory_space<vmem>>, vector<256x256xbf16>
    %cst_20 = arith.constant dense<0.000000e+00> : vector<256x256xf32>
    %28 = tpu.matmul %26, %27, %cst_20 {dimension_numbers = #tpu.dot_dimension_numbers<[1], [0], [0], [1], [0, 0, 1, 1], [], []>} : vector<256x256xbf16>, vector<256x256xbf16>, vector<256x256xf32> -> vector<256x256xf32>
    %c0_21 = arith.constant 0 : index
    %c0_22 = arith.constant 0 : index
    %29 = vector.load %arg9[%c0_21, %c0_22] : memref<1x256xf32, #tpu.memory_space<vmem>>, vector<1x256xf32>
    %30 = vector.broadcast %29 : vector<1x256xf32> to vector<256x256xf32>
    %31 = arith.addf %28, %30 : vector<256x256xf32>
    %cst_23 = arith.constant 0.000000e+00 : f32
    %32 = vector.broadcast %cst_23 : f32 to vector<256x256xf32>
    %33 = arith.maximumf %31, %32 : vector<256x256xf32>
    %34 = arith.truncf %33 : vector<256x256xf32> to vector<256x256xbf16>
    %c0_24 = arith.constant 0 : index
    %c0_25 = arith.constant 0 : index
    %35 = vector.load %arg10[%c0_24, %c0_25] : memref<256x256xbf16, #tpu.memory_space<vmem>>, vector<256x256xbf16>
    %cst_26 = arith.constant dense<0.000000e+00> : vector<256x256xf32>
    %36 = tpu.matmul %34, %35, %cst_26 {dimension_numbers = #tpu.dot_dimension_numbers<[1], [0], [0], [1], [0, 0, 1, 1], [], []>} : vector<256x256xbf16>, vector<256x256xbf16>, vector<256x256xf32> -> vector<256x256xf32>
    %37 = arith.addf %36, %10 : vector<256x256xf32>
    %c0_27 = arith.constant 0 : index
    %c0_28 = arith.constant 0 : index
    %38 = vector.load %arg11[%c0_27, %c0_28] : memref<1x256xf32, #tpu.memory_space<vmem>>, vector<1x256xf32>
    %39 = vector.broadcast %38 : vector<1x256xf32> to vector<256x256xf32>
    %40 = arith.addf %37, %39 : vector<256x256xf32>
    %cst_29 = arith.constant 0.000000e+00 : f32
    %41 = vector.broadcast %cst_29 : f32 to vector<256x256xf32>
    %42 = arith.maximumf %40, %41 : vector<256x256xf32>
    %43 = arith.truncf %42 : vector<256x256xf32> to vector<256x256xbf16>
    %c0_30 = arith.constant 0 : index
    %c0_31 = arith.constant 0 : index
    %44 = vector.load %arg12[%c0_30, %c0_31] : memref<256x256xbf16, #tpu.memory_space<vmem>>, vector<256x256xbf16>
    %cst_32 = arith.constant dense<0.000000e+00> : vector<256x256xf32>
    %45 = tpu.matmul %43, %44, %cst_32 {dimension_numbers = #tpu.dot_dimension_numbers<[1], [0], [0], [1], [0, 0, 1, 1], [], []>} : vector<256x256xbf16>, vector<256x256xbf16>, vector<256x256xf32> -> vector<256x256xf32>
    %c0_33 = arith.constant 0 : index
    %c0_34 = arith.constant 0 : index
    %46 = vector.load %arg13[%c0_33, %c0_34] : memref<1x256xf32, #tpu.memory_space<vmem>>, vector<1x256xf32>
    %47 = vector.broadcast %46 : vector<1x256xf32> to vector<256x256xf32>
    %48 = arith.addf %45, %47 : vector<256x256xf32>
    %cst_35 = arith.constant 0.000000e+00 : f32
    %49 = vector.broadcast %cst_35 : f32 to vector<256x256xf32>
    %50 = arith.maximumf %48, %49 : vector<256x256xf32>
    %51 = arith.truncf %50 : vector<256x256xf32> to vector<256x256xbf16>
    %c0_36 = arith.constant 0 : index
    %c0_37 = arith.constant 0 : index
    %52 = vector.load %arg14[%c0_36, %c0_37] : memref<256x256xbf16, #tpu.memory_space<vmem>>, vector<256x256xbf16>
    %cst_38 = arith.constant dense<0.000000e+00> : vector<256x256xf32>
    %53 = tpu.matmul %51, %52, %cst_38 {dimension_numbers = #tpu.dot_dimension_numbers<[1], [0], [0], [1], [0, 0, 1, 1], [], []>} : vector<256x256xbf16>, vector<256x256xbf16>, vector<256x256xf32> -> vector<256x256xf32>
    %c0_39 = arith.constant 0 : index
    %c0_40 = arith.constant 0 : index
    %54 = vector.load %arg15[%c0_39, %c0_40] : memref<1x256xf32, #tpu.memory_space<vmem>>, vector<1x256xf32>
    %55 = vector.broadcast %54 : vector<1x256xf32> to vector<256x256xf32>
    %56 = arith.addf %53, %55 : vector<256x256xf32>
    %cst_41 = arith.constant 0.000000e+00 : f32
    %57 = vector.broadcast %cst_41 : f32 to vector<256x256xf32>
    %58 = arith.maximumf %56, %57 : vector<256x256xf32>
    %59 = arith.truncf %58 : vector<256x256xf32> to vector<256x256xbf16>
    %c0_42 = arith.constant 0 : index
    %c0_43 = arith.constant 0 : index
    %60 = vector.load %arg16[%c0_42, %c0_43] : memref<256x256xbf16, #tpu.memory_space<vmem>>, vector<256x256xbf16>
    %cst_44 = arith.constant dense<0.000000e+00> : vector<256x256xf32>
    %61 = tpu.matmul %59, %60, %cst_44 {dimension_numbers = #tpu.dot_dimension_numbers<[1], [0], [0], [1], [0, 0, 1, 1], [], []>} : vector<256x256xbf16>, vector<256x256xbf16>, vector<256x256xf32> -> vector<256x256xf32>
    %c0_45 = arith.constant 0 : index
    %c0_46 = arith.constant 0 : index
    %62 = vector.load %arg17[%c0_45, %c0_46] : memref<1x256xf32, #tpu.memory_space<vmem>>, vector<1x256xf32>
    %63 = vector.broadcast %62 : vector<1x256xf32> to vector<256x256xf32>
    %64 = arith.addf %61, %63 : vector<256x256xf32>
    %cst_47 = arith.constant 0.000000e+00 : f32
    %65 = vector.broadcast %cst_47 : f32 to vector<256x256xf32>
    %66 = arith.maximumf %64, %65 : vector<256x256xf32>
    %67 = arith.truncf %66 : vector<256x256xf32> to vector<256x256xbf16>
    %c0_48 = arith.constant 0 : index
    %c0_49 = arith.constant 0 : index
    %68 = vector.load %arg18[%c0_48, %c0_49] : memref<256x4xbf16, #tpu.memory_space<vmem>>, vector<256x4xbf16>
    %cst_50 = arith.constant dense<0.000000e+00> : vector<256x4xf32>
    %69 = tpu.matmul %67, %68, %cst_50 {dimension_numbers = #tpu.dot_dimension_numbers<[1], [0], [0], [1], [0, 0, 1, 1], [], []>} : vector<256x256xbf16>, vector<256x4xbf16>, vector<256x4xf32> -> vector<256x4xf32>
    %c0_51 = arith.constant 0 : index
    %c0_52 = arith.constant 0 : index
    %70 = vector.load %arg19[%c0_51, %c0_52] : memref<1x4xf32, #tpu.memory_space<vmem>>, vector<1x4xf32>
    %71 = vector.broadcast %70 : vector<1x4xf32> to vector<256x4xf32>
    %72 = arith.addf %69, %71 : vector<256x4xf32>
    %73 = tpu.iota {dimensions = array<i32: 1>} : vector<256x4xi32>
    %c3_i32 = arith.constant 3 : i32
    %74 = vector.broadcast %c3_i32 : i32 to vector<256x4xi32>
    %75 = arith.cmpi eq, %73, %74 : vector<256x4xi32>
    %cst_53 = arith.constant 0.000000e+00 : f32
    %76 = vector.broadcast %cst_53 : f32 to vector<256x4xf32>
    %77 = arith.maximumf %72, %76 : vector<256x4xf32>
    %78 = arith.negf %72 : vector<256x4xf32>
    %79 = math.exp %78 : vector<256x4xf32>
    %cst_54 = arith.constant 1.000000e+00 : f32
    %80 = vector.broadcast %cst_54 : f32 to vector<256x4xf32>
    %81 = arith.addf %80, %79 : vector<256x4xf32>
    %82 = arith.divf %80, %81 : vector<256x4xf32>
    %83 = arith.select %75, %77, %82 : vector<256x4xi1>, vector<256x4xf32>
    %c0_55 = arith.constant 0 : index
    %c0_56 = arith.constant 0 : index
    %84 = vector.load %arg20[%c0_55, %c0_56] : memref<256x4xf32, #tpu.memory_space<vmem>>, vector<256x4xf32>
    tpu.vector_store %arg20[%c0_55, %c0_56], %83 {strides = array<i32>} : memref<256x4xf32, #tpu.memory_space<vmem>>, vector<256x4xf32>,
    return
  }
  func.func @transform_0(%arg0: i32) -> (i32, i32) {
    %c0_i32 = arith.constant 0 : i32
    %c0_i32_0 = arith.constant 0 : i32
    return %arg0, %c0_i32 : i32, i32
  }
  func.func @transform_1(%arg0: i32) -> (i32, i32) {
    %c0_i32 = arith.constant 0 : i32
    %c0_i32_0 = arith.constant 0 : i32
    %c0_i32_1 = arith.constant 0 : i32
    return %c0_i32, %c0_i32_0 : i32, i32
  }
  func.func @transform_2(%arg0: i32) -> (i32, i32) {
    %c0_i32 = arith.constant 0 : i32
    %c0_i32_0 = arith.constant 0 : i32
    %c0_i32_1 = arith.constant 0 : i32
    return %c0_i32, %c0_i32_0 : i32, i32
  }
  func.func @transform_3(%arg0: i32) -> (i32, i32) {
    %c0_i32 = arith.constant 0 : i32
    %c0_i32_0 = arith.constant 0 : i32
    %c0_i32_1 = arith.constant 0 : i32
    return %c0_i32, %c0_i32_0 : i32, i32
  }
  func.func @transform_4(%arg0: i32) -> (i32, i32) {
    %c0_i32 = arith.constant 0 : i32
    %c0_i32_0 = arith.constant 0 : i32
    %c0_i32_1 = arith.constant 0 : i32
    return %c0_i32, %c0_i32_0 : i32, i32
  }
  func.func @transform_5(%arg0: i32) -> (i32, i32) {
    %c0_i32 = arith.constant 0 : i32
    %c0_i32_0 = arith.constant 0 : i32
    %c0_i32_1 = arith.constant 0 : i32
    return %c0_i32, %c0_i32_0 : i32, i32
  }
  func.func @transform_6(%arg0: i32) -> (i32, i32) {
    %c0_i32 = arith.constant 0 : i32
    %c0_i32_0 = arith.constant 0 : i32
    %c0_i32_1 = arith.constant 0 : i32
    return %c0_i32, %c0_i32_0 : i32, i32
  }
  func.func @transform_7(%arg0: i32) -> (i32, i32) {
    %c0_i32 = arith.constant 0 : i32
    %c0_i32_0 = arith.constant 0 : i32
    %c0_i32_1 = arith.constant 0 : i32
    return %c0_i32, %c0_i32_0 : i32, i32
  }
  func.func @transform_8(%arg0: i32) -> (i32, i32) {
    %c0_i32 = arith.constant 0 : i32
    %c0_i32_0 = arith.constant 0 : i32
    %c0_i32_1 = arith.constant 0 : i32
    return %c0_i32, %c0_i32_0 : i32, i32
  }
  func.func @transform_9(%arg0: i32) -> (i32, i32) {
    %c0_i32 = arith.constant 0 : i32
    %c0_i32_0 = arith.constant 0 : i32
    %c0_i32_1 = arith.constant 0 : i32
    return %c0_i32, %c0_i32_0 : i32, i32
  }
  func.func @transform_10(%arg0: i32) -> (i32, i32) {
    %c0_i32 = arith.constant 0 : i32
    %c0_i32_0 = arith.constant 0 : i32
    %c0_i32_1 = arith.constant 0 : i32
    return %c0_i32, %c0_i32_0 : i32, i32
  }
  func.func @transform_11(%arg0: i32) -> (i32, i32) {
    %c0_i32 = arith.constant 0 : i32
    %c0_i32_0 = arith.constant 0 : i32
    %c0_i32_1 = arith.constant 0 : i32
    return %c0_i32, %c0_i32_0 : i32, i32
  }
  func.func @transform_12(%arg0: i32) -> (i32, i32) {
    %c0_i32 = arith.constant 0 : i32
    %c0_i32_0 = arith.constant 0 : i32
    %c0_i32_1 = arith.constant 0 : i32
    return %c0_i32, %c0_i32_0 : i32, i32
  }
  func.func @transform_13(%arg0: i32) -> (i32, i32) {
    %c0_i32 = arith.constant 0 : i32
    %c0_i32_0 = arith.constant 0 : i32
    %c0_i32_1 = arith.constant 0 : i32
    return %c0_i32, %c0_i32_0 : i32, i32
  }
  func.func @transform_14(%arg0: i32) -> (i32, i32) {
    %c0_i32 = arith.constant 0 : i32
    %c0_i32_0 = arith.constant 0 : i32
    %c0_i32_1 = arith.constant 0 : i32
    return %c0_i32, %c0_i32_0 : i32, i32
  }
  func.func @transform_15(%arg0: i32) -> (i32, i32) {
    %c0_i32 = arith.constant 0 : i32
    %c0_i32_0 = arith.constant 0 : i32
    %c0_i32_1 = arith.constant 0 : i32
    return %c0_i32, %c0_i32_0 : i32, i32
  }
  func.func @transform_16(%arg0: i32) -> (i32, i32) {
    %c0_i32 = arith.constant 0 : i32
    %c0_i32_0 = arith.constant 0 : i32
    %c0_i32_1 = arith.constant 0 : i32
    return %c0_i32, %c0_i32_0 : i32, i32
  }
  func.func @transform_17(%arg0: i32) -> (i32, i32) {
    %c0_i32 = arith.constant 0 : i32
    %c0_i32_0 = arith.constant 0 : i32
    %c0_i32_1 = arith.constant 0 : i32
    return %c0_i32, %c0_i32_0 : i32, i32
  }
  func.func @transform_18(%arg0: i32) -> (i32, i32) {
    %c0_i32 = arith.constant 0 : i32
    %c0_i32_0 = arith.constant 0 : i32
    %c0_i32_1 = arith.constant 0 : i32
    return %c0_i32, %c0_i32_0 : i32, i32
  }
  func.func @transform_19(%arg0: i32) -> (i32, i32) {
    %c0_i32 = arith.constant 0 : i32
    %c0_i32_0 = arith.constant 0 : i32
    return %arg0, %c0_i32 : i32, i32
  }
}

</mosaic_0001>

<bundles_post_ra>
// kernel: tpu_custom_call.1
= control target key start
LH: loop header
LB: loop body
LE: loop exit
PB: predicated region body
PF: predicated region fallthrough
CT: control target
= control target key end

     0   :  { %s8545_s0 = inlined_call_operand.vmem [shape: bf16[512,39], index: 0, kind: input, shape index: {}]   ;;  %s8546_s1 = inlined_call_operand.vmem [shape: bf16[39,512], index: 1, kind: input, shape index: {}]   ;;  %s8547_s2 = inlined_call_operand.vmem [shape: f32[1,256], index: 2, kind: input, shape index: {}]   ;;  %s8548_s3 = inlined_call_operand.vmem [shape: bf16[256,256], index: 3, kind: input, shape index: {}]   ;;  %s8549_s4 = inlined_call_operand.vmem [shape: f32[1,256], index: 4, kind: input, shape index: {}]   ;;  %s8550_s5 = inlined_call_operand.hbm [shape: bf16[256,256], index: 5, kind: input, shape index: {}]   ;;  %s8551_s6 = inlined_call_operand.vmem [shape: f32[1,256], index: 6, kind: input, shape index: {}]   ;;  %s8552_s7 = inlined_call_operand.hbm [shape: bf16[256,256], index: 7, kind: input, shape index: {}]   ;;  %s8553_s8 = inlined_call_operand.vmem [shape: f32[1,256], index: 8, kind: input, shape index: {}]   ;;  %s8554_s9 = inlined_call_operand.hbm [shape: bf16[256,256], index: 9, kind: input, shape index: {}]   ;;  %s8555_s10 = inlined_call_operand.vmem [shape: f32[1,256], index: 10, kind: input, shape index: {}]   ;;  %s8556_s11 = inlined_call_operand.hbm [shape: bf16[256,256], index: 11, kind: input, shape index: {}]   ;;  %s8557_s12 = inlined_call_operand.vmem [shape: f32[1,256], index: 12, kind: input, shape index: {}]   ;;  %s8558_s13 = inlined_call_operand.hbm [shape: bf16[256,256], index: 13, kind: input, shape index: {}]   ;;  %s8559_s14 = inlined_call_operand.vmem [shape: f32[1,256], index: 14, kind: input, shape index: {}]   ;;  %s8560_s15 = inlined_call_operand.hbm [shape: bf16[256,256], index: 15, kind: input, shape index: {}]   ;;  %s8561_s16 = inlined_call_operand.vmem [shape: f32[1,256], index: 16, kind: input, shape index: {}]   ;;  %s8562_s17 = inlined_call_operand.vmem [shape: bf16[256,4], index: 17, kind: input, shape index: {}]   ;;  %s8563_s18 = inlined_call_operand.vmem [shape: f32[1,4], index: 18, kind: input, shape index: {}]   ;;  %s8564_s19 = inlined_call_operand.vmem [shape: f32[512,4], index: 19, kind: output, shape index: {}]  }
   0x1   :  { %8572 = sst [smem:[#allocation16_spill]] %s8545_s0 }
   0x2   :  { %8573 = sst [smem:[#allocation17_spill]] %s8546_s1 }
   0x3   :  { %8574 = sst [smem:[#allocation18_spill]] %s8547_s2 }
   0x4   :  { %8575 = sst [smem:[#allocation19_spill]] %s8548_s3 }
   0x5   :  { %8576 = sst [smem:[#allocation20_spill]] %s8559_s14 }
   0x6   :  { %8577 = sst [smem:[#allocation21_spill]] %s8561_s16 }
   0x7   :  { %8578 = sst [smem:[#allocation22_spill]] %s8562_s17 }
   0x8   :  { %8579 = sst [smem:[#allocation23_spill]] %s8563_s18 }
   0x9   :  { %8580 = sst [smem:[#allocation24_spill]] %s8564_s19 }
   0xa   :  { %24 = vsyncpa [#allocation3], 0 }
   0xb   :  { %25 = vsyncpa [#allocation5], 0 }
   0xc   :  { %26 = vsyncpa [#allocation8], 0 }
   0xd   :  { %27 = vsyncpa [#allocation11], 0  ;;  %s7128_s0 = smov 0  }
   0xe LB: > { %s8567_s30 = sadd.s32 4294967295, %s7016_s0   ;;  %p5711_p0 = scmp.ge.s32.totalorder %s7016_s0, 1  ;;  %s7016_s0 = sphi %s7128_s0, %s33_s0  }
   0xf   : > { %p468_p1 = scmp.lt.s32.totalorder %s7016_s0, 3  ;;  %p7138_p2 = scmp.eq.s32.totalorder %s8567_s30, 0 }
  0x10   : > { %s7018_s1 = smov [#allocation4]   ;;  %s7019_s2 = smov [#allocation7]  }
  0x11   : > { %s8581_s20 = scalar_select %p7138_p2, 1, 0 }
  0x12   : > { %p7142_p3 = pnand %p5711_p0, %p468_p1  ;;  %s508_s22 = sshll.u32 %s7018_s1, 4  ;;  %s7146_s22 = int_to_ptr.vmem [resolvable:$true] %s508_s22 }
  0x13   : > { %s540_s23 = sshll.u32 %s7019_s2, 4  ;;  %s7020_s25 = smov [#allocation2]   ;;  %s7150_s23 = int_to_ptr.vmem [resolvable:$true] %s540_s23 }
  0x14   : > { %s8582_s21 = scalar_select %p7142_p3, 1, 0 }
  0x15   : > { %p6265_p4 = pneg %p7142_p3  ;;  %s492_s3 = sshll.u32 %s7020_s25, 4  ;;  %s7158_s3 = int_to_ptr.vmem [resolvable:$true] %s492_s3 }
  0x16   : > { %s7021_s26 = smov [#allocation6]   ;;  %s6826_s1 = scalar_lea.hbm %s8552_s7, 4096 }
  0x17   : > { %p7154_p5 = pnand %p7138_p2, %p6265_p4  ;;  %s7160_s27 = sshll.u32 %s7021_s26, 4  ;;  %s525_s27 = int_to_ptr.vmem [resolvable:$true] %s7160_s27 }
  0x18   : > { %p6827_p6 = scmp.ne.s32.totalorder %s8552_s7, %s6826_s1  ;;  %p6833_p10 = scmp.lt.u32.totalorder %s6826_s1, %s8552_s7 }
  0x19   : > { %p7170_p7 = pneg %p7154_p5 }
  0x1b   : > { %p6829_p8 = pnand %p7170_p7, %p6827_p6 }
  0x1d   : > { %p6830_p9 = pneg %p6829_p8 }
  0x1f   : > { %p6835_p11 = pnand %p6833_p10, %p6830_p9 }
  0x21   : > { %6838 = shalt.err (!%p6835_p11)
}
  0x22   : > { %s6839_s30 = scalar_lea.vmem %s7146_s22, 4096  ;;  %p6847_p1 = scmp.lt.s32.totalorder %s7146_s22, %s7146_s22 }
  0x23   : > { %p6840_p12 = scmp.ne.s32.totalorder %s7146_s22, %s6839_s30  ;;  %p6848_p4 = scmp.lt.s32.totalorder %s6839_s30, %s6839_s30 }
  0x25   : > { %p6842_p13 = pnand %p6840_p12, %p7170_p7  ;;  %p6849_p6 = por %p6848_p4, %p6847_p1 }
  0x27   : > { %p6843_p0 = pneg %p6842_p13 }
  0x29   : > { %p6850_p8 = pnand %p6849_p6, %p6843_p0 }
  0x2b   : > { %6853 = shalt.err (!%p6850_p8)
}
  0x2c   : > { %s7022_s28 = smov 128   ;;  %s7023_s29 = smov 8  }
  0x2d   : > { %6271 = dma.hbm_to_vmem [thread:$0]  (!%p7154_p5), %s8552_s7, 4096, %s7146_s22, [#allocation5], %s7022_s28, %s7022_s28, %s7023_s29  }
  0x2e   : > { %s6854_s30 = scalar_lea.hbm %s8556_s11, 4096 }
  0x2f   : > { %p6855_p9 = scmp.ne.s32.totalorder %s8556_s11, %s6854_s30  ;;  %p6861_p12 = scmp.lt.u32.totalorder %s6854_s30, %s8556_s11 }
  0x31   : > { %p6857_p10 = pnand %p6855_p9, %p7170_p7 }
  0x33   : > { %p6858_p11 = pneg %p6857_p10 }
  0x35   : > { %p6863_p13 = pnand %p6861_p12, %p6858_p11 }
  0x37   : > { %6866 = shalt.err (!%p6863_p13)
}
  0x38   : > { %s6867_s22 = scalar_lea.vmem %s7150_s23, 4096  ;;  %p6875_p6 = scmp.lt.s32.totalorder %s7150_s23, %s7150_s23 }
  0x39   : > { %p6868_p0 = scmp.ne.s32.totalorder %s7150_s23, %s6867_s22  ;;  %p6876_p8 = scmp.lt.s32.totalorder %s6867_s22, %s6867_s22 }
  0x3b   : > { %p6870_p1 = pnand %p6868_p0, %p7170_p7  ;;  %p6877_p9 = por %p6876_p8, %p6875_p6 }
  0x3d   : > { %p6871_p4 = pneg %p6870_p1 }
  0x3f   : > { %p6878_p10 = pnand %p6877_p9, %p6871_p4 }
  0x41   : > { %6881 = shalt.err (!%p6878_p10)
}
  0x42   : > { %6277 = dma.hbm_to_vmem [thread:$0]  (!%p7154_p5), %s8556_s11, 4096, %s7150_s23, [#allocation8], %s7022_s28, %s7022_s28, %s7023_s29  }
  0x43   : > { %s6882_s1 = scalar_lea.hbm %s8550_s5, 4096 }
  0x44   : > { %p6883_p11 = scmp.ne.s32.totalorder %s8550_s5, %s6882_s1  ;;  %p6889_p0 = scmp.lt.u32.totalorder %s6882_s1, %s8550_s5 }
  0x46   : > { %p6885_p12 = pnand %p6883_p11, %p7170_p7 }
  0x48   : > { %p6886_p13 = pneg %p6885_p12 }
  0x4a   : > { %p6891_p1 = pnand %p6889_p0, %p6886_p13 }
  0x4c   : > { %6894 = shalt.err (!%p6891_p1)
}
  0x4d   : > { %s6895_s23 = scalar_lea.vmem %s7158_s3, 4096  ;;  %p6903_p9 = scmp.lt.s32.totalorder %s7158_s3, %s7158_s3 }
  0x4e   : > { %p6896_p4 = scmp.ne.s32.totalorder %s7158_s3, %s6895_s23  ;;  %p6904_p10 = scmp.lt.s32.totalorder %s6895_s23, %s6895_s23 }
  0x50   : > { %p6898_p6 = pnand %p6896_p4, %p7170_p7  ;;  %p6905_p11 = por %p6904_p10, %p6903_p9 }
  0x52   : > { %p6899_p8 = pneg %p6898_p6 }
  0x54   : > { %p6906_p12 = pnand %p6905_p11, %p6899_p8 }
  0x56   : > { %6909 = shalt.err (!%p6906_p12)
}
  0x57   : > { %6268 = dma.hbm_to_vmem [thread:$0]  (!%p7154_p5), %s8550_s5, 4096, %s7158_s3, [#allocation3], %s7022_s28, %s7022_s28, %s7023_s29  }
  0x58   : > { %s6910_s18 = scalar_lea.hbm %s8554_s9, 4096 }
  0x59   : > { %p6911_p13 = scmp.ne.s32.totalorder %s8554_s9, %s6910_s18  ;;  %p6917_p4 = scmp.lt.u32.totalorder %s6910_s18, %s8554_s9 }
  0x5b   : > { %p6913_p0 = pnand %p6911_p13, %p7170_p7 }
  0x5d   : > { %p6914_p1 = pneg %p6913_p0 }
  0x5f   : > { %p6919_p6 = pnand %p6917_p4, %p6914_p1 }
  0x61   : > { %6922 = shalt.err (!%p6919_p6)
}
  0x62   : > { %s6923_s30 = scalar_lea.vmem %s525_s27, 4096  ;;  %p6931_p11 = scmp.lt.s32.totalorder %s525_s27, %s525_s27 }
  0x63   : > { %p6924_p8 = scmp.ne.s32.totalorder %s525_s27, %s6923_s30  ;;  %p6932_p12 = scmp.lt.s32.totalorder %s6923_s30, %s6923_s30 }
  0x65   : > { %p6926_p9 = pnand %p6924_p8, %p7170_p7  ;;  %p6933_p2 = por %p6932_p12, %p6931_p11 }
  0x67   : > { %p6927_p10 = pneg %p6926_p9 }
  0x69   : > { %p6934_p3 = pnand %p6933_p2, %p6927_p10 }
  0x6b   : > { %6937 = shalt.err (!%p6934_p3)
}
  0x6c   : > { %6274 = dma.hbm_to_vmem [thread:$0]  (!%p7154_p5), %s8554_s9, 4096, %s525_s27, [#allocation5], %s7022_s28, %s7022_s28, %s7023_s29  }
  0x6d   : > { %s7024_s22 = smov [#allocation9]   ;;  %s7025_s16 = smov [#allocation10]  }
  0x6e   : > { %s556_s14 = sshll.u32 %s7024_s22, 4  ;;  %s572_s17 = sshll.u32 %s7025_s16, 4  ;;  %s557_s14 = int_to_ptr.vmem [resolvable:$true] %s556_s14  ;;  %s573_s17 = int_to_ptr.vmem [resolvable:$true] %s572_s17 }
  0x6f   : > { %s6938_s2 = scalar_lea.hbm %s8558_s13, 4096 }
  0x70   : > { %p6939_p2 = scmp.ne.s32.totalorder %s8558_s13, %s6938_s2  ;;  %p6945_p0 = scmp.lt.u32.totalorder %s6938_s2, %s8558_s13 }
  0x72   : > { %p6941_p3 = pnand %p6939_p2, %p7170_p7 }
  0x74   : > { %p6942_p13 = pneg %p6941_p3 }
  0x76   : > { %p6947_p1 = pnand %p6945_p0, %p6942_p13 }
  0x78   : > { %6950 = shalt.err (!%p6947_p1)
}
  0x79   : > { %s6951_s27 = scalar_lea.vmem %s557_s14, 4096  ;;  %p6959_p9 = scmp.lt.s32.totalorder %s557_s14, %s557_s14 }
  0x7a   : > { %p6952_p4 = scmp.ne.s32.totalorder %s557_s14, %s6951_s27  ;;  %p6960_p10 = scmp.lt.s32.totalorder %s6951_s27, %s6951_s27 }
  0x7c   : > { %p6954_p6 = pnand %p6952_p4, %p7170_p7  ;;  %p6961_p11 = por %p6960_p10, %p6959_p9 }
  0x7e   : > { %p6955_p8 = pneg %p6954_p6 }
  0x80   : > { %p6962_p12 = pnand %p6961_p11, %p6955_p8 }
  0x82   : > { %6965 = shalt.err (!%p6962_p12)
}
  0x83   : > { %6280 = dma.hbm_to_vmem [thread:$0]  (!%p7154_p5), %s8558_s13, 4096, %s557_s14, [#allocation8], %s7022_s28, %s7022_s28, %s7023_s29  }
  0x84   : > { %s6966_s1 = scalar_lea.hbm %s8560_s15, 4096 }
  0x85   : > { %p6967_p2 = scmp.ne.s32.totalorder %s8560_s15, %s6966_s1  ;;  %p6973_p0 = scmp.lt.u32.totalorder %s6966_s1, %s8560_s15 }
  0x87   : > { %p6969_p3 = pnand %p6967_p2, %p7170_p7 }
  0x89   : > { %p6970_p13 = pneg %p6969_p3 }
  0x8b   : > { %p6975_p1 = pnand %p6973_p0, %p6970_p13 }
  0x8d   : > { %6978 = shalt.err (!%p6975_p1)
}
  0x8e   : > { %s6979_s3 = scalar_lea.vmem %s573_s17, 4096  ;;  %p6987_p9 = scmp.lt.s32.totalorder %s573_s17, %s573_s17 }
  0x8f   : > { %p6980_p4 = scmp.ne.s32.totalorder %s573_s17, %s6979_s3  ;;  %p6988_p10 = scmp.lt.s32.totalorder %s6979_s3, %s6979_s3 }
  0x91   : > { %p6982_p6 = pnand %p6980_p4, %p7170_p7  ;;  %p6989_p11 = por %p6988_p10, %p6987_p9 }
  0x93   : > { %p6983_p8 = pneg %p6982_p6 }
  0x95   : > { %p6990_p12 = pnand %p6989_p11, %p6983_p8 }
  0x97   : > { %6993 = shalt.err (!%p6990_p12)
}
  0x98   : > { %6283 = dma.hbm_to_vmem [thread:$0]  (!%p7154_p5), %s8560_s15, 4096, %s573_s17, [#allocation11], %s7022_s28, %s7022_s28, %s7023_s29  }
  0x99   : > { %p8585_p2 = scmp.ne.s32.totalorder %s8582_s21, 0 }
  0x9a   : > { %p8586_p7 = scmp.ne.s32.totalorder (!%p8585_p2), %s8581_s20, 0 }
  0x9b   : > { %606 = sbr.rel (%p8585_p2) target bundleno = 2332 (0x91c), region = 96 }
  0xa2   : > { %6999 = dma.done.wait (%p8586_p7), [#allocation3], 4096  }
  0xa3   : > { %7001 = vsyncadd (%p8586_p7), [#allocation3], 4294963200 }
  0xa4   : > { %7003 = dma.done.wait (%p8586_p7), [#allocation5], 8192  }
  0xa5   : > { %7005 = vsyncadd (%p8586_p7), [#allocation5], 4294959104 }
  0xa6   : > { %7007 = dma.done.wait (%p8586_p7), [#allocation8], 8192  }
  0xa7   : > { %7009 = vsyncadd (%p8586_p7), [#allocation8], 4294959104 }
  0xa8   : > { %7011 = dma.done.wait (%p8586_p7), [#allocation11], 4096  }
  0xa9   : > { %7013 = vsyncadd (%p8586_p7), [#allocation11], 4294963200  ;;  %v7026_v0 = vmov 0   ;;  %s8587_s19 = sadd.s32 4294967295, %s7016_s0   ;;  %vm916_vm0 = vcmask 1042432   ;;  %vm917_vm1 = vcmask 1043456  }
  0xaa   : > { %964 = vmatprep.mubr.bf16.mxu0 %v7026_v0  ;;  %s5726_s21 = sshll.u32 %s8587_s19, 5  ;;  %1157 = vmatprep.mubr.bf16.mxu1 %v7026_v0  ;;  %v7027_v1 = vmov 65535   ;;  %s8588_s29 = sld [smem:[#allocation17_spill]]  ;;  %vm867_vm2 = vcmask 318464   ;;  %vm5560_vm4 = vcmask 31744  }
  0xab   : > { %p683_p5 = scmp.lt.s32.totalorder %s5726_s21, 63  ;;  %v918_v2 = vsel %vm916_vm0, 4294967295, %v7027_v1  ;;  %s8589_s26 = sld [smem:[#allocation16_spill]] }
  0xac   : > { %v7347_v7 = vsel %vm917_vm1, %v918_v2, 0  ;;  %s8591_s27 = sld [smem:[#allocation18_spill]]  ;;  %s8593_s28 = sld [smem:[#allocation20_spill]] }
  0xad   : > { %s8598_s21 = smov (!%p683_p5, %s5726_s21), 63  ;;  %s8594_s20 = sld [smem:[#allocation21_spill]] }
  0xae   : > { %s5727_s24 = sshll.u32 %s8598_s21, 2  ;;  %s8595_s22 = sld [smem:[#allocation23_spill]] }
  0xaf   : > { %s5729_s16 = sshll.u32 %s8598_s21, 3  ;;  %s8596_s2 = sld [smem:[#allocation24_spill]] }
  0xb0   : > { %v6314_v3 = vld [vmem:[%s8588_s29 + $0x4] ss:$16 sps:$4 sm:$0xff]   ;;  %v6316_v4 = vld [vmem:[%s8588_s29] ss:$16 sps:$4 sm:$0xff]   ;;  %v6386_v61 = vld [vmem:[%s8588_s29 + $0xc] ss:$16 sps:$4 sm:$0xff]  }
  0xb1   : > { %932 = vmatprep.subr.bf16.mxu0 %v6314_v3  ;;  %v6317_v5 = vld [vmem:[%s8588_s29 + $0x24] ss:$16 sps:$4 sm:$0xff]   ;;  %s7352_s30 = scalar_lea.vmem %s8589_s26, %s5727_s24  ;;  %v6319_v8 = vld [vmem:[%s8588_s29 + $0x20] ss:$16 sps:$4 sm:$0xff]   ;;  %s8590_s24 = sld [smem:[#allocation19_spill]]  ;;  %1125 = vmatprep.subr.bf16.mxu1 %v6386_v61  ;;  %v736_v2 = vld [vmem:[%s8588_s29 + $0x48] sm:$0xff] }
  0xb2   : > { %v735_v6 = vld [vmem:[%s8588_s29 + $0x40] sm:$0xff]  ;;  %933 = vmatpush1.bf16.msra.mxu0 %v6316_v4  ;;  %v7372_v16 = vld [vmem:[%s7352_s30 + $0x8] sm:$0xff]   ;;  %v7393_v22 = vld [vmem:[%s7352_s30 + $0x10] sm:$0xff]   ;;  %v5757_v3 = vcombine.high %v736_v2, %v736_v2  ;;  %v5756_v4 = vcombine.low %v736_v2, %v736_v2  ;;  %s8592_s26 = sld [smem:[#allocation22_spill]] }
  0xb3   : > { %v5755_v9 = vcombine.high %v735_v6, %v735_v6  ;;  %v5754_v10 = vcombine.low %v735_v6, %v735_v6  ;;  %934 = vmatprep.subr.bf16.mxu0 %v6317_v5  ;;  %v7360_v13 = vld [vmem:[%s7352_s30] sm:$0xff]   ;;  %v7411_v27 = vld [vmem:[%s7352_s30 + $0x18] sm:$0xff]   ;;  %v7447_v37 = vld [vmem:[%s7352_s30 + $0x28] sm:$0xff]  }
  0xb4   : > { %v7429_v32 = vld [vmem:[%s7352_s30 + $0x20] sm:$0xff]   ;;  %v7465_v42 = vld [vmem:[%s7352_s30 + $0x30] sm:$0xff]   ;;  %v7483_v47 = vld [vmem:[%s7352_s30 + $0x38] sm:$0xff]   ;;  %v930_v5 = vand.u32 %v5757_v3, %v7347_v7  ;;  %v927_v6 = vand.u32 %v5756_v4, %v7347_v7 }
  0xb5   : > { %v924_v11 = vand.u32 %v5755_v9, %v7347_v7  ;;  %v921_v12 = vand.u32 %v5754_v10, %v7347_v7  ;;  %v7498_v51 = vld [vmem:[%s7352_s30 + $0x40] sm:$0xff]   ;;  %v7504_v52 = vld [vmem:[%s7352_s30 + $0x48] sm:$0xff]   ;;  %v7510_v53 = vld [vmem:[%s7352_s30 + $0x50] sm:$0xff]   ;;  %v1320_v10 = vlaneseq }
  0xb6   : > { %935 = vmatpush1.bf16.msra.mxu0 %v6319_v8  ;;  %v7516_v54 = vld [vmem:[%s7352_s30 + $0x58] sm:$0xff]   ;;  %v7528_v57 = vld [vmem:[%s7352_s30 + $0x60] sm:$0xff]   ;;  %v7534_v58 = vld [vmem:[%s7352_s30 + $0x68] sm:$0xff]  }
  0xb7   : > { %936 = vmatprep.subr.bf16.mxu0 %v924_v11  ;;  %v6334_v14 = vld [vmem:[%s8590_s24] ss:$8 sps:$4 sm:$0xff]   ;;  %v6336_v15 = vld [vmem:[%s8590_s24 + $0x4] ss:$8 sps:$4 sm:$0xff]   ;;  %v6340_v17 = vld [vmem:[%s8590_s24 + $0x14] ss:$8 sps:$4 sm:$0xff]  }
  0xb8   : > { %v6338_v18 = vld [vmem:[%s8590_s24 + $0x10] ss:$8 sps:$4 sm:$0xff]   ;;  %v6344_v19 = vld [vmem:[%s8590_s24 + $0x24] ss:$8 sps:$4 sm:$0xff]   ;;  %v6342_v20 = vld [vmem:[%s8590_s24 + $0x20] ss:$8 sps:$4 sm:$0xff]  }
  0xb9   : > { %v6348_v21 = vld [vmem:[%s8590_s24 + $0x34] ss:$8 sps:$4 sm:$0xff]   ;;  %v6346_v23 = vld [vmem:[%s8590_s24 + $0x30] ss:$8 sps:$4 sm:$0xff]   ;;  %v6352_v24 = vld [vmem:[%s8590_s24 + $0x44] ss:$8 sps:$4 sm:$0xff]  }
  0xba   : > { %937 = vmatpush1.bf16.msra.mxu0 %v921_v12  ;;  %v6350_v25 = vld [vmem:[%s8590_s24 + $0x40] ss:$8 sps:$4 sm:$0xff]   ;;  %v6355_v26 = vld [vmem:[%s8590_s24 + $0x54] ss:$8 sps:$4 sm:$0xff]   ;;  %v6353_v28 = vld [vmem:[%s8590_s24 + $0x50] ss:$8 sps:$4 sm:$0xff]  }
  0xbb   : > { %1694 = vmatprep.subr.bf16.mxu0 %v6336_v15  ;;  %v6358_v29 = vld [vmem:[%s8590_s24 + $0x64] ss:$8 sps:$4 sm:$0xff]   ;;  %v6356_v30 = vld [vmem:[%s8590_s24 + $0x60] ss:$8 sps:$4 sm:$0xff]   ;;  %v6361_v31 = vld [vmem:[%s8590_s24 + $0x74] ss:$8 sps:$4 sm:$0xff]  }
  0xbc   : > { %v6359_v33 = vld [vmem:[%s8590_s24 + $0x70] ss:$8 sps:$4 sm:$0xff]   ;;  %v6364_v34 = vld [vmem:[%s8590_s24 + $0x84] ss:$8 sps:$4 sm:$0xff]   ;;  %v6362_v35 = vld [vmem:[%s8590_s24 + $0x80] ss:$8 sps:$4 sm:$0xff]  }
  0xbd   : > { %5758 = vmatmul.mubr.msk.bf16.vlgmr.msra.gmra.mrb[0].mxu0 %vm867_vm2, %v7360_v13  ;;  %v6367_v36 = vld [vmem:[%s8590_s24 + $0x94] ss:$8 sps:$4 sm:$0xff]   ;;  %v6365_v38 = vld [vmem:[%s8590_s24 + $0x90] ss:$8 sps:$4 sm:$0xff]   ;;  %v6370_v39 = vld [vmem:[%s8590_s24 + $0xa4] ss:$8 sps:$4 sm:$0xff]  }
  0xbe   : > { %974 = vmatprep.mubr.bf16.mxu0 %v7026_v0  ;;  %1695 = vmatpush1.bf16.msra.mxu0 %v6334_v14  ;;  %v6368_v40 = vld [vmem:[%s8590_s24 + $0xa0] ss:$8 sps:$4 sm:$0xff]   ;;  %v6373_v41 = vld [vmem:[%s8590_s24 + $0xb4] ss:$8 sps:$4 sm:$0xff]   ;;  %v6371_v43 = vld [vmem:[%s8590_s24 + $0xb0] ss:$8 sps:$4 sm:$0xff]  }
  0xbf   : > { %1696 = vmatprep.subr.bf16.mxu0 %v6340_v17  ;;  %v6376_v44 = vld [vmem:[%s8590_s24 + $0xc4] ss:$8 sps:$4 sm:$0xff]   ;;  %v6374_v45 = vld [vmem:[%s8590_s24 + $0xc0] ss:$8 sps:$4 sm:$0xff]   ;;  %v6379_v46 = vld [vmem:[%s8590_s24 + $0xd4] ss:$8 sps:$4 sm:$0xff]  }
  0xc0   : > { %v6377_v48 = vld [vmem:[%s8590_s24 + $0xd0] ss:$8 sps:$4 sm:$0xff]   ;;  %v6382_v49 = vld [vmem:[%s8590_s24 + $0xe4] ss:$8 sps:$4 sm:$0xff]   ;;  %v6380_v50 = vld [vmem:[%s8590_s24 + $0xe0] ss:$8 sps:$4 sm:$0xff]  }
  0xc1   : > { %v6385_v55 = vld [vmem:[%s8590_s24 + $0xf4] ss:$8 sps:$4 sm:$0xff]   ;;  %v6383_v56 = vld [vmem:[%s8590_s24 + $0xf0] ss:$8 sps:$4 sm:$0xff]   ;;  %v6394_v8 = vld [vmem:[#allocation2] ss:$8 sps:$4 sm:$0xff]  }
  0xc2   : > { %1697 = vmatpush1.bf16.msra.mxu0 %v6338_v18  ;;  %v7540_v59 = vld [vmem:[%s7352_s30 + $0x70] sm:$0xff]   ;;  %v7546_v60 = vld [vmem:[%s7352_s30 + $0x78] sm:$0xff]   ;;  %v6396_v9 = vld [vmem:[#allocation2 + $0x4] ss:$8 sps:$4 sm:$0xff]   ;;  %v1321_v7 = vshrl.u32 %v1320_v10, 7  ;;  %s8288_s30 = scalar_lea.vmem %s8596_s2, %s5729_s16 }
  0xc3   : > { %1698 = vmatprep.subr.bf16.mxu0 %v6344_v19  ;;  %v6388_v62 = vld [vmem:[%s8588_s29 + $0x8] ss:$16 sps:$4 sm:$0xff]   ;;  %v6389_v63 = vld [vmem:[%s8588_s29 + $0x2c] ss:$16 sps:$4 sm:$0xff]  }
  0xc4   : > { %1126 = vmatpush1.bf16.msra.mxu1 %v6388_v62  ;;  %v6391_v1 = vld [vmem:[%s8588_s29 + $0x28] ss:$16 sps:$4 sm:$0xff]   ;;  %v6399_v12 = vld [vmem:[#allocation2 + $0x14] ss:$8 sps:$4 sm:$0xff]   ;;  %v7574_v14 = vsub.s32 0, %v1321_v7  ;;  %v7581_v15 = vsub.s32 1, %v1321_v7 }
  0xc5   : > { %5759 = vmatmul.mubr.msk.bf16.gmra.mrb[4].mxu0 %vm867_vm2, %v7372_v16  ;;  %1127 = vmatprep.subr.bf16.mxu1 %v6389_v63  ;;  %v6397_v11 = vld [vmem:[#allocation2 + $0x10] ss:$8 sps:$4 sm:$0xff]   ;;  %v6402_v17 = vld [vmem:[#allocation2 + $0x24] ss:$8 sps:$4 sm:$0xff]   ;;  %v6417_v62 = vld [vmem:[#allocation2 + $0x74] ss:$8 sps:$4 sm:$0xff]  }
  0xc6   : > { %984 = vmatprep.mubr.bf16.mxu0 %v7026_v0  ;;  %1699 = vmatpush1.bf16.msra.mxu0 %v6342_v20  ;;  %v6403_v20 = vld [vmem:[#allocation2 + $0x30] ss:$8 sps:$4 sm:$0xff]  }
  0xc7   : > { %1700 = vmatprep.subr.bf16.mxu0 %v6348_v21  ;;  %v6405_v21 = vld [vmem:[#allocation2 + $0x34] ss:$8 sps:$4 sm:$0xff]   ;;  %v6415_v4 = vld [vmem:[#allocation2 + $0x70] ss:$8 sps:$4 sm:$0xff]  }
  0xc8   : > { %1128 = vmatpush1.bf16.msra.mxu1 %v6391_v1 }
  0xc9   : > { %1129 = vmatprep.subr.bf16.mxu1 %v930_v5 }
  0xca   : > { %1701 = vmatpush1.bf16.msra.mxu0 %v6346_v23 }
  0xcb   : > { %1702 = vmatprep.subr.bf16.mxu0 %v6352_v24 }
  0xcc   : > { %1130 = vmatpush1.bf16.msra.mxu1 %v927_v6 }
  0xcd   : > { %5760 = vmatmul.mubr.msk.bf16.gmra.mrb[8].mxu0 %vm867_vm2, %v7393_v22  ;;  %2187 = vmatprep.subr.bf16.mxu1 %v6396_v9 }
  0xce   : > { %994 = vmatprep.mubr.bf16.mxu0 %v7026_v0  ;;  %1703 = vmatpush1.bf16.msra.mxu0 %v6350_v25 }
  0xcf   : > { %1704 = vmatprep.subr.bf16.mxu0 %v6355_v26  ;;  %5774 = vmatmul.mubr.msk.bf16.vlgmr.msra.gmra.mrb[0].mxu1 %vm867_vm2, %v7360_v13  ;;  %v1318_v13 = vld [vmem:[%s8591_s27] sm:$0x3] }
  0xd0   : > { %1167 = vmatprep.mubr.bf16.mxu1 %v7026_v0  ;;  %2188 = vmatpush1.bf16.msra.mxu1 %v6394_v8  ;;  %v7585_v18 = vrot.slane %v1318_v13, %v7574_v14  ;;  %v7588_v19 = vrot.slane %v1318_v13, %v7581_v15  ;;  %v6420_v8 = vld [vmem:[#allocation2 + $0x84] ss:$8 sps:$4 sm:$0xff]  }
  0xd1   : > { %2189 = vmatprep.subr.bf16.mxu1 %v6399_v12 }
  0xd2   : > { %1705 = vmatpush1.bf16.msra.mxu0 %v6353_v28 }
  0xd3   : > { %1706 = vmatprep.subr.bf16.mxu0 %v6358_v29 }
  0xd4   : > { %2190 = vmatpush1.bf16.msra.mxu1 %v6397_v11 }
  0xd5   : > { %5761 = vmatmul.mubr.msk.bf16.gmra.mrb[12].mxu0 %vm867_vm2, %v7411_v27  ;;  %2191 = vmatprep.subr.bf16.mxu1 %v6402_v17  ;;  %v6418_v17 = vld [vmem:[#allocation2 + $0x80] ss:$8 sps:$4 sm:$0xff]  }
  0xd6   : > { %1004 = vmatprep.mubr.bf16.mxu0 %v7026_v0  ;;  %1707 = vmatpush1.bf16.msra.mxu0 %v6356_v30  ;;  %v6406_v30 = vld [vmem:[#allocation2 + $0x40] ss:$8 sps:$4 sm:$0xff]  }
  0xd7   : > { %1708 = vmatprep.subr.bf16.mxu0 %v6361_v31  ;;  %5775 = vmatmul.mubr.msk.bf16.gmra.mrb[4].mxu1 %vm867_vm2, %v7372_v16  ;;  %v6400_v16 = vld [vmem:[#allocation2 + $0x20] ss:$8 sps:$4 sm:$0xff]   ;;  %v6408_v31 = vld [vmem:[#allocation2 + $0x44] ss:$8 sps:$4 sm:$0xff]  }
  0xd8   : > { %1177 = vmatprep.mubr.bf16.mxu1 %v7026_v0  ;;  %2192 = vmatpush1.bf16.msra.mxu1 %v6400_v16 }
  0xd9   : > { %2193 = vmatprep.subr.bf16.mxu1 %v6405_v21  ;;  %v6423_v21 = vld [vmem:[#allocation2 + $0x94] ss:$8 sps:$4 sm:$0xff]  }
  0xda   : > { %1709 = vmatpush1.bf16.msra.mxu0 %v6359_v33 }
  0xdb   : > { %1710 = vmatprep.subr.bf16.mxu0 %v6364_v34  ;;  %v6411_v34 = vld [vmem:[#allocation2 + $0x54] ss:$8 sps:$4 sm:$0xff]  }
  0xdc   : > { %2194 = vmatpush1.bf16.msra.mxu1 %v6403_v20 }
  0xdd   : > { %5762 = vmatmul.mubr.msk.bf16.gmra.mrb[16].mxu0 %vm867_vm2, %v7429_v32  ;;  %2195 = vmatprep.subr.bf16.mxu1 %v6408_v31 }
  0xde   : > { %1014 = vmatprep.mubr.bf16.mxu0 %v7026_v0  ;;  %1711 = vmatpush1.bf16.msra.mxu0 %v6362_v35 }
  0xdf   : > { %1712 = vmatprep.subr.bf16.mxu0 %v6367_v36  ;;  %5776 = vmatmul.mubr.msk.bf16.gmra.mrb[8].mxu1 %vm867_vm2, %v7393_v22 }
  0xe0   : > { %1187 = vmatprep.mubr.bf16.mxu1 %v7026_v0  ;;  %2196 = vmatpush1.bf16.msra.mxu1 %v6406_v30  ;;  %v6426_v30 = vld [vmem:[#allocation2 + $0xa4] ss:$8 sps:$4 sm:$0xff]  }
  0xe1   : > { %2197 = vmatprep.subr.bf16.mxu1 %v6411_v34 }
  0xe2   : > { %1713 = vmatpush1.bf16.msra.mxu0 %v6365_v38 }
  0xe3   : > { %1714 = vmatprep.subr.bf16.mxu0 %v6370_v39 }
  0xe5   : > { %5763 = vmatmul.mubr.msk.bf16.gmra.mrb[20].mxu0 %vm867_vm2, %v7447_v37 }
  0xe6   : > { %1024 = vmatprep.mubr.bf16.mxu0 %v7026_v0  ;;  %1715 = vmatpush1.bf16.msra.mxu0 %v6368_v40  ;;  %v6409_v40 = vld [vmem:[#allocation2 + $0x50] ss:$8 sps:$4 sm:$0xff]  }
  0xe7   : > { %1716 = vmatprep.subr.bf16.mxu0 %v6373_v41  ;;  %5777 = vmatmul.mubr.msk.bf16.gmra.mrb[12].mxu1 %vm867_vm2, %v7411_v27 }
  0xe8   : > { %1197 = vmatprep.mubr.bf16.mxu1 %v7026_v0  ;;  %2198 = vmatpush1.bf16.msra.mxu1 %v6409_v40  ;;  %v6429_v40 = vld [vmem:[#allocation2 + $0xb4] ss:$8 sps:$4 sm:$0xff]  }
  0xea   : > { %1717 = vmatpush1.bf16.msra.mxu0 %v6371_v43 }
  0xeb   : > { %1718 = vmatprep.subr.bf16.mxu0 %v6376_v44  ;;  %v6414_v44 = vld [vmem:[#allocation2 + $0x64] ss:$8 sps:$4 sm:$0xff]  }
  0xec   : > { %2199 = vmatprep.subr.bf16.mxu1 %v6414_v44 }
  0xed   : > { %5764 = vmatmul.mubr.msk.bf16.gmra.mrb[24].mxu0 %vm867_vm2, %v7465_v42 }
  0xee   : > { %1034 = vmatprep.mubr.bf16.mxu0 %v7026_v0  ;;  %1719 = vmatpush1.bf16.msra.mxu0 %v6374_v45 }
  0xef   : > { %1720 = vmatprep.subr.bf16.mxu0 %v6379_v46  ;;  %5778 = vmatmul.mubr.msk.bf16.gmra.mrb[16].mxu1 %vm867_vm2, %v7429_v32 }
  0xf0   : > { %1207 = vmatprep.mubr.bf16.mxu1 %v7026_v0 }
  0xf2   : > { %1721 = vmatpush1.bf16.msra.mxu0 %v6377_v48 }
  0xf3   : > { %1722 = vmatprep.subr.bf16.mxu0 %v6382_v49 }
  0xf5   : > { %5765 = vmatmul.mubr.msk.bf16.gmra.mrb[28].mxu0 %vm867_vm2, %v7483_v47 }
  0xf6   : > { %1044 = vmatprep.mubr.bf16.mxu0 %v7026_v0  ;;  %1723 = vmatpush1.bf16.msra.mxu0 %v6380_v50 }
  0xf7   : > { %1724 = vmatprep.subr.bf16.mxu0 %v6385_v55  ;;  %5779 = vmatmul.mubr.msk.bf16.gmra.mrb[20].mxu1 %vm867_vm2, %v7447_v37 }
  0xf8   : > { %1217 = vmatprep.mubr.bf16.mxu1 %v7026_v0 }
  0xfa   : > { %1725 = vmatpush1.bf16.msra.mxu0 %v6383_v56  ;;  %v6412_v56 = vld [vmem:[#allocation2 + $0x60] ss:$8 sps:$4 sm:$0xff]  }
  0xfb   : > { %2200 = vmatpush1.bf16.msra.mxu1 %v6412_v56 }
  0xfc   : > { %2201 = vmatprep.subr.bf16.mxu1 %v6417_v62 }
  0xfd   : > { %5766 = vmatmul.mubr.msk.bf16.gmra.mrb[32].mxu0 %vm867_vm2, %v7498_v51 }
  0xfe   : > { %1054 = vmatprep.mubr.bf16.mxu0 %v7026_v0 }
  0xff   : > { %2202 = vmatpush1.bf16.msra.mxu1 %v6415_v4 }
 0x100   : > { %2203 = vmatprep.subr.bf16.mxu1 %v6420_v8  ;;  %5780 = vmatmul.mubr.msk.bf16.gmra.mrb[24].mxu1 %vm867_vm2, %v7465_v42 }
 0x101   : > { %1227 = vmatprep.mubr.bf16.mxu1 %v7026_v0 }
 0x103   : > { %2204 = vmatpush1.bf16.msra.mxu1 %v6418_v17 }
 0x104   : > { %2205 = vmatprep.subr.bf16.mxu1 %v6423_v21 }
 0x105   : > { %5767 = vmatmul.mubr.msk.bf16.gmra.mrb[36].mxu0 %vm867_vm2, %v7504_v52 }
 0x106   : > { %1064 = vmatprep.mubr.bf16.mxu0 %v7026_v0 }
 0x108   : > { %5781 = vmatmul.mubr.msk.bf16.gmra.mrb[28].mxu1 %vm867_vm2, %v7483_v47 }
 0x109   : > { %1237 = vmatprep.mubr.bf16.mxu1 %v7026_v0 }
 0x10d   : > { %5768 = vmatmul.mubr.msk.bf16.gmra.mrb[40].mxu0 %vm867_vm2, %v7510_v53 }
 0x10e   : > { %1074 = vmatprep.mubr.bf16.mxu0 %v7026_v0 }
 0x110   : > { %5782 = vmatmul.mubr.msk.bf16.gmra.mrb[32].mxu1 %vm867_vm2, %v7498_v51 }
 0x111   : > { %1247 = vmatprep.mubr.bf16.mxu1 %v7026_v0 }
 0x115   : > { %5769 = vmatmul.mubr.msk.bf16.gmra.mrb[44].mxu0 %vm867_vm2, %v7516_v54 }
 0x116   : > { %1084 = vmatprep.mubr.bf16.mxu0 %v7026_v0 }
 0x118   : > { %5783 = vmatmul.mubr.msk.bf16.gmra.mrb[36].mxu1 %vm867_vm2, %v7504_v52 }
 0x119   : > { %1257 = vmatprep.mubr.bf16.mxu1 %v7026_v0 }
 0x11d   : > { %5770 = vmatmul.mubr.msk.bf16.gmra.mrb[48].mxu0 %vm867_vm2, %v7528_v57 }
 0x11e   : > { %1094 = vmatprep.mubr.bf16.mxu0 %v7026_v0 }
 0x120   : > { %5784 = vmatmul.mubr.msk.bf16.gmra.mrb[40].mxu1 %vm867_vm2, %v7510_v53 }
 0x121   : > { %1267 = vmatprep.mubr.bf16.mxu1 %v7026_v0 }
 0x125   : > { %5771 = vmatmul.mubr.msk.bf16.gmra.mrb[52].mxu0 %vm867_vm2, %v7534_v58 }
 0x126   : > { %1104 = vmatprep.mubr.bf16.mxu0 %v7026_v0 }
 0x128   : > { %5785 = vmatmul.mubr.msk.bf16.gmra.mrb[44].mxu1 %vm867_vm2, %v7516_v54 }
 0x129   : > { %1277 = vmatprep.mubr.bf16.mxu1 %v7026_v0 }
 0x12d   : > { %5772 = vmatmul.mubr.msk.bf16.gmra.mrb[56].mxu0 %vm867_vm2, %v7540_v59 }
 0x12e   : > { %1114 = vmatprep.mubr.bf16.mxu0 %v7026_v0 }
 0x130   : > { %5786 = vmatmul.mubr.msk.bf16.gmra.mrb[48].mxu1 %vm867_vm2, %v7528_v57 }
 0x131   : > { %1287 = vmatprep.mubr.bf16.mxu1 %v7026_v0 }
 0x135   : > { %5773 = vmatmul.mubr.msk.bf16.gmra.mrb[60].mxu0 %vm867_vm2, %v7546_v60 }
 0x138   : > { %5787 = vmatmul.mubr.msk.bf16.gmra.mrb[52].mxu1 %vm867_vm2, %v7534_v58 }
 0x139   : > { %1297 = vmatprep.mubr.bf16.mxu1 %v7026_v0 }
 0x140   : > { %5788 = vmatmul.mubr.msk.bf16.gmra.mrb[56].mxu1 %vm867_vm2, %v7540_v59 }
 0x141   : > { %1307 = vmatprep.mubr.bf16.mxu1 %v7026_v0 }
 0x148   : > { %5789 = vmatmul.mubr.msk.bf16.gmra.mrb[60].mxu1 %vm867_vm2, %v7546_v60 }
 0x190   : > { %v966_v22 = vpop.f32.mrb[0].mxu0 }
 0x191   : > { %v1330_v23 = vadd.f32 %v7585_v18, %v966_v22  ;;  %v968_v24 = vpop.f32.mrb[1].mxu0 }
 0x192   : > { %v1331_v25 = vadd.f32 %v7588_v19, %v968_v24  ;;  %v970_v26 = vpop.f32.mrb[2].mxu0 }
 0x193   : > { %v1332_v28 = vadd.f32 %v7585_v18, %v970_v26  ;;  %v972_v29 = vpop.f32.mrb[3].mxu0  ;;  %v1394_v35 = vmax.f32 %v1330_v23, 0.0  ;;  %v6421_v26 = vld [vmem:[#allocation2 + $0x90] ss:$8 sps:$4 sm:$0xff]  }
 0x194   : > { %v1333_v33 = vadd.f32 %v7588_v19, %v972_v29  ;;  %v1395_v38 = vmax.f32 %v1331_v25, 0.0  ;;  %2206 = vmatpush1.bf16.msra.mxu1 %v6421_v26 }
 0x195   : > { %v1396_v36 = vmax.f32 %v1332_v28, 0.0  ;;  %2207 = vmatprep.subr.bf16.mxu1 %v6426_v30 }
 0x196   : > { %v1397_v39 = vmax.f32 %v1333_v33, 0.0 }
 0x197   : > { %v1458_v27 = vpack.c.bf16 %v1396_v36, %v1394_v35 }
 0x198   : > { %v976_v41 = vpop.f32.mrb[4].mxu0  ;;  %v1459_v43 = vpack.c.bf16 %v1397_v39, %v1395_v38  ;;  %v6424_v39 = vld [vmem:[#allocation2 + $0xa0] ss:$8 sps:$4 sm:$0xff]  }
 0x199   : > { %v1334_v45 = vadd.f32 %v7585_v18, %v976_v41  ;;  %v978_v46 = vpop.f32.mrb[5].mxu0  ;;  %2208 = vmatpush1.bf16.msra.mxu1 %v6424_v39 }
 0x19a   : > { %v1335_v48 = vadd.f32 %v7588_v19, %v978_v46  ;;  %v980_v49 = vpop.f32.mrb[6].mxu0  ;;  %1726 = vmatprep.mubr.bf16.mxu0 %v1459_v43  ;;  %v6427_v46 = vld [vmem:[#allocation2 + $0xb0] ss:$8 sps:$4 sm:$0xff]   ;;  %2209 = vmatprep.subr.bf16.mxu1 %v6429_v40 }
 0x19b   : > { %v1336_v50 = vadd.f32 %v7585_v18, %v980_v49  ;;  %v982_v55 = vpop.f32.mrb[7].mxu0  ;;  %1727 = vmatmul.mubr.bf16.vlgmr.msra.gmra.mrb[64].mxu0 %v1458_v27  ;;  %v1398_v63 = vmax.f32 %v1334_v45, 0.0 }
 0x19c   : > { %v1337_v61 = vadd.f32 %v7588_v19, %v982_v55  ;;  %v1399_v2 = vmax.f32 %v1335_v48, 0.0 }
 0x19d   : > { %v1400_v1 = vmax.f32 %v1336_v50, 0.0  ;;  %v6432_v50 = vld [vmem:[#allocation2 + $0xc4] ss:$8 sps:$4 sm:$0xff]   ;;  %2210 = vmatpush1.bf16.msra.mxu1 %v6427_v46 }
 0x19e   : > { %v1401_v32 = vmax.f32 %v1337_v61, 0.0  ;;  %2211 = vmatprep.subr.bf16.mxu1 %v6432_v50 }
 0x19f   : > { %v1460_v3 = vpack.c.bf16 %v1400_v1, %v1398_v63 }
 0x1a0   : > { %v986_v5 = vpop.f32.mrb[8].mxu0  ;;  %v1461_v6 = vpack.c.bf16 %v1401_v32, %v1399_v2  ;;  %v6430_v2 = vld [vmem:[#allocation2 + $0xc0] ss:$8 sps:$4 sm:$0xff]  }
 0x1a1   : > { %v1338_v9 = vadd.f32 %v7585_v18, %v986_v5  ;;  %v988_v11 = vpop.f32.mrb[9].mxu0  ;;  %2212 = vmatpush1.bf16.msra.mxu1 %v6430_v2 }
 0x1a2   : > { %v1339_v12 = vadd.f32 %v7588_v19, %v988_v11  ;;  %v990_v7 = vpop.f32.mrb[10].mxu0  ;;  %1736 = vmatprep.mubr.bf16.mxu0 %v1461_v6 }
 0x1a3   : > { %v1340_v13 = vadd.f32 %v7585_v18, %v990_v7  ;;  %v992_v16 = vpop.f32.mrb[11].mxu0  ;;  %1737 = vmatmul.mubr.bf16.gmra.mrb[68].mxu0 %v1460_v3  ;;  %v1402_v22 = vmax.f32 %v1338_v9, 0.0  ;;  %v6435_v3 = vld [vmem:[#allocation2 + $0xd4] ss:$8 sps:$4 sm:$0xff]   ;;  %v6433_v9 = vld [vmem:[#allocation2 + $0xd0] ss:$8 sps:$4 sm:$0xff]  }
 0x1a4   : > { %v1341_v20 = vadd.f32 %v7588_v19, %v992_v16  ;;  %v1403_v24 = vmax.f32 %v1339_v12, 0.0  ;;  %2213 = vmatprep.subr.bf16.mxu1 %v6435_v3  ;;  %v6438_v7 = vld [vmem:[#allocation2 + $0xe4] ss:$8 sps:$4 sm:$0xff]  }
 0x1a5   : > { %v1404_v23 = vmax.f32 %v1340_v13, 0.0  ;;  %2214 = vmatpush1.bf16.msra.mxu1 %v6433_v9 }
 0x1a6   : > { %v1405_v37 = vmax.f32 %v1341_v20, 0.0  ;;  %2215 = vmatprep.subr.bf16.mxu1 %v6438_v7 }
 0x1a7   : > { %v1462_v25 = vpack.c.bf16 %v1404_v23, %v1402_v22  ;;  %v6436_v23 = vld [vmem:[#allocation2 + $0xe0] ss:$8 sps:$4 sm:$0xff]  }
 0x1a8   : > { %v996_v28 = vpop.f32.mrb[12].mxu0  ;;  %v1463_v29 = vpack.c.bf16 %v1405_v37, %v1403_v24 }
 0x1a9   : > { %v1342_v31 = vadd.f32 %v7585_v18, %v996_v28  ;;  %v998_v33 = vpop.f32.mrb[13].mxu0  ;;  %2216 = vmatpush1.bf16.msra.mxu1 %v6436_v23 }
 0x1aa   : > { %v1343_v34 = vadd.f32 %v7588_v19, %v998_v33  ;;  %v1000_v35 = vpop.f32.mrb[14].mxu0  ;;  %1746 = vmatprep.mubr.bf16.mxu0 %v1463_v29 }
 0x1ab   : > { %v1344_v36 = vadd.f32 %v7585_v18, %v1000_v35  ;;  %v1002_v38 = vpop.f32.mrb[15].mxu0  ;;  %1747 = vmatmul.mubr.bf16.gmra.mrb[72].mxu0 %v1462_v25  ;;  %v1406_v41 = vmax.f32 %v1342_v31, 0.0 }
 0x1ac   : > { %v1345_v27 = vadd.f32 %v7588_v19, %v1002_v38  ;;  %v1407_v44 = vmax.f32 %v1343_v34, 0.0 }
 0x1ad   : > { %v1408_v43 = vmax.f32 %v1344_v36, 0.0 }
 0x1ae   : > { %v1409_v42 = vmax.f32 %v1345_v27, 0.0 }
 0x1af   : > { %v1464_v45 = vpack.c.bf16 %v1408_v43, %v1406_v41 }
 0x1b0   : > { %v1006_v48 = vpop.f32.mrb[16].mxu0  ;;  %v1465_v49 = vpack.c.bf16 %v1409_v42, %v1407_v44 }
 0x1b1   : > { %v1346_v55 = vadd.f32 %v7585_v18, %v1006_v48  ;;  %v1008_v56 = vpop.f32.mrb[17].mxu0 }
 0x1b2   : > { %v1347_v61 = vadd.f32 %v7588_v19, %v1008_v56  ;;  %v1010_v62 = vpop.f32.mrb[18].mxu0  ;;  %1756 = vmatprep.mubr.bf16.mxu0 %v1465_v49 }
 0x1b3   : > { %v1348_v63 = vadd.f32 %v7585_v18, %v1010_v62  ;;  %v1012_v1 = vpop.f32.mrb[19].mxu0  ;;  %1757 = vmatmul.mubr.bf16.gmra.mrb[76].mxu0 %v1464_v45  ;;  %v1410_v4 = vmax.f32 %v1346_v55, 0.0 }
 0x1b4   : > { %v1349_v32 = vadd.f32 %v7588_v19, %v1012_v1  ;;  %v1411_v6 = vmax.f32 %v1347_v61, 0.0 }
 0x1b5   : > { %v1412_v5 = vmax.f32 %v1348_v63, 0.0 }
 0x1b6   : > { %v1413_v47 = vmax.f32 %v1349_v32, 0.0 }
 0x1b7   : > { %v1466_v8 = vpack.c.bf16 %v1412_v5, %v1410_v4 }
 0x1b8   : > { %v1016_v11 = vpop.f32.mrb[20].mxu0  ;;  %v1467_v12 = vpack.c.bf16 %v1413_v47, %v1411_v6 }
 0x1b9   : > { %v1350_v13 = vadd.f32 %v7585_v18, %v1016_v11  ;;  %v1018_v16 = vpop.f32.mrb[21].mxu0 }
 0x1ba   : > { %v1351_v17 = vadd.f32 %v7588_v19, %v1018_v16  ;;  %v1020_v20 = vpop.f32.mrb[22].mxu0  ;;  %1766 = vmatprep.mubr.bf16.mxu0 %v1467_v12 }
 0x1bb   : > { %v1352_v21 = vadd.f32 %v7585_v18, %v1020_v20  ;;  %v1022_v22 = vpop.f32.mrb[23].mxu0  ;;  %1767 = vmatmul.mubr.bf16.gmra.mrb[80].mxu0 %v1466_v8  ;;  %v1414_v37 = vmax.f32 %v1350_v13, 0.0 }
 0x1bc   : > { %v1353_v24 = vadd.f32 %v7588_v19, %v1022_v22  ;;  %v1415_v26 = vmax.f32 %v1351_v17, 0.0 }
 0x1bd   : > { %v1416_v25 = vmax.f32 %v1352_v21, 0.0 }
 0x1be   : > { %v1417_v28 = vmax.f32 %v1353_v24, 0.0 }
 0x1bf   : > { %v1468_v51 = vpack.c.bf16 %v1416_v25, %v1414_v37 }
 0x1c0   : > { %v1026_v29 = vpop.f32.mrb[24].mxu0  ;;  %v1469_v30 = vpack.c.bf16 %v1417_v28, %v1415_v26 }
 0x1c1   : > { %v1354_v31 = vadd.f32 %v7585_v18, %v1026_v29  ;;  %v1028_v33 = vpop.f32.mrb[25].mxu0 }
 0x1c2   : > { %v1355_v34 = vadd.f32 %v7588_v19, %v1028_v33  ;;  %v1030_v35 = vpop.f32.mrb[26].mxu0  ;;  %1776 = vmatprep.mubr.bf16.mxu0 %v1469_v30 }
 0x1c3   : > { %v1356_v36 = vadd.f32 %v7585_v18, %v1030_v35  ;;  %v1032_v38 = vpop.f32.mrb[27].mxu0  ;;  %1777 = vmatmul.mubr.bf16.gmra.mrb[84].mxu0 %v1468_v51  ;;  %v1418_v27 = vmax.f32 %v1354_v31, 0.0 }
 0x1c4   : > { %v1357_v39 = vadd.f32 %v7588_v19, %v1032_v38  ;;  %v1419_v41 = vmax.f32 %v1355_v34, 0.0 }
 0x1c5   : > { %v1420_v40 = vmax.f32 %v1356_v36, 0.0 }
 0x1c6   : > { %v1421_v43 = vmax.f32 %v1357_v39, 0.0 }
 0x1c7   : > { %v1470_v44 = vpack.c.bf16 %v1420_v40, %v1418_v27 }
 0x1c8   : > { %v1036_v42 = vpop.f32.mrb[28].mxu0  ;;  %v1471_v45 = vpack.c.bf16 %v1421_v43, %v1419_v41 }
 0x1c9   : > { %v1358_v52 = vadd.f32 %v7585_v18, %v1036_v42  ;;  %v1038_v46 = vpop.f32.mrb[29].mxu0 }
 0x1ca   : > { %v1359_v48 = vadd.f32 %v7588_v19, %v1038_v46  ;;  %v1040_v49 = vpop.f32.mrb[30].mxu0  ;;  %1786 = vmatprep.mubr.bf16.mxu0 %v1471_v45 }
 0x1cb   : > { %v1360_v50 = vadd.f32 %v7585_v18, %v1040_v49  ;;  %v1042_v55 = vpop.f32.mrb[31].mxu0  ;;  %1787 = vmatmul.mubr.bf16.gmra.mrb[88].mxu0 %v1470_v44  ;;  %v1422_v61 = vmax.f32 %v1358_v52, 0.0 }
 0x1cc   : > { %v1361_v56 = vadd.f32 %v7588_v19, %v1042_v55  ;;  %v1423_v63 = vmax.f32 %v1359_v48, 0.0 }
 0x1cd   : > { %v1424_v62 = vmax.f32 %v1360_v50, 0.0 }
 0x1ce   : > { %v1425_v1 = vmax.f32 %v1361_v56, 0.0 }
 0x1cf   : > { %v1472_v2 = vpack.c.bf16 %v1424_v62, %v1422_v61 }
 0x1d0   : > { %v1046_v32 = vpop.f32.mrb[32].mxu0  ;;  %v1473_v3 = vpack.c.bf16 %v1425_v1, %v1423_v63 }
 0x1d1   : > { %v1362_v53 = vadd.f32 %v7585_v18, %v1046_v32  ;;  %v1048_v4 = vpop.f32.mrb[33].mxu0 }
 0x1d2   : > { %v1363_v5 = vadd.f32 %v7588_v19, %v1048_v4  ;;  %v1050_v6 = vpop.f32.mrb[34].mxu0  ;;  %1796 = vmatprep.mubr.bf16.mxu0 %v1473_v3 }
 0x1d3   : > { %v1364_v47 = vadd.f32 %v7585_v18, %v1050_v6  ;;  %v1052_v8 = vpop.f32.mrb[35].mxu0  ;;  %1797 = vmatmul.mubr.bf16.gmra.mrb[92].mxu0 %v1472_v2  ;;  %v1426_v11 = vmax.f32 %v1362_v53, 0.0 }
 0x1d4   : > { %v1365_v9 = vadd.f32 %v7588_v19, %v1052_v8  ;;  %v1427_v7 = vmax.f32 %v1363_v5, 0.0 }
 0x1d5   : > { %v1428_v12 = vmax.f32 %v1364_v47, 0.0  ;;  %v6441_v47 = vld [vmem:[#allocation2 + $0xf4] ss:$8 sps:$4 sm:$0xff]  }
 0x1d6   : > { %v1429_v13 = vmax.f32 %v1365_v9, 0.0  ;;  %v6439_v9 = vld [vmem:[#allocation2 + $0xf0] ss:$8 sps:$4 sm:$0xff]   ;;  %2217 = vmatprep.subr.bf16.mxu1 %v6441_v47 }
 0x1d7   : > { %v1474_v16 = vpack.c.bf16 %v1428_v12, %v1426_v11  ;;  %2218 = vmatpush1.bf16.msra.mxu1 %v6439_v9  ;;  %v6451_v47 = vld [vmem:[#allocation4 + $0x30] ss:$8 sps:$4 sm:$0xff]  }
 0x1d8   : > { %v1056_v17 = vpop.f32.mrb[36].mxu0  ;;  %v1475_v20 = vpack.c.bf16 %v1429_v13, %v1427_v7 }
 0x1d9   : > { %v1366_v54 = vadd.f32 %v7585_v18, %v1056_v17  ;;  %v1058_v21 = vpop.f32.mrb[37].mxu0 }
 0x1da   : > { %v1367_v22 = vadd.f32 %v7588_v19, %v1058_v21  ;;  %v1060_v23 = vpop.f32.mrb[38].mxu0  ;;  %1806 = vmatprep.mubr.bf16.mxu0 %v1475_v20 }
 0x1db   : > { %v1368_v24 = vadd.f32 %v7585_v18, %v1060_v23  ;;  %v1062_v37 = vpop.f32.mrb[39].mxu0  ;;  %1807 = vmatmul.mubr.bf16.gmra.mrb[96].mxu0 %v1474_v16  ;;  %v1430_v26 = vmax.f32 %v1366_v54, 0.0 }
 0x1dc   : > { %v1369_v25 = vadd.f32 %v7588_v19, %v1062_v37  ;;  %v1431_v51 = vmax.f32 %v1367_v22, 0.0 }
 0x1dd   : > { %v1432_v28 = vmax.f32 %v1368_v24, 0.0 }
 0x1de   : > { %v1433_v29 = vmax.f32 %v1369_v25, 0.0 }
 0x1df   : > { %v1476_v30 = vpack.c.bf16 %v1432_v28, %v1430_v26 }
 0x1e0   : > { %v1066_v31 = vpop.f32.mrb[40].mxu0  ;;  %v1477_v33 = vpack.c.bf16 %v1433_v29, %v1431_v51 }
 0x1e1   : > { %v1370_v57 = vadd.f32 %v7585_v18, %v1066_v31  ;;  %v1068_v34 = vpop.f32.mrb[41].mxu0 }
 0x1e2   : > { %v1371_v35 = vadd.f32 %v7588_v19, %v1068_v34  ;;  %v1070_v36 = vpop.f32.mrb[42].mxu0  ;;  %1816 = vmatprep.mubr.bf16.mxu0 %v1477_v33 }
 0x1e3   : > { %v1372_v38 = vadd.f32 %v7585_v18, %v1070_v36  ;;  %v1072_v39 = vpop.f32.mrb[43].mxu0  ;;  %1817 = vmatmul.mubr.bf16.gmra.mrb[100].mxu0 %v1476_v30  ;;  %v1434_v40 = vmax.f32 %v1370_v57, 0.0 }
 0x1e4   : > { %v1373_v27 = vadd.f32 %v7588_v19, %v1072_v39  ;;  %v1435_v43 = vmax.f32 %v1371_v35, 0.0 }
 0x1e5   : > { %v1436_v41 = vmax.f32 %v1372_v38, 0.0 }
 0x1e6   : > { %v1437_v44 = vmax.f32 %v1373_v27, 0.0 }
 0x1e7   : > { %v1478_v42 = vpack.c.bf16 %v1436_v41, %v1434_v40 }
 0x1e8   : > { %v1076_v45 = vpop.f32.mrb[44].mxu0  ;;  %v1479_v52 = vpack.c.bf16 %v1437_v44, %v1435_v43 }
 0x1e9   : > { %v1374_v58 = vadd.f32 %v7585_v18, %v1076_v45  ;;  %v1078_v46 = vpop.f32.mrb[45].mxu0 }
 0x1ea   : > { %v1375_v48 = vadd.f32 %v7588_v19, %v1078_v46  ;;  %v1080_v49 = vpop.f32.mrb[46].mxu0  ;;  %1826 = vmatprep.mubr.bf16.mxu0 %v1479_v52 }
 0x1eb   : > { %v1376_v50 = vadd.f32 %v7585_v18, %v1080_v49  ;;  %v1082_v55 = vpop.f32.mrb[47].mxu0  ;;  %1827 = vmatmul.mubr.bf16.gmra.mrb[104].mxu0 %v1478_v42  ;;  %v1438_v61 = vmax.f32 %v1374_v58, 0.0 }
 0x1ec   : > { %v1377_v56 = vadd.f32 %v7588_v19, %v1082_v55  ;;  %v1439_v63 = vmax.f32 %v1375_v48, 0.0 }
 0x1ed   : > { %v1440_v62 = vmax.f32 %v1376_v50, 0.0 }
 0x1ee   : > { %v1441_v1 = vmax.f32 %v1377_v56, 0.0 }
 0x1ef   : > { %v1480_v2 = vpack.c.bf16 %v1440_v62, %v1438_v61 }
 0x1f0   : > { %v1086_v32 = vpop.f32.mrb[48].mxu0  ;;  %v1481_v3 = vpack.c.bf16 %v1441_v1, %v1439_v63 }
 0x1f1   : > { %v1378_v59 = vadd.f32 %v7585_v18, %v1086_v32  ;;  %v1088_v53 = vpop.f32.mrb[49].mxu0  ;;  %v6442_v32 = vld [vmem:[#allocation4] ss:$8 sps:$4 sm:$0xff]  }
 0x1f2   : > { %v1379_v0 = vadd.f32 %v7588_v19, %v1088_v53  ;;  %v1090_v4 = vpop.f32.mrb[50].mxu0  ;;  %1836 = vmatprep.mubr.bf16.mxu0 %v1481_v3  ;;  %v6444_v3 = vld [vmem:[#allocation4 + $0x4] ss:$8 sps:$4 sm:$0xff]   ;;  %v6447_v53 = vld [vmem:[#allocation4 + $0x14] ss:$8 sps:$4 sm:$0xff]  }
 0x1f3   : > { %v1380_v5 = vadd.f32 %v7585_v18, %v1090_v4  ;;  %v1092_v6 = vpop.f32.mrb[51].mxu0  ;;  %1837 = vmatmul.mubr.bf16.gmra.mrb[108].mxu0 %v1480_v2  ;;  %v1442_v11 = vmax.f32 %v1378_v59, 0.0  ;;  %2680 = vmatprep.subr.bf16.mxu0 %v6444_v3  ;;  %v6445_v59 = vld [vmem:[#allocation4 + $0x10] ss:$8 sps:$4 sm:$0xff]  }
 0x1f4   : > { %v1381_v8 = vadd.f32 %v7588_v19, %v1092_v6  ;;  %v1443_v7 = vmax.f32 %v1379_v0, 0.0  ;;  %2681 = vmatpush1.bf16.msra.mxu0 %v6442_v32  ;;  %v6450_v0 = vld [vmem:[#allocation4 + $0x24] ss:$8 sps:$4 sm:$0xff]  }
 0x1f5   : > { %v1444_v12 = vmax.f32 %v1380_v5, 0.0  ;;  %2682 = vmatprep.subr.bf16.mxu0 %v6447_v53 }
 0x1f6   : > { %v1445_v13 = vmax.f32 %v1381_v8, 0.0  ;;  %v6453_v8 = vld [vmem:[#allocation4 + $0x34] ss:$8 sps:$4 sm:$0xff]  }
 0x1f7   : > { %v1482_v16 = vpack.c.bf16 %v1444_v12, %v1442_v11 }
 0x1f8   : > { %v1096_v60 = vpop.f32.mrb[52].mxu0  ;;  %v1483_v17 = vpack.c.bf16 %v1445_v13, %v1443_v7  ;;  %2683 = vmatpush1.bf16.msra.mxu0 %v6445_v59  ;;  %v6469_v59 = vld [vmem:[#allocation4 + $0x90] ss:$8 sps:$4 sm:$0xff]  }
 0x1f9   : > { %v1382_v20 = vadd.f32 %v7585_v18, %v1096_v60  ;;  %v1098_v54 = vpop.f32.mrb[53].mxu0  ;;  %2684 = vmatprep.subr.bf16.mxu0 %v6450_v0  ;;  %v6454_v60 = vld [vmem:[#allocation4 + $0x40] ss:$8 sps:$4 sm:$0xff]  }
 0x1fa   : > { %v1383_v21 = vadd.f32 %v7588_v19, %v1098_v54  ;;  %v1100_v22 = vpop.f32.mrb[54].mxu0  ;;  %1846 = vmatprep.mubr.bf16.mxu0 %v1483_v17  ;;  %v6456_v17 = vld [vmem:[#allocation4 + $0x44] ss:$8 sps:$4 sm:$0xff]   ;;  %v6459_v54 = vld [vmem:[#allocation4 + $0x54] ss:$8 sps:$4 sm:$0xff]  }
 0x1fb   : > { %v1384_v23 = vadd.f32 %v7585_v18, %v1100_v22  ;;  %v1102_v24 = vpop.f32.mrb[55].mxu0  ;;  %1847 = vmatmul.mubr.bf16.gmra.mrb[112].mxu0 %v1482_v16  ;;  %v1446_v25 = vmax.f32 %v1382_v20, 0.0 }
 0x1fc   : > { %v1385_v37 = vadd.f32 %v7588_v19, %v1102_v24  ;;  %v1447_v28 = vmax.f32 %v1383_v21, 0.0 }
 0x1fd   : > { %v1448_v26 = vmax.f32 %v1384_v23, 0.0 }
 0x1fe   : > { %v1449_v51 = vmax.f32 %v1385_v37, 0.0 }
 0x1ff   : > { %v1484_v29 = vpack.c.bf16 %v1448_v26, %v1446_v25  ;;  %v6457_v25 = vld [vmem:[#allocation4 + $0x50] ss:$8 sps:$4 sm:$0xff]  }
 0x200   : > { %v1106_v30 = vpop.f32.mrb[56].mxu0  ;;  %v1485_v31 = vpack.c.bf16 %v1449_v51, %v1447_v28  ;;  %v6462_v51 = vld [vmem:[#allocation4 + $0x64] ss:$8 sps:$4 sm:$0xff]  }
 0x201   : > { %v1386_v33 = vadd.f32 %v7585_v18, %v1106_v30  ;;  %v1108_v57 = vpop.f32.mrb[57].mxu0 }
 0x202   : > { %v1387_v34 = vadd.f32 %v7588_v19, %v1108_v57  ;;  %v1110_v35 = vpop.f32.mrb[58].mxu0  ;;  %1856 = vmatprep.mubr.bf16.mxu0 %v1485_v31 }
 0x203   : > { %v1388_v36 = vadd.f32 %v7585_v18, %v1110_v35  ;;  %v1112_v38 = vpop.f32.mrb[59].mxu0  ;;  %1857 = vmatmul.mubr.bf16.gmra.mrb[116].mxu0 %v1484_v29  ;;  %v1450_v27 = vmax.f32 %v1386_v33, 0.0  ;;  %v6460_v35 = vld [vmem:[#allocation4 + $0x60] ss:$8 sps:$4 sm:$0xff]  }
 0x204   : > { %v1389_v39 = vadd.f32 %v7588_v19, %v1112_v38  ;;  %v1451_v41 = vmax.f32 %v1387_v34, 0.0  ;;  %v6465_v38 = vld [vmem:[#allocation4 + $0x74] ss:$8 sps:$4 sm:$0xff]  }
 0x205   : > { %v1452_v40 = vmax.f32 %v1388_v36, 0.0 }
 0x206   : > { %v1453_v43 = vmax.f32 %v1389_v39, 0.0 }
 0x207   : > { %v1486_v44 = vpack.c.bf16 %v1452_v40, %v1450_v27 }
 0x208   : > { %v1116_v42 = vpop.f32.mrb[60].mxu0  ;;  %v1487_v45 = vpack.c.bf16 %v1453_v43, %v1451_v41 }
 0x209   : > { %v1390_v52 = vadd.f32 %v7585_v18, %v1116_v42  ;;  %v1118_v58 = vpop.f32.mrb[61].mxu0 }
 0x20a   : > { %v1391_v46 = vadd.f32 %v7588_v19, %v1118_v58  ;;  %v1120_v48 = vpop.f32.mrb[62].mxu0  ;;  %1866 = vmatprep.mubr.bf16.mxu0 %v1487_v45 }
 0x20b   : > { %v1392_v49 = vadd.f32 %v7585_v18, %v1120_v48  ;;  %v1122_v50 = vpop.f32.mrb[63].mxu0  ;;  %1867 = vmatmul.mubr.bf16.gmra.mrb[120].mxu0 %v1486_v44  ;;  %v1454_v56 = vmax.f32 %v1390_v52, 0.0  ;;  %v1522_v18 = vld [vmem:[%s8549_s4] sm:$0x3]  ;;  %v6463_v44 = vld [vmem:[#allocation4 + $0x70] ss:$8 sps:$4 sm:$0xff]  }
 0x20c   : > { %v1393_v55 = vadd.f32 %v7588_v19, %v1122_v50  ;;  %v1455_v62 = vmax.f32 %v1391_v46, 0.0  ;;  %v6448_v19 = vld [vmem:[#allocation4 + $0x20] ss:$8 sps:$4 sm:$0xff]   ;;  %v7696_v4 = vrot.slane %v1522_v18, %v7574_v14  ;;  %v7699_v5 = vrot.slane %v1522_v18, %v7581_v15  ;;  %v6468_v52 = vld [vmem:[#allocation4 + $0x84] ss:$8 sps:$4 sm:$0xff]  }
 0x20d   : > { %v1456_v61 = vmax.f32 %v1392_v49, 0.0  ;;  %2685 = vmatpush1.bf16.msra.mxu0 %v6448_v19  ;;  %v6474_v19 = vld [vmem:[#allocation4 + $0xa4] ss:$8 sps:$4 sm:$0xff]  }
 0x20e   : > { %v1457_v63 = vmax.f32 %v1393_v55, 0.0  ;;  %2686 = vmatprep.subr.bf16.mxu0 %v6453_v8 }
 0x20f   : > { %v1488_v1 = vpack.c.bf16 %v1456_v61, %v1454_v56  ;;  %v6466_v56 = vld [vmem:[#allocation4 + $0x80] ss:$8 sps:$4 sm:$0xff]  }
 0x210   : > { %v1489_v2 = vpack.c.bf16 %v1457_v63, %v1455_v62  ;;  %v6471_v62 = vld [vmem:[#allocation4 + $0x94] ss:$8 sps:$4 sm:$0xff]  }
 0x211   : > { %2687 = vmatpush1.bf16.msra.mxu0 %v6451_v47 }
 0x212   : > { %1876 = vmatprep.mubr.bf16.mxu0 %v1489_v2  ;;  %2688 = vmatprep.subr.bf16.mxu0 %v6456_v17 }
 0x213   : > { %1877 = vmatmul.mubr.bf16.gmra.mrb[124].mxu0 %v1488_v1 }
 0x215   : > { %2689 = vmatpush1.bf16.msra.mxu0 %v6454_v60 }
 0x216   : > { %2690 = vmatprep.subr.bf16.mxu0 %v6459_v54 }
 0x219   : > { %2691 = vmatpush1.bf16.msra.mxu0 %v6457_v25 }
 0x21a   : > { %2692 = vmatprep.subr.bf16.mxu0 %v6462_v51 }
 0x21d   : > { %2693 = vmatpush1.bf16.msra.mxu0 %v6460_v35 }
 0x21e   : > { %2694 = vmatprep.subr.bf16.mxu0 %v6465_v38 }
 0x221   : > { %2695 = vmatpush1.bf16.msra.mxu0 %v6463_v44 }
 0x222   : > { %2696 = vmatprep.subr.bf16.mxu0 %v6468_v52 }
 0x225   : > { %2697 = vmatpush1.bf16.msra.mxu0 %v6466_v56 }
 0x226   : > { %2698 = vmatprep.subr.bf16.mxu0 %v6471_v62 }
 0x229   : > { %2699 = vmatpush1.bf16.msra.mxu0 %v6469_v59 }
 0x22a   : > { %2700 = vmatprep.subr.bf16.mxu0 %v6474_v19 }
 0x26e   : > { %v1728_v6 = vpop.f32.mrb[64].mxu0 }
 0x26f   : > { %v1729_v9 = vadd.f32 %v1728_v6, %v7696_v4  ;;  %v1730_v11 = vpop.f32.mrb[65].mxu0 }
 0x270   : > { %v1731_v12 = vadd.f32 %v1730_v11, %v7699_v5  ;;  %v1732_v7 = vpop.f32.mrb[66].mxu0 }
 0x271   : > { %v1733_v13 = vadd.f32 %v1732_v7, %v7696_v4  ;;  %v1734_v16 = vpop.f32.mrb[67].mxu0  ;;  %v1887_v21 = vmax.f32 %v1729_v9, 0.0 }
 0x272   : > { %v1735_v20 = vadd.f32 %v1734_v16, %v7699_v5  ;;  %v1888_v23 = vmax.f32 %v1731_v12, 0.0  ;;  %v6472_v12 = vld [vmem:[#allocation4 + $0xa0] ss:$8 sps:$4 sm:$0xff]  }
 0x273   : > { %v1889_v22 = vmax.f32 %v1733_v13, 0.0  ;;  %v6477_v13 = vld [vmem:[#allocation4 + $0xb4] ss:$8 sps:$4 sm:$0xff]   ;;  %2701 = vmatpush1.bf16.msra.mxu0 %v6472_v12 }
 0x274   : > { %v1890_v24 = vmax.f32 %v1735_v20, 0.0  ;;  %2702 = vmatprep.subr.bf16.mxu0 %v6477_v13 }
 0x275   : > { %v1951_v37 = vpack.c.bf16 %v1889_v22, %v1887_v21  ;;  %v6475_v21 = vld [vmem:[#allocation4 + $0xb0] ss:$8 sps:$4 sm:$0xff]  }
 0x276   : > { %v1952_v26 = vpack.c.bf16 %v1890_v24, %v1888_v23  ;;  %v1738_v28 = vpop.f32.mrb[68].mxu0  ;;  %v6480_v24 = vld [vmem:[#allocation4 + $0xc4] ss:$8 sps:$4 sm:$0xff]  }
 0x277   : > { %v1739_v29 = vadd.f32 %v1738_v28, %v7696_v4  ;;  %v1740_v30 = vpop.f32.mrb[69].mxu0  ;;  %2703 = vmatpush1.bf16.msra.mxu0 %v6475_v21 }
 0x278   : > { %v1741_v31 = vadd.f32 %v1740_v30, %v7699_v5  ;;  %v1742_v33 = vpop.f32.mrb[70].mxu0  ;;  %2219 = vmatprep.mubr.bf16.mxu1 %v1952_v26  ;;  %v6478_v30 = vld [vmem:[#allocation4 + $0xc0] ss:$8 sps:$4 sm:$0xff]   ;;  %2704 = vmatprep.subr.bf16.mxu0 %v6480_v24 }
 0x279   : > { %v1743_v57 = vadd.f32 %v1742_v33, %v7696_v4  ;;  %v1744_v34 = vpop.f32.mrb[71].mxu0  ;;  %2220 = vmatmul.mubr.bf16.vlgmr.msra.gmra.mrb[64].mxu1 %v1951_v37  ;;  %v1891_v39 = vmax.f32 %v1739_v29, 0.0  ;;  %v6483_v33 = vld [vmem:[#allocation4 + $0xd4] ss:$8 sps:$4 sm:$0xff]  }
 0x27a   : > { %v1745_v36 = vadd.f32 %v1744_v34, %v7699_v5  ;;  %v1892_v40 = vmax.f32 %v1741_v31, 0.0 }
 0x27b   : > { %v1893_v27 = vmax.f32 %v1743_v57, 0.0  ;;  %2705 = vmatpush1.bf16.msra.mxu0 %v6478_v30 }
 0x27c   : > { %v1894_v41 = vmax.f32 %v1745_v36, 0.0  ;;  %2706 = vmatprep.subr.bf16.mxu0 %v6483_v33 }
 0x27d   : > { %v1953_v43 = vpack.c.bf16 %v1893_v27, %v1891_v39  ;;  %v6481_v39 = vld [vmem:[#allocation4 + $0xd0] ss:$8 sps:$4 sm:$0xff]  }
 0x27e   : > { %v1954_v42 = vpack.c.bf16 %v1894_v41, %v1892_v40  ;;  %v1748_v45 = vpop.f32.mrb[72].mxu0  ;;  %v6486_v41 = vld [vmem:[#allocation4 + $0xe4] ss:$8 sps:$4 sm:$0xff]  }
 0x27f   : > { %v1749_v58 = vadd.f32 %v1748_v45, %v7696_v4  ;;  %v1750_v46 = vpop.f32.mrb[73].mxu0  ;;  %2707 = vmatpush1.bf16.msra.mxu0 %v6481_v39 }
 0x280   : > { %v1751_v48 = vadd.f32 %v1750_v46, %v7699_v5  ;;  %v1752_v49 = vpop.f32.mrb[74].mxu0  ;;  %2229 = vmatprep.mubr.bf16.mxu1 %v1954_v42  ;;  %v6484_v46 = vld [vmem:[#allocation4 + $0xe0] ss:$8 sps:$4 sm:$0xff]   ;;  %2708 = vmatprep.subr.bf16.mxu0 %v6486_v41 }
 0x281   : > { %v1753_v50 = vadd.f32 %v1752_v49, %v7696_v4  ;;  %v1754_v55 = vpop.f32.mrb[75].mxu0  ;;  %2230 = vmatmul.mubr.bf16.gmra.mrb[68].mxu1 %v1953_v43  ;;  %v1895_v63 = vmax.f32 %v1749_v58, 0.0 }
 0x282   : > { %v1755_v61 = vadd.f32 %v1754_v55, %v7699_v5  ;;  %v1896_v2 = vmax.f32 %v1751_v48, 0.0 }
 0x283   : > { %v1897_v1 = vmax.f32 %v1753_v50, 0.0  ;;  %2709 = vmatpush1.bf16.msra.mxu0 %v6484_v46 }
 0x284   : > { %v1898_v32 = vmax.f32 %v1755_v61, 0.0 }
 0x285   : > { %v1955_v3 = vpack.c.bf16 %v1897_v1, %v1895_v63 }
 0x286   : > { %v1956_v53 = vpack.c.bf16 %v1898_v32, %v1896_v2  ;;  %v1758_v18 = vpop.f32.mrb[76].mxu0 }
 0x287   : > { %v1759_v0 = vadd.f32 %v1758_v18, %v7696_v4  ;;  %v1760_v6 = vpop.f32.mrb[77].mxu0 }
 0x288   : > { %v1761_v47 = vadd.f32 %v1760_v6, %v7699_v5  ;;  %v1762_v8 = vpop.f32.mrb[78].mxu0  ;;  %2239 = vmatprep.mubr.bf16.mxu1 %v1956_v53 }
 0x289   : > { %v1763_v9 = vadd.f32 %v1762_v8, %v7696_v4  ;;  %v1764_v11 = vpop.f32.mrb[79].mxu0  ;;  %2240 = vmatmul.mubr.bf16.gmra.mrb[72].mxu1 %v1955_v3  ;;  %v1899_v16 = vmax.f32 %v1759_v0, 0.0 }
 0x28a   : > { %v1765_v7 = vadd.f32 %v1764_v11, %v7699_v5  ;;  %v1900_v17 = vmax.f32 %v1761_v47, 0.0 }
 0x28b   : > { %v1901_v60 = vmax.f32 %v1763_v9, 0.0 }
 0x28c   : > { %v1902_v20 = vmax.f32 %v1765_v7, 0.0 }
 0x28d   : > { %v1957_v54 = vpack.c.bf16 %v1901_v60, %v1899_v16 }
 0x28e   : > { %v1958_v22 = vpack.c.bf16 %v1902_v20, %v1900_v17  ;;  %v1768_v23 = vpop.f32.mrb[80].mxu0 }
 0x28f   : > { %v1769_v37 = vadd.f32 %v1768_v23, %v7696_v4  ;;  %v1770_v25 = vpop.f32.mrb[81].mxu0 }
 0x290   : > { %v1771_v26 = vadd.f32 %v1770_v25, %v7699_v5  ;;  %v1772_v28 = vpop.f32.mrb[82].mxu0  ;;  %2249 = vmatprep.mubr.bf16.mxu1 %v1958_v22 }
 0x291   : > { %v1773_v51 = vadd.f32 %v1772_v28, %v7696_v4  ;;  %v1774_v29 = vpop.f32.mrb[83].mxu0  ;;  %2250 = vmatmul.mubr.bf16.gmra.mrb[76].mxu1 %v1957_v54  ;;  %v1903_v57 = vmax.f32 %v1769_v37, 0.0 }
 0x292   : > { %v1775_v31 = vadd.f32 %v1774_v29, %v7699_v5  ;;  %v1904_v35 = vmax.f32 %v1771_v26, 0.0 }
 0x293   : > { %v1905_v34 = vmax.f32 %v1773_v51, 0.0 }
 0x294   : > { %v1906_v36 = vmax.f32 %v1775_v31, 0.0 }
 0x295   : > { %v1959_v38 = vpack.c.bf16 %v1905_v34, %v1903_v57 }
 0x296   : > { %v1960_v27 = vpack.c.bf16 %v1906_v36, %v1904_v35  ;;  %v1778_v40 = vpop.f32.mrb[84].mxu0 }
 0x297   : > { %v1779_v43 = vadd.f32 %v1778_v40, %v7696_v4  ;;  %v1780_v44 = vpop.f32.mrb[85].mxu0 }
 0x298   : > { %v1781_v42 = vadd.f32 %v1780_v44, %v7699_v5  ;;  %v1782_v45 = vpop.f32.mrb[86].mxu0  ;;  %2259 = vmatprep.mubr.bf16.mxu1 %v1960_v27 }
 0x299   : > { %v1783_v52 = vadd.f32 %v1782_v45, %v7696_v4  ;;  %v1784_v58 = vpop.f32.mrb[87].mxu0  ;;  %2260 = vmatmul.mubr.bf16.gmra.mrb[80].mxu1 %v1959_v38  ;;  %v1907_v49 = vmax.f32 %v1779_v43, 0.0 }
 0x29a   : > { %v1785_v48 = vadd.f32 %v1784_v58, %v7699_v5  ;;  %v1908_v55 = vmax.f32 %v1781_v42, 0.0 }
 0x29b   : > { %v1909_v50 = vmax.f32 %v1783_v52, 0.0 }
 0x29c   : > { %v1910_v56 = vmax.f32 %v1785_v48, 0.0 }
 0x29d   : > { %v1961_v61 = vpack.c.bf16 %v1909_v50, %v1907_v49 }
 0x29e   : > { %v1962_v62 = vpack.c.bf16 %v1910_v56, %v1908_v55  ;;  %v1788_v63 = vpop.f32.mrb[88].mxu0 }
 0x29f   : > { %v1789_v1 = vadd.f32 %v1788_v63, %v7696_v4  ;;  %v1790_v2 = vpop.f32.mrb[89].mxu0 }
 0x2a0   : > { %v1791_v32 = vadd.f32 %v1790_v2, %v7699_v5  ;;  %v1792_v3 = vpop.f32.mrb[90].mxu0  ;;  %2269 = vmatprep.mubr.bf16.mxu1 %v1962_v62 }
 0x2a1   : > { %v1793_v59 = vadd.f32 %v1792_v3, %v7696_v4  ;;  %v1794_v53 = vpop.f32.mrb[91].mxu0  ;;  %2270 = vmatmul.mubr.bf16.gmra.mrb[84].mxu1 %v1961_v61  ;;  %v1911_v19 = vmax.f32 %v1789_v1, 0.0 }
 0x2a2   : > { %v1795_v18 = vadd.f32 %v1794_v53, %v7699_v5  ;;  %v1912_v6 = vmax.f32 %v1791_v32, 0.0 }
 0x2a3   : > { %v1913_v0 = vmax.f32 %v1793_v59, 0.0 }
 0x2a4   : > { %v1914_v47 = vmax.f32 %v1795_v18, 0.0 }
 0x2a5   : > { %v1963_v8 = vpack.c.bf16 %v1913_v0, %v1911_v19 }
 0x2a6   : > { %v1964_v9 = vpack.c.bf16 %v1914_v47, %v1912_v6  ;;  %v1798_v11 = vpop.f32.mrb[92].mxu0 }
 0x2a7   : > { %v1799_v12 = vadd.f32 %v1798_v11, %v7696_v4  ;;  %v1800_v7 = vpop.f32.mrb[93].mxu0 }
 0x2a8   : > { %v1801_v13 = vadd.f32 %v1800_v7, %v7699_v5  ;;  %v1802_v16 = vpop.f32.mrb[94].mxu0  ;;  %2279 = vmatprep.mubr.bf16.mxu1 %v1964_v9 }
 0x2a9   : > { %v1803_v60 = vadd.f32 %v1802_v16, %v7696_v4  ;;  %v1804_v17 = vpop.f32.mrb[95].mxu0  ;;  %2280 = vmatmul.mubr.bf16.gmra.mrb[88].mxu1 %v1963_v8  ;;  %v1915_v54 = vmax.f32 %v1799_v12, 0.0 }
 0x2aa   : > { %v1805_v20 = vadd.f32 %v1804_v17, %v7699_v5  ;;  %v1916_v22 = vmax.f32 %v1801_v13, 0.0 }
 0x2ab   : > { %v1917_v21 = vmax.f32 %v1803_v60, 0.0 }
 0x2ac   : > { %v1918_v23 = vmax.f32 %v1805_v20, 0.0 }
 0x2ad   : > { %v1965_v24 = vpack.c.bf16 %v1917_v21, %v1915_v54 }
 0x2ae   : > { %v1966_v37 = vpack.c.bf16 %v1918_v23, %v1916_v22  ;;  %v1808_v25 = vpop.f32.mrb[96].mxu0 }
 0x2af   : > { %v1809_v26 = vadd.f32 %v1808_v25, %v7696_v4  ;;  %v1810_v28 = vpop.f32.mrb[97].mxu0 }
 0x2b0   : > { %v1811_v51 = vadd.f32 %v1810_v28, %v7699_v5  ;;  %v1812_v29 = vpop.f32.mrb[98].mxu0  ;;  %2289 = vmatprep.mubr.bf16.mxu1 %v1966_v37 }
 0x2b1   : > { %v1813_v30 = vadd.f32 %v1812_v29, %v7696_v4  ;;  %v1814_v31 = vpop.f32.mrb[99].mxu0  ;;  %2290 = vmatmul.mubr.bf16.gmra.mrb[92].mxu1 %v1965_v24  ;;  %v1919_v57 = vmax.f32 %v1809_v26, 0.0  ;;  %v6489_v29 = vld [vmem:[#allocation4 + $0xf4] ss:$8 sps:$4 sm:$0xff]  }
 0x2b2   : > { %v1815_v33 = vadd.f32 %v1814_v31, %v7699_v5  ;;  %v1920_v35 = vmax.f32 %v1811_v51, 0.0  ;;  %v6487_v31 = vld [vmem:[#allocation4 + $0xf0] ss:$8 sps:$4 sm:$0xff]   ;;  %2710 = vmatprep.subr.bf16.mxu0 %v6489_v29 }
 0x2b3   : > { %v1921_v34 = vmax.f32 %v1813_v30, 0.0  ;;  %2711 = vmatpush1.bf16.msra.mxu0 %v6487_v31  ;;  %v6499_v29 = vld [vmem:[#allocation6 + $0x30] ss:$8 sps:$4 sm:$0xff]  }
 0x2b4   : > { %v1922_v36 = vmax.f32 %v1815_v33, 0.0 }
 0x2b5   : > { %v1967_v38 = vpack.c.bf16 %v1921_v34, %v1919_v57 }
 0x2b6   : > { %v1968_v39 = vpack.c.bf16 %v1922_v36, %v1920_v35  ;;  %v1818_v27 = vpop.f32.mrb[100].mxu0 }
 0x2b7   : > { %v1819_v40 = vadd.f32 %v1818_v27, %v7696_v4  ;;  %v1820_v41 = vpop.f32.mrb[101].mxu0 }
 0x2b8   : > { %v1821_v43 = vadd.f32 %v1820_v41, %v7699_v5  ;;  %v1822_v44 = vpop.f32.mrb[102].mxu0  ;;  %2299 = vmatprep.mubr.bf16.mxu1 %v1968_v39 }
 0x2b9   : > { %v1823_v42 = vadd.f32 %v1822_v44, %v7696_v4  ;;  %v1824_v45 = vpop.f32.mrb[103].mxu0  ;;  %2300 = vmatmul.mubr.bf16.gmra.mrb[96].mxu1 %v1967_v38  ;;  %v1923_v58 = vmax.f32 %v1819_v40, 0.0 }
 0x2ba   : > { %v1825_v52 = vadd.f32 %v1824_v45, %v7699_v5  ;;  %v1924_v48 = vmax.f32 %v1821_v43, 0.0 }
 0x2bb   : > { %v1925_v46 = vmax.f32 %v1823_v42, 0.0 }
 0x2bc   : > { %v1926_v49 = vmax.f32 %v1825_v52, 0.0 }
 0x2bd   : > { %v1969_v50 = vpack.c.bf16 %v1925_v46, %v1923_v58 }
 0x2be   : > { %v1970_v55 = vpack.c.bf16 %v1926_v49, %v1924_v48  ;;  %v1828_v56 = vpop.f32.mrb[104].mxu0 }
 0x2bf   : > { %v1829_v61 = vadd.f32 %v1828_v56, %v7696_v4  ;;  %v1830_v62 = vpop.f32.mrb[105].mxu0 }
 0x2c0   : > { %v1831_v63 = vadd.f32 %v1830_v62, %v7699_v5  ;;  %v1832_v1 = vpop.f32.mrb[106].mxu0  ;;  %2309 = vmatprep.mubr.bf16.mxu1 %v1970_v55 }
 0x2c1   : > { %v1833_v2 = vadd.f32 %v1832_v1, %v7696_v4  ;;  %v1834_v32 = vpop.f32.mrb[107].mxu0  ;;  %2310 = vmatmul.mubr.bf16.gmra.mrb[100].mxu1 %v1969_v50  ;;  %v1927_v59 = vmax.f32 %v1829_v61, 0.0 }
 0x2c2   : > { %v1835_v3 = vadd.f32 %v1834_v32, %v7699_v5  ;;  %v1928_v18 = vmax.f32 %v1831_v63, 0.0 }
 0x2c3   : > { %v1929_v53 = vmax.f32 %v1833_v2, 0.0 }
 0x2c4   : > { %v1930_v19 = vmax.f32 %v1835_v3, 0.0 }
 0x2c5   : > { %v1971_v0 = vpack.c.bf16 %v1929_v53, %v1927_v59 }
 0x2c6   : > { %v1972_v6 = vpack.c.bf16 %v1930_v19, %v1928_v18  ;;  %v1838_v47 = vpop.f32.mrb[108].mxu0 }
 0x2c7   : > { %v1839_v8 = vadd.f32 %v1838_v47, %v7696_v4  ;;  %v1840_v9 = vpop.f32.mrb[109].mxu0 }
 0x2c8   : > { %v1841_v11 = vadd.f32 %v1840_v9, %v7699_v5  ;;  %v1842_v12 = vpop.f32.mrb[110].mxu0  ;;  %2319 = vmatprep.mubr.bf16.mxu1 %v1972_v6 }
 0x2c9   : > { %v1843_v7 = vadd.f32 %v1842_v12, %v7696_v4  ;;  %v1844_v13 = vpop.f32.mrb[111].mxu0  ;;  %2320 = vmatmul.mubr.bf16.gmra.mrb[104].mxu1 %v1971_v0  ;;  %v1931_v60 = vmax.f32 %v1839_v8, 0.0 }
 0x2ca   : > { %v1845_v16 = vadd.f32 %v1844_v13, %v7699_v5  ;;  %v1932_v20 = vmax.f32 %v1841_v11, 0.0 }
 0x2cb   : > { %v1933_v17 = vmax.f32 %v1843_v7, 0.0 }
 0x2cc   : > { %v1934_v54 = vmax.f32 %v1845_v16, 0.0 }
 0x2cd   : > { %v1973_v21 = vpack.c.bf16 %v1933_v17, %v1931_v60 }
 0x2ce   : > { %v1974_v22 = vpack.c.bf16 %v1934_v54, %v1932_v20  ;;  %v1848_v23 = vpop.f32.mrb[112].mxu0 }
 0x2cf   : > { %v1849_v24 = vadd.f32 %v1848_v23, %v7696_v4  ;;  %v1850_v37 = vpop.f32.mrb[113].mxu0  ;;  %v6492_v23 = vld [vmem:[#allocation6 + $0x4] ss:$8 sps:$4 sm:$0xff]  }
 0x2d0   : > { %v1851_v25 = vadd.f32 %v1850_v37, %v7699_v5  ;;  %v1852_v26 = vpop.f32.mrb[114].mxu0  ;;  %2329 = vmatprep.mubr.bf16.mxu1 %v1974_v22  ;;  %v6490_v22 = vld [vmem:[#allocation6] ss:$8 sps:$4 sm:$0xff]   ;;  %3161 = vmatprep.subr.bf16.mxu1 %v6492_v23  ;;  %v6495_v37 = vld [vmem:[#allocation6 + $0x14] ss:$8 sps:$4 sm:$0xff]  }
 0x2d1   : > { %v1853_v28 = vadd.f32 %v1852_v26, %v7696_v4  ;;  %v1854_v51 = vpop.f32.mrb[115].mxu0  ;;  %2330 = vmatmul.mubr.bf16.gmra.mrb[108].mxu1 %v1973_v21  ;;  %v1935_v33 = vmax.f32 %v1849_v24, 0.0  ;;  %v6493_v24 = vld [vmem:[#allocation6 + $0x10] ss:$8 sps:$4 sm:$0xff]  }
 0x2d2   : > { %v1855_v30 = vadd.f32 %v1854_v51, %v7699_v5  ;;  %v1936_v34 = vmax.f32 %v1851_v25, 0.0  ;;  %3162 = vmatpush1.bf16.msra.mxu1 %v6490_v22  ;;  %v6498_v25 = vld [vmem:[#allocation6 + $0x24] ss:$8 sps:$4 sm:$0xff]  }
 0x2d3   : > { %v1937_v57 = vmax.f32 %v1853_v28, 0.0  ;;  %3163 = vmatprep.subr.bf16.mxu1 %v6495_v37 }
 0x2d4   : > { %v1938_v35 = vmax.f32 %v1855_v30, 0.0  ;;  %v6501_v30 = vld [vmem:[#allocation6 + $0x34] ss:$8 sps:$4 sm:$0xff]  }
 0x2d5   : > { %v1975_v36 = vpack.c.bf16 %v1937_v57, %v1935_v33 }
 0x2d6   : > { %v1976_v38 = vpack.c.bf16 %v1938_v35, %v1936_v34  ;;  %v1858_v39 = vpop.f32.mrb[116].mxu0  ;;  %3164 = vmatpush1.bf16.msra.mxu1 %v6493_v24  ;;  %v6517_v24 = vld [vmem:[#allocation6 + $0x90] ss:$8 sps:$4 sm:$0xff]  }
 0x2d7   : > { %v1859_v27 = vadd.f32 %v1858_v39, %v7696_v4  ;;  %v1860_v40 = vpop.f32.mrb[117].mxu0  ;;  %3165 = vmatprep.subr.bf16.mxu1 %v6498_v25  ;;  %v6504_v39 = vld [vmem:[#allocation6 + $0x44] ss:$8 sps:$4 sm:$0xff]  }
 0x2d8   : > { %v1861_v41 = vadd.f32 %v1860_v40, %v7699_v5  ;;  %v1862_v43 = vpop.f32.mrb[118].mxu0  ;;  %2339 = vmatprep.mubr.bf16.mxu1 %v1976_v38  ;;  %v6502_v38 = vld [vmem:[#allocation6 + $0x40] ss:$8 sps:$4 sm:$0xff]   ;;  %v6507_v40 = vld [vmem:[#allocation6 + $0x54] ss:$8 sps:$4 sm:$0xff]  }
 0x2d9   : > { %v1863_v44 = vadd.f32 %v1862_v43, %v7696_v4  ;;  %v1864_v42 = vpop.f32.mrb[119].mxu0  ;;  %2340 = vmatmul.mubr.bf16.gmra.mrb[112].mxu1 %v1975_v36  ;;  %v1939_v52 = vmax.f32 %v1859_v27, 0.0 }
 0x2da   : > { %v1865_v45 = vadd.f32 %v1864_v42, %v7699_v5  ;;  %v1940_v46 = vmax.f32 %v1861_v41, 0.0 }
 0x2db   : > { %v1941_v58 = vmax.f32 %v1863_v44, 0.0 }
 0x2dc   : > { %v1942_v48 = vmax.f32 %v1865_v45, 0.0 }
 0x2dd   : > { %v1977_v49 = vpack.c.bf16 %v1941_v58, %v1939_v52  ;;  %v6505_v52 = vld [vmem:[#allocation6 + $0x50] ss:$8 sps:$4 sm:$0xff]  }
 0x2de   : > { %v1978_v50 = vpack.c.bf16 %v1942_v48, %v1940_v46  ;;  %v1868_v55 = vpop.f32.mrb[120].mxu0  ;;  %v6510_v48 = vld [vmem:[#allocation6 + $0x64] ss:$8 sps:$4 sm:$0xff]  }
 0x2df   : > { %v1869_v56 = vadd.f32 %v1868_v55, %v7696_v4  ;;  %v1870_v61 = vpop.f32.mrb[121].mxu0 }
 0x2e0   : > { %v1871_v62 = vadd.f32 %v1870_v61, %v7699_v5  ;;  %v1872_v63 = vpop.f32.mrb[122].mxu0  ;;  %2349 = vmatprep.mubr.bf16.mxu1 %v1978_v50 }
 0x2e1   : > { %v1873_v1 = vadd.f32 %v1872_v63, %v7696_v4  ;;  %v1874_v2 = vpop.f32.mrb[123].mxu0  ;;  %2350 = vmatmul.mubr.bf16.gmra.mrb[116].mxu1 %v1977_v49  ;;  %v1943_v3 = vmax.f32 %v1869_v56, 0.0  ;;  %v6508_v63 = vld [vmem:[#allocation6 + $0x60] ss:$8 sps:$4 sm:$0xff]  }
 0x2e2   : > { %v1875_v32 = vadd.f32 %v1874_v2, %v7699_v5  ;;  %v1944_v53 = vmax.f32 %v1871_v62, 0.0  ;;  %v6513_v2 = vld [vmem:[#allocation6 + $0x74] ss:$8 sps:$4 sm:$0xff]  }
 0x2e3   : > { %v1945_v59 = vmax.f32 %v1873_v1, 0.0 }
 0x2e4   : > { %v1946_v18 = vmax.f32 %v1875_v32, 0.0 }
 0x2e5   : > { %v1979_v19 = vpack.c.bf16 %v1945_v59, %v1943_v3 }
 0x2e6   : > { %v1980_v0 = vpack.c.bf16 %v1946_v18, %v1944_v53  ;;  %v1878_v6 = vpop.f32.mrb[124].mxu0 }
 0x2e7   : > { %v1879_v47 = vadd.f32 %v1878_v6, %v7696_v4  ;;  %v1880_v8 = vpop.f32.mrb[125].mxu0 }
 0x2e8   : > { %v1881_v9 = vadd.f32 %v1880_v8, %v7699_v5  ;;  %v1882_v11 = vpop.f32.mrb[126].mxu0  ;;  %2359 = vmatprep.mubr.bf16.mxu1 %v1980_v0 }
 0x2e9   : > { %v1883_v12 = vadd.f32 %v1882_v11, %v7696_v4  ;;  %v1884_v7 = vpop.f32.mrb[127].mxu0  ;;  %2360 = vmatmul.mubr.bf16.gmra.mrb[120].mxu1 %v1979_v19  ;;  %v1947_v16 = vmax.f32 %v1879_v47, 0.0  ;;  %v2015_v4 = vld [vmem:[%s8551_s6] sm:$0x3]  ;;  %v6511_v19 = vld [vmem:[#allocation6 + $0x70] ss:$8 sps:$4 sm:$0xff]  }
 0x2ea   : > { %v1885_v13 = vadd.f32 %v1884_v7, %v7699_v5  ;;  %v1948_v17 = vmax.f32 %v1881_v9, 0.0  ;;  %v6496_v5 = vld [vmem:[#allocation6 + $0x20] ss:$8 sps:$4 sm:$0xff]   ;;  %v7769_v26 = vrot.slane %v2015_v4, %v7574_v14  ;;  %v7772_v28 = vrot.slane %v2015_v4, %v7581_v15  ;;  %v6516_v47 = vld [vmem:[#allocation6 + $0x84] ss:$8 sps:$4 sm:$0xff]  }
 0x2eb   : > { %v1949_v60 = vmax.f32 %v1883_v12, 0.0  ;;  %3166 = vmatpush1.bf16.msra.mxu1 %v6496_v5  ;;  %v6522_v5 = vld [vmem:[#allocation6 + $0xa4] ss:$8 sps:$4 sm:$0xff]  }
 0x2ec   : > { %v1950_v20 = vmax.f32 %v1885_v13, 0.0  ;;  %3167 = vmatprep.subr.bf16.mxu1 %v6501_v30 }
 0x2ed   : > { %v1981_v54 = vpack.c.bf16 %v1949_v60, %v1947_v16  ;;  %v6514_v16 = vld [vmem:[#allocation6 + $0x80] ss:$8 sps:$4 sm:$0xff]  }
 0x2ee   : > { %v1982_v21 = vpack.c.bf16 %v1950_v20, %v1948_v17  ;;  %v6519_v17 = vld [vmem:[#allocation6 + $0x94] ss:$8 sps:$4 sm:$0xff]  }
 0x2ef   : > { %3168 = vmatpush1.bf16.msra.mxu1 %v6499_v29 }
 0x2f0   : > { %2369 = vmatprep.mubr.bf16.mxu1 %v1982_v21  ;;  %3169 = vmatprep.subr.bf16.mxu1 %v6504_v39 }
 0x2f1   : > { %2370 = vmatmul.mubr.bf16.gmra.mrb[124].mxu1 %v1981_v54 }
 0x2f3   : > { %3170 = vmatpush1.bf16.msra.mxu1 %v6502_v38 }
 0x2f4   : > { %3171 = vmatprep.subr.bf16.mxu1 %v6507_v40 }
 0x2f7   : > { %3172 = vmatpush1.bf16.msra.mxu1 %v6505_v52 }
 0x2f8   : > { %3173 = vmatprep.subr.bf16.mxu1 %v6510_v48 }
 0x2fb   : > { %3174 = vmatpush1.bf16.msra.mxu1 %v6508_v63 }
 0x2fc   : > { %3175 = vmatprep.subr.bf16.mxu1 %v6513_v2 }
 0x2ff   : > { %3176 = vmatpush1.bf16.msra.mxu1 %v6511_v19 }
 0x300   : > { %3177 = vmatprep.subr.bf16.mxu1 %v6516_v47 }
 0x303   : > { %3178 = vmatpush1.bf16.msra.mxu1 %v6514_v16 }
 0x304   : > { %3179 = vmatprep.subr.bf16.mxu1 %v6519_v17 }
 0x307   : > { %3180 = vmatpush1.bf16.msra.mxu1 %v6517_v24 }
 0x308   : > { %3181 = vmatprep.subr.bf16.mxu1 %v6522_v5 }
 0x34c   : > { %v2221_v51 = vpop.f32.mrb[64].mxu1 }
 0x34d   : > { %v2222_v31 = vadd.f32 %v2221_v51, %v7769_v26  ;;  %v2223_v33 = vpop.f32.mrb[65].mxu1 }
 0x34e   : > { %v2224_v57 = vadd.f32 %v2223_v33, %v7772_v28  ;;  %v2225_v34 = vpop.f32.mrb[66].mxu1 }
 0x34f   : > { %v2226_v35 = vadd.f32 %v2225_v34, %v7769_v26  ;;  %v2227_v36 = vpop.f32.mrb[67].mxu1  ;;  %v2380_v41 = vmax.f32 %v2222_v31, 0.0 }
 0x350   : > { %v2228_v27 = vadd.f32 %v2227_v36, %v7772_v28  ;;  %v2381_v44 = vmax.f32 %v2224_v57, 0.0  ;;  %v6520_v57 = vld [vmem:[#allocation6 + $0xa0] ss:$8 sps:$4 sm:$0xff]  }
 0x351   : > { %v2382_v43 = vmax.f32 %v2226_v35, 0.0  ;;  %v6525_v35 = vld [vmem:[#allocation6 + $0xb4] ss:$8 sps:$4 sm:$0xff]   ;;  %3182 = vmatpush1.bf16.msra.mxu1 %v6520_v57 }
 0x352   : > { %v2383_v42 = vmax.f32 %v2228_v27, 0.0  ;;  %3183 = vmatprep.subr.bf16.mxu1 %v6525_v35 }
 0x353   : > { %v2444_v45 = vpack.c.bf16 %v2382_v43, %v2380_v41  ;;  %v6523_v41 = vld [vmem:[#allocation6 + $0xb0] ss:$8 sps:$4 sm:$0xff]  }
 0x354   : > { %v2445_v58 = vpack.c.bf16 %v2383_v42, %v2381_v44  ;;  %v2231_v46 = vpop.f32.mrb[68].mxu1  ;;  %v6528_v42 = vld [vmem:[#allocation6 + $0xc4] ss:$8 sps:$4 sm:$0xff]  }
 0x355   : > { %v2232_v49 = vadd.f32 %v2231_v46, %v7769_v26  ;;  %v2233_v50 = vpop.f32.mrb[69].mxu1  ;;  %3184 = vmatpush1.bf16.msra.mxu1 %v6523_v41 }
 0x356   : > { %v2234_v55 = vadd.f32 %v2233_v50, %v7772_v28  ;;  %v2235_v56 = vpop.f32.mrb[70].mxu1  ;;  %2712 = vmatprep.mubr.bf16.mxu0 %v2445_v58  ;;  %v6526_v50 = vld [vmem:[#allocation6 + $0xc0] ss:$8 sps:$4 sm:$0xff]   ;;  %3185 = vmatprep.subr.bf16.mxu1 %v6528_v42 }
 0x357   : > { %v2236_v61 = vadd.f32 %v2235_v56, %v7769_v26  ;;  %v2237_v62 = vpop.f32.mrb[71].mxu1  ;;  %2713 = vmatmul.mubr.bf16.vlgmr.msra.gmra.mrb[128].mxu0 %v2444_v45  ;;  %v2384_v32 = vmax.f32 %v2232_v49, 0.0  ;;  %v6531_v56 = vld [vmem:[#allocation6 + $0xd4] ss:$8 sps:$4 sm:$0xff]  }
 0x358   : > { %v2238_v1 = vadd.f32 %v2237_v62, %v7772_v28  ;;  %v2385_v59 = vmax.f32 %v2234_v55, 0.0 }
 0x359   : > { %v2386_v3 = vmax.f32 %v2236_v61, 0.0  ;;  %3186 = vmatpush1.bf16.msra.mxu1 %v6526_v50 }
 0x35a   : > { %v2387_v53 = vmax.f32 %v2238_v1, 0.0  ;;  %3187 = vmatprep.subr.bf16.mxu1 %v6531_v56 }
 0x35b   : > { %v2446_v18 = vpack.c.bf16 %v2386_v3, %v2384_v32  ;;  %v6529_v32 = vld [vmem:[#allocation6 + $0xd0] ss:$8 sps:$4 sm:$0xff]  }
 0x35c   : > { %v2447_v0 = vpack.c.bf16 %v2387_v53, %v2385_v59  ;;  %v2241_v6 = vpop.f32.mrb[72].mxu1  ;;  %v6534_v53 = vld [vmem:[#allocation6 + $0xe4] ss:$8 sps:$4 sm:$0xff]  }
 0x35d   : > { %v2242_v8 = vadd.f32 %v2241_v6, %v7769_v26  ;;  %v2243_v9 = vpop.f32.mrb[73].mxu1  ;;  %3188 = vmatpush1.bf16.msra.mxu1 %v6529_v32 }
 0x35e   : > { %v2244_v11 = vadd.f32 %v2243_v9, %v7772_v28  ;;  %v2245_v12 = vpop.f32.mrb[74].mxu1  ;;  %2722 = vmatprep.mubr.bf16.mxu0 %v2447_v0  ;;  %v6532_v9 = vld [vmem:[#allocation6 + $0xe0] ss:$8 sps:$4 sm:$0xff]   ;;  %3189 = vmatprep.subr.bf16.mxu1 %v6534_v53 }
 0x35f   : > { %v2246_v7 = vadd.f32 %v2245_v12, %v7769_v26  ;;  %v2247_v13 = vpop.f32.mrb[75].mxu1  ;;  %2723 = vmatmul.mubr.bf16.gmra.mrb[132].mxu0 %v2446_v18  ;;  %v2388_v20 = vmax.f32 %v2242_v8, 0.0 }
 0x360   : > { %v2248_v60 = vadd.f32 %v2247_v13, %v7772_v28  ;;  %v2389_v21 = vmax.f32 %v2244_v11, 0.0 }
 0x361   : > { %v2390_v54 = vmax.f32 %v2246_v7, 0.0  ;;  %3190 = vmatpush1.bf16.msra.mxu1 %v6532_v9 }
 0x362   : > { %v2391_v22 = vmax.f32 %v2248_v60, 0.0 }
 0x363   : > { %v2448_v23 = vpack.c.bf16 %v2390_v54, %v2388_v20 }
 0x364   : > { %v2449_v37 = vpack.c.bf16 %v2391_v22, %v2389_v21  ;;  %v2251_v4 = vpop.f32.mrb[76].mxu1 }
 0x365   : > { %v2252_v25 = vadd.f32 %v2251_v4, %v7769_v26  ;;  %v2253_v51 = vpop.f32.mrb[77].mxu1 }
 0x366   : > { %v2254_v29 = vadd.f32 %v2253_v51, %v7772_v28  ;;  %v2255_v30 = vpop.f32.mrb[78].mxu1  ;;  %2732 = vmatprep.mubr.bf16.mxu0 %v2449_v37 }
 0x367   : > { %v2256_v31 = vadd.f32 %v2255_v30, %v7769_v26  ;;  %v2257_v33 = vpop.f32.mrb[79].mxu1  ;;  %2733 = vmatmul.mubr.bf16.gmra.mrb[136].mxu0 %v2448_v23  ;;  %v2392_v36 = vmax.f32 %v2252_v25, 0.0 }
 0x368   : > { %v2258_v34 = vadd.f32 %v2257_v33, %v7772_v28  ;;  %v2393_v39 = vmax.f32 %v2254_v29, 0.0 }
 0x369   : > { %v2394_v38 = vmax.f32 %v2256_v31, 0.0 }
 0x36a   : > { %v2395_v27 = vmax.f32 %v2258_v34, 0.0 }
 0x36b   : > { %v2450_v40 = vpack.c.bf16 %v2394_v38, %v2392_v36 }
 0x36c   : > { %v2451_v43 = vpack.c.bf16 %v2395_v27, %v2393_v39  ;;  %v2261_v44 = vpop.f32.mrb[80].mxu1 }
 0x36d   : > { %v2262_v45 = vadd.f32 %v2261_v44, %v7769_v26  ;;  %v2263_v52 = vpop.f32.mrb[81].mxu1 }
 0x36e   : > { %v2264_v58 = vadd.f32 %v2263_v52, %v7772_v28  ;;  %v2265_v46 = vpop.f32.mrb[82].mxu1  ;;  %2742 = vmatprep.mubr.bf16.mxu0 %v2451_v43 }
 0x36f   : > { %v2266_v48 = vadd.f32 %v2265_v46, %v7769_v26  ;;  %v2267_v49 = vpop.f32.mrb[83].mxu1  ;;  %2743 = vmatmul.mubr.bf16.gmra.mrb[140].mxu0 %v2450_v40  ;;  %v2396_v61 = vmax.f32 %v2262_v45, 0.0 }
 0x370   : > { %v2268_v55 = vadd.f32 %v2267_v49, %v7772_v28  ;;  %v2397_v63 = vmax.f32 %v2264_v58, 0.0 }
 0x371   : > { %v2398_v62 = vmax.f32 %v2266_v48, 0.0 }
 0x372   : > { %v2399_v1 = vmax.f32 %v2268_v55, 0.0 }
 0x373   : > { %v2452_v2 = vpack.c.bf16 %v2398_v62, %v2396_v61 }
 0x374   : > { %v2453_v3 = vpack.c.bf16 %v2399_v1, %v2397_v63  ;;  %v2271_v59 = vpop.f32.mrb[84].mxu1 }
 0x375   : > { %v2272_v18 = vadd.f32 %v2271_v59, %v7769_v26  ;;  %v2273_v19 = vpop.f32.mrb[85].mxu1 }
 0x376   : > { %v2274_v0 = vadd.f32 %v2273_v19, %v7772_v28  ;;  %v2275_v6 = vpop.f32.mrb[86].mxu1  ;;  %2752 = vmatprep.mubr.bf16.mxu0 %v2453_v3 }
 0x377   : > { %v2276_v47 = vadd.f32 %v2275_v6, %v7769_v26  ;;  %v2277_v8 = vpop.f32.mrb[87].mxu1  ;;  %2753 = vmatmul.mubr.bf16.gmra.mrb[144].mxu0 %v2452_v2  ;;  %v2400_v12 = vmax.f32 %v2272_v18, 0.0 }
 0x378   : > { %v2278_v11 = vadd.f32 %v2277_v8, %v7772_v28  ;;  %v2401_v13 = vmax.f32 %v2274_v0, 0.0 }
 0x379   : > { %v2402_v7 = vmax.f32 %v2276_v47, 0.0 }
 0x37a   : > { %v2403_v16 = vmax.f32 %v2278_v11, 0.0 }
 0x37b   : > { %v2454_v60 = vpack.c.bf16 %v2402_v7, %v2400_v12 }
 0x37c   : > { %v2455_v17 = vpack.c.bf16 %v2403_v16, %v2401_v13  ;;  %v2281_v20 = vpop.f32.mrb[88].mxu1 }
 0x37d   : > { %v2282_v54 = vadd.f32 %v2281_v20, %v7769_v26  ;;  %v2283_v21 = vpop.f32.mrb[89].mxu1 }
 0x37e   : > { %v2284_v22 = vadd.f32 %v2283_v21, %v7772_v28  ;;  %v2285_v23 = vpop.f32.mrb[90].mxu1  ;;  %2762 = vmatprep.mubr.bf16.mxu0 %v2455_v17 }
 0x37f   : > { %v2286_v24 = vadd.f32 %v2285_v23, %v7769_v26  ;;  %v2287_v37 = vpop.f32.mrb[91].mxu1  ;;  %2763 = vmatmul.mubr.bf16.gmra.mrb[148].mxu0 %v2454_v60  ;;  %v2404_v5 = vmax.f32 %v2282_v54, 0.0 }
 0x380   : > { %v2288_v4 = vadd.f32 %v2287_v37, %v7772_v28  ;;  %v2405_v51 = vmax.f32 %v2284_v22, 0.0 }
 0x381   : > { %v2406_v25 = vmax.f32 %v2286_v24, 0.0 }
 0x382   : > { %v2407_v29 = vmax.f32 %v2288_v4, 0.0 }
 0x383   : > { %v2456_v30 = vpack.c.bf16 %v2406_v25, %v2404_v5 }
 0x384   : > { %v2457_v31 = vpack.c.bf16 %v2407_v29, %v2405_v51  ;;  %v2291_v33 = vpop.f32.mrb[92].mxu1 }
 0x385   : > { %v2292_v57 = vadd.f32 %v2291_v33, %v7769_v26  ;;  %v2293_v34 = vpop.f32.mrb[93].mxu1 }
 0x386   : > { %v2294_v35 = vadd.f32 %v2293_v34, %v7772_v28  ;;  %v2295_v36 = vpop.f32.mrb[94].mxu1  ;;  %2772 = vmatprep.mubr.bf16.mxu0 %v2457_v31 }
 0x387   : > { %v2296_v38 = vadd.f32 %v2295_v36, %v7769_v26  ;;  %v2297_v39 = vpop.f32.mrb[95].mxu1  ;;  %2773 = vmatmul.mubr.bf16.gmra.mrb[152].mxu0 %v2456_v30  ;;  %v2408_v40 = vmax.f32 %v2292_v57, 0.0 }
 0x388   : > { %v2298_v27 = vadd.f32 %v2297_v39, %v7772_v28  ;;  %v2409_v43 = vmax.f32 %v2294_v35, 0.0 }
 0x389   : > { %v2410_v41 = vmax.f32 %v2296_v38, 0.0 }
 0x38a   : > { %v2411_v44 = vmax.f32 %v2298_v27, 0.0 }
 0x38b   : > { %v2458_v42 = vpack.c.bf16 %v2410_v41, %v2408_v40 }
 0x38c   : > { %v2459_v45 = vpack.c.bf16 %v2411_v44, %v2409_v43  ;;  %v2301_v52 = vpop.f32.mrb[96].mxu1 }
 0x38d   : > { %v2302_v58 = vadd.f32 %v2301_v52, %v7769_v26  ;;  %v2303_v46 = vpop.f32.mrb[97].mxu1 }
 0x38e   : > { %v2304_v48 = vadd.f32 %v2303_v46, %v7772_v28  ;;  %v2305_v49 = vpop.f32.mrb[98].mxu1  ;;  %2782 = vmatprep.mubr.bf16.mxu0 %v2459_v45 }
 0x38f   : > { %v2306_v50 = vadd.f32 %v2305_v49, %v7769_v26  ;;  %v2307_v55 = vpop.f32.mrb[99].mxu1  ;;  %2783 = vmatmul.mubr.bf16.gmra.mrb[156].mxu0 %v2458_v42  ;;  %v2412_v61 = vmax.f32 %v2302_v58, 0.0  ;;  %v6537_v49 = vld [vmem:[#allocation6 + $0xf4] ss:$8 sps:$4 sm:$0xff]  }
 0x390   : > { %v2308_v56 = vadd.f32 %v2307_v55, %v7772_v28  ;;  %v2413_v63 = vmax.f32 %v2304_v48, 0.0  ;;  %v6535_v55 = vld [vmem:[#allocation6 + $0xf0] ss:$8 sps:$4 sm:$0xff]   ;;  %3191 = vmatprep.subr.bf16.mxu1 %v6537_v49 }
 0x391   : > { %v2414_v62 = vmax.f32 %v2306_v50, 0.0  ;;  %3192 = vmatpush1.bf16.msra.mxu1 %v6535_v55  ;;  %v6547_v49 = vld [vmem:[#allocation7 + $0x30] ss:$8 sps:$4 sm:$0xff]  }
 0x392   : > { %v2415_v1 = vmax.f32 %v2308_v56, 0.0 }
 0x393   : > { %v2460_v2 = vpack.c.bf16 %v2414_v62, %v2412_v61 }
 0x394   : > { %v2461_v32 = vpack.c.bf16 %v2415_v1, %v2413_v63  ;;  %v2311_v3 = vpop.f32.mrb[100].mxu1 }
 0x395   : > { %v2312_v59 = vadd.f32 %v2311_v3, %v7769_v26  ;;  %v2313_v53 = vpop.f32.mrb[101].mxu1 }
 0x396   : > { %v2314_v18 = vadd.f32 %v2313_v53, %v7772_v28  ;;  %v2315_v19 = vpop.f32.mrb[102].mxu1  ;;  %2792 = vmatprep.mubr.bf16.mxu0 %v2461_v32 }
 0x397   : > { %v2316_v0 = vadd.f32 %v2315_v19, %v7769_v26  ;;  %v2317_v6 = vpop.f32.mrb[103].mxu1  ;;  %2793 = vmatmul.mubr.bf16.gmra.mrb[160].mxu0 %v2460_v2  ;;  %v2416_v8 = vmax.f32 %v2312_v59, 0.0 }
 0x398   : > { %v2318_v47 = vadd.f32 %v2317_v6, %v7772_v28  ;;  %v2417_v11 = vmax.f32 %v2314_v18, 0.0 }
 0x399   : > { %v2418_v9 = vmax.f32 %v2316_v0, 0.0 }
 0x39a   : > { %v2419_v12 = vmax.f32 %v2318_v47, 0.0 }
 0x39b   : > { %v2462_v7 = vpack.c.bf16 %v2418_v9, %v2416_v8 }
 0x39c   : > { %v2463_v13 = vpack.c.bf16 %v2419_v12, %v2417_v11  ;;  %v2321_v16 = vpop.f32.mrb[104].mxu1 }
 0x39d   : > { %v2322_v60 = vadd.f32 %v2321_v16, %v7769_v26  ;;  %v2323_v17 = vpop.f32.mrb[105].mxu1 }
 0x39e   : > { %v2324_v20 = vadd.f32 %v2323_v17, %v7772_v28  ;;  %v2325_v54 = vpop.f32.mrb[106].mxu1  ;;  %2802 = vmatprep.mubr.bf16.mxu0 %v2463_v13 }
 0x39f   : > { %v2326_v21 = vadd.f32 %v2325_v54, %v7769_v26  ;;  %v2327_v22 = vpop.f32.mrb[107].mxu1  ;;  %2803 = vmatmul.mubr.bf16.gmra.mrb[164].mxu0 %v2462_v7  ;;  %v2420_v24 = vmax.f32 %v2322_v60, 0.0 }
 0x3a0   : > { %v2328_v23 = vadd.f32 %v2327_v22, %v7772_v28  ;;  %v2421_v4 = vmax.f32 %v2324_v20, 0.0 }
 0x3a1   : > { %v2422_v37 = vmax.f32 %v2326_v21, 0.0 }
 0x3a2   : > { %v2423_v5 = vmax.f32 %v2328_v23, 0.0 }
 0x3a3   : > { %v2464_v25 = vpack.c.bf16 %v2422_v37, %v2420_v24 }
 0x3a4   : > { %v2465_v51 = vpack.c.bf16 %v2423_v5, %v2421_v4  ;;  %v2331_v29 = vpop.f32.mrb[108].mxu1 }
 0x3a5   : > { %v2332_v30 = vadd.f32 %v2331_v29, %v7769_v26  ;;  %v2333_v31 = vpop.f32.mrb[109].mxu1 }
 0x3a6   : > { %v2334_v33 = vadd.f32 %v2333_v31, %v7772_v28  ;;  %v2335_v57 = vpop.f32.mrb[110].mxu1  ;;  %2812 = vmatprep.mubr.bf16.mxu0 %v2465_v51 }
 0x3a7   : > { %v2336_v34 = vadd.f32 %v2335_v57, %v7769_v26  ;;  %v2337_v35 = vpop.f32.mrb[111].mxu1  ;;  %2813 = vmatmul.mubr.bf16.gmra.mrb[168].mxu0 %v2464_v25  ;;  %v2424_v38 = vmax.f32 %v2332_v30, 0.0 }
 0x3a8   : > { %v2338_v36 = vadd.f32 %v2337_v35, %v7772_v28  ;;  %v2425_v27 = vmax.f32 %v2334_v33, 0.0 }
 0x3a9   : > { %v2426_v39 = vmax.f32 %v2336_v34, 0.0 }
 0x3aa   : > { %v2427_v40 = vmax.f32 %v2338_v36, 0.0 }
 0x3ab   : > { %v2466_v41 = vpack.c.bf16 %v2426_v39, %v2424_v38 }
 0x3ac   : > { %v2467_v43 = vpack.c.bf16 %v2427_v40, %v2425_v27  ;;  %v2341_v44 = vpop.f32.mrb[112].mxu1 }
 0x3ad   : > { %v2342_v42 = vadd.f32 %v2341_v44, %v7769_v26  ;;  %v2343_v45 = vpop.f32.mrb[113].mxu1  ;;  %v6540_v44 = vld [vmem:[#allocation7 + $0x4] ss:$8 sps:$4 sm:$0xff]  }
 0x3ae   : > { %v2344_v52 = vadd.f32 %v2343_v45, %v7772_v28  ;;  %v2345_v58 = vpop.f32.mrb[114].mxu1  ;;  %2822 = vmatprep.mubr.bf16.mxu0 %v2467_v43  ;;  %v6538_v43 = vld [vmem:[#allocation7] ss:$8 sps:$4 sm:$0xff]   ;;  %3730 = vmatprep.subr.bf16.mxu0 %v6540_v44  ;;  %v6543_v45 = vld [vmem:[#allocation7 + $0x14] ss:$8 sps:$4 sm:$0xff]  }
 0x3af   : > { %v2346_v46 = vadd.f32 %v2345_v58, %v7769_v26  ;;  %v2347_v48 = vpop.f32.mrb[115].mxu1  ;;  %2823 = vmatmul.mubr.bf16.gmra.mrb[172].mxu0 %v2466_v41  ;;  %v2428_v56 = vmax.f32 %v2342_v42, 0.0  ;;  %v6541_v42 = vld [vmem:[#allocation7 + $0x10] ss:$8 sps:$4 sm:$0xff]  }
 0x3b0   : > { %v2348_v50 = vadd.f32 %v2347_v48, %v7772_v28  ;;  %v2429_v62 = vmax.f32 %v2344_v52, 0.0  ;;  %3731 = vmatpush1.bf16.msra.mxu0 %v6538_v43  ;;  %v6546_v52 = vld [vmem:[#allocation7 + $0x24] ss:$8 sps:$4 sm:$0xff]  }
 0x3b1   : > { %v2430_v61 = vmax.f32 %v2346_v46, 0.0  ;;  %3732 = vmatprep.subr.bf16.mxu0 %v6543_v45 }
 0x3b2   : > { %v2431_v63 = vmax.f32 %v2348_v50, 0.0  ;;  %v6549_v50 = vld [vmem:[#allocation7 + $0x34] ss:$8 sps:$4 sm:$0xff]  }
 0x3b3   : > { %v2468_v1 = vpack.c.bf16 %v2430_v61, %v2428_v56 }
 0x3b4   : > { %v2469_v2 = vpack.c.bf16 %v2431_v63, %v2429_v62  ;;  %v2351_v32 = vpop.f32.mrb[116].mxu1  ;;  %3733 = vmatpush1.bf16.msra.mxu0 %v6541_v42  ;;  %v6565_v42 = vld [vmem:[#allocation7 + $0x90] ss:$8 sps:$4 sm:$0xff]  }
 0x3b5   : > { %v2352_v3 = vadd.f32 %v2351_v32, %v7769_v26  ;;  %v2353_v59 = vpop.f32.mrb[117].mxu1  ;;  %3734 = vmatprep.subr.bf16.mxu0 %v6546_v52  ;;  %v6552_v32 = vld [vmem:[#allocation7 + $0x44] ss:$8 sps:$4 sm:$0xff]  }
 0x3b6   : > { %v2354_v53 = vadd.f32 %v2353_v59, %v7772_v28  ;;  %v2355_v18 = vpop.f32.mrb[118].mxu1  ;;  %2832 = vmatprep.mubr.bf16.mxu0 %v2469_v2  ;;  %v6550_v2 = vld [vmem:[#allocation7 + $0x40] ss:$8 sps:$4 sm:$0xff]   ;;  %v6555_v59 = vld [vmem:[#allocation7 + $0x54] ss:$8 sps:$4 sm:$0xff]  }
 0x3b7   : > { %v2356_v19 = vadd.f32 %v2355_v18, %v7769_v26  ;;  %v2357_v0 = vpop.f32.mrb[119].mxu1  ;;  %2833 = vmatmul.mubr.bf16.gmra.mrb[176].mxu0 %v2468_v1  ;;  %v2432_v47 = vmax.f32 %v2352_v3, 0.0 }
 0x3b8   : > { %v2358_v6 = vadd.f32 %v2357_v0, %v7772_v28  ;;  %v2433_v9 = vmax.f32 %v2354_v53, 0.0 }
 0x3b9   : > { %v2434_v8 = vmax.f32 %v2356_v19, 0.0 }
 0x3ba   : > { %v2435_v11 = vmax.f32 %v2358_v6, 0.0 }
 0x3bb   : > { %v2470_v12 = vpack.c.bf16 %v2434_v8, %v2432_v47  ;;  %v6553_v47 = vld [vmem:[#allocation7 + $0x50] ss:$8 sps:$4 sm:$0xff]  }
 0x3bc   : > { %v2471_v7 = vpack.c.bf16 %v2435_v11, %v2433_v9  ;;  %v2361_v13 = vpop.f32.mrb[120].mxu1  ;;  %v6558_v11 = vld [vmem:[#allocation7 + $0x64] ss:$8 sps:$4 sm:$0xff]  }
 0x3bd   : > { %v2362_v16 = vadd.f32 %v2361_v13, %v7769_v26  ;;  %v2363_v60 = vpop.f32.mrb[121].mxu1 }
 0x3be   : > { %v2364_v17 = vadd.f32 %v2363_v60, %v7772_v28  ;;  %v2365_v20 = vpop.f32.mrb[122].mxu1  ;;  %2842 = vmatprep.mubr.bf16.mxu0 %v2471_v7 }
 0x3bf   : > { %v2366_v54 = vadd.f32 %v2365_v20, %v7769_v26  ;;  %v2367_v21 = vpop.f32.mrb[123].mxu1  ;;  %2843 = vmatmul.mubr.bf16.gmra.mrb[180].mxu0 %v2470_v12  ;;  %v2436_v23 = vmax.f32 %v2362_v16, 0.0  ;;  %v6556_v20 = vld [vmem:[#allocation7 + $0x60] ss:$8 sps:$4 sm:$0xff]  }
 0x3c0   : > { %v2368_v22 = vadd.f32 %v2367_v21, %v7772_v28  ;;  %v2437_v37 = vmax.f32 %v2364_v17, 0.0  ;;  %v6561_v21 = vld [vmem:[#allocation7 + $0x74] ss:$8 sps:$4 sm:$0xff]  }
 0x3c1   : > { %v2438_v24 = vmax.f32 %v2366_v54, 0.0 }
 0x3c2   : > { %v2439_v4 = vmax.f32 %v2368_v22, 0.0 }
 0x3c3   : > { %v2472_v5 = vpack.c.bf16 %v2438_v24, %v2436_v23 }
 0x3c4   : > { %v2473_v25 = vpack.c.bf16 %v2439_v4, %v2437_v37  ;;  %v2371_v51 = vpop.f32.mrb[124].mxu1 }
 0x3c5   : > { %v2372_v29 = vadd.f32 %v2371_v51, %v7769_v26  ;;  %v2373_v30 = vpop.f32.mrb[125].mxu1 }
 0x3c6   : > { %v2374_v31 = vadd.f32 %v2373_v30, %v7772_v28  ;;  %v2375_v33 = vpop.f32.mrb[126].mxu1  ;;  %2852 = vmatprep.mubr.bf16.mxu0 %v2473_v25 }
 0x3c7   : > { %v2376_v57 = vadd.f32 %v2375_v33, %v7769_v26  ;;  %v2377_v34 = vpop.f32.mrb[127].mxu1  ;;  %2853 = vmatmul.mubr.bf16.gmra.mrb[184].mxu0 %v2472_v5  ;;  %v2440_v36 = vmax.f32 %v2372_v29, 0.0  ;;  %v2508_v26 = vld [vmem:[%s8553_s8] sm:$0x3]  ;;  %v6559_v5 = vld [vmem:[#allocation7 + $0x70] ss:$8 sps:$4 sm:$0xff]  }
 0x3c8   : > { %v2378_v35 = vadd.f32 %v2377_v34, %v7772_v28  ;;  %v2441_v39 = vmax.f32 %v2374_v31, 0.0  ;;  %v6544_v28 = vld [vmem:[#allocation7 + $0x20] ss:$8 sps:$4 sm:$0xff]   ;;  %v7842_v58 = vrot.slane %v2508_v26, %v7574_v14  ;;  %v7845_v46 = vrot.slane %v2508_v26, %v7581_v15  ;;  %v6564_v29 = vld [vmem:[#allocation7 + $0x84] ss:$8 sps:$4 sm:$0xff]  }
 0x3c9   : > { %v2442_v38 = vmax.f32 %v2376_v57, 0.0  ;;  %3735 = vmatpush1.bf16.msra.mxu0 %v6544_v28  ;;  %v6570_v28 = vld [vmem:[#allocation7 + $0xa4] ss:$8 sps:$4 sm:$0xff]  }
 0x3ca   : > { %v2443_v27 = vmax.f32 %v2378_v35, 0.0  ;;  %3736 = vmatprep.subr.bf16.mxu0 %v6549_v50 }
 0x3cb   : > { %v2474_v40 = vpack.c.bf16 %v2442_v38, %v2440_v36  ;;  %v6562_v36 = vld [vmem:[#allocation7 + $0x80] ss:$8 sps:$4 sm:$0xff]  }
 0x3cc   : > { %v2475_v41 = vpack.c.bf16 %v2443_v27, %v2441_v39  ;;  %v6567_v39 = vld [vmem:[#allocation7 + $0x94] ss:$8 sps:$4 sm:$0xff]  }
 0x3cd   : > { %3737 = vmatpush1.bf16.msra.mxu0 %v6547_v49 }
 0x3ce   : > { %2862 = vmatprep.mubr.bf16.mxu0 %v2475_v41  ;;  %3738 = vmatprep.subr.bf16.mxu0 %v6552_v32 }
 0x3cf   : > { %2863 = vmatmul.mubr.bf16.gmra.mrb[188].mxu0 %v2474_v40 }
 0x3d1   : > { %3739 = vmatpush1.bf16.msra.mxu0 %v6550_v2 }
 0x3d2   : > { %3740 = vmatprep.subr.bf16.mxu0 %v6555_v59 }
 0x3d5   : > { %3741 = vmatpush1.bf16.msra.mxu0 %v6553_v47 }
 0x3d6   : > { %3742 = vmatprep.subr.bf16.mxu0 %v6558_v11 }
 0x3d9   : > { %3743 = vmatpush1.bf16.msra.mxu0 %v6556_v20 }
 0x3da   : > { %3744 = vmatprep.subr.bf16.mxu0 %v6561_v21 }
 0x3dd   : > { %3745 = vmatpush1.bf16.msra.mxu0 %v6559_v5 }
 0x3de   : > { %3746 = vmatprep.subr.bf16.mxu0 %v6564_v29 }
 0x3e1   : > { %3747 = vmatpush1.bf16.msra.mxu0 %v6562_v36 }
 0x3e2   : > { %3748 = vmatprep.subr.bf16.mxu0 %v6567_v39 }
 0x3e5   : > { %3749 = vmatpush1.bf16.msra.mxu0 %v6565_v42 }
 0x3e6   : > { %3750 = vmatprep.subr.bf16.mxu0 %v6570_v28 }
 0x42a   : > { %v2714_v48 = vpop.f32.mrb[128].mxu0 }
 0x42b   : > { %v2715_v55 = vadd.f32 %v2714_v48, %v7842_v58  ;;  %v2716_v56 = vpop.f32.mrb[129].mxu0 }
 0x42c   : > { %v2717_v61 = vadd.f32 %v2716_v56, %v7845_v46  ;;  %v2718_v62 = vpop.f32.mrb[130].mxu0 }
 0x42d   : > { %v2719_v63 = vadd.f32 %v2718_v62, %v7842_v58  ;;  %v2720_v1 = vpop.f32.mrb[131].mxu0  ;;  %v2873_v53 = vmax.f32 %v2715_v55, 0.0 }
 0x42e   : > { %v2721_v3 = vadd.f32 %v2720_v1, %v7845_v46  ;;  %v2874_v19 = vmax.f32 %v2717_v61, 0.0  ;;  %v6568_v61 = vld [vmem:[#allocation7 + $0xa0] ss:$8 sps:$4 sm:$0xff]  }
 0x42f   : > { %v2875_v18 = vmax.f32 %v2719_v63, 0.0  ;;  %v6573_v63 = vld [vmem:[#allocation7 + $0xb4] ss:$8 sps:$4 sm:$0xff]   ;;  %3751 = vmatpush1.bf16.msra.mxu0 %v6568_v61 }
 0x430   : > { %v2876_v0 = vmax.f32 %v2721_v3, 0.0  ;;  %3752 = vmatprep.subr.bf16.mxu0 %v6573_v63 }
 0x431   : > { %v2937_v6 = vpack.c.bf16 %v2875_v18, %v2873_v53  ;;  %v6571_v53 = vld [vmem:[#allocation7 + $0xb0] ss:$8 sps:$4 sm:$0xff]  }
 0x432   : > { %v2938_v8 = vpack.c.bf16 %v2876_v0, %v2874_v19  ;;  %v2724_v9 = vpop.f32.mrb[132].mxu0  ;;  %v6576_v0 = vld [vmem:[#allocation7 + $0xc4] ss:$8 sps:$4 sm:$0xff]  }
 0x433   : > { %v2725_v12 = vadd.f32 %v2724_v9, %v7842_v58  ;;  %v2726_v7 = vpop.f32.mrb[133].mxu0  ;;  %3753 = vmatpush1.bf16.msra.mxu0 %v6571_v53 }
 0x434   : > { %v2727_v13 = vadd.f32 %v2726_v7, %v7845_v46  ;;  %v2728_v16 = vpop.f32.mrb[134].mxu0  ;;  %3193 = vmatprep.mubr.bf16.mxu1 %v2938_v8  ;;  %v6574_v7 = vld [vmem:[#allocation7 + $0xc0] ss:$8 sps:$4 sm:$0xff]   ;;  %3754 = vmatprep.subr.bf16.mxu0 %v6576_v0 }
 0x435   : > { %v2729_v60 = vadd.f32 %v2728_v16, %v7842_v58  ;;  %v2730_v17 = vpop.f32.mrb[135].mxu0  ;;  %3194 = vmatmul.mubr.bf16.vlgmr.msra.gmra.mrb[0].mxu1 %v2937_v6  ;;  %v2877_v22 = vmax.f32 %v2725_v12, 0.0  ;;  %v6579_v16 = vld [vmem:[#allocation7 + $0xd4] ss:$8 sps:$4 sm:$0xff]  }
 0x436   : > { %v2731_v54 = vadd.f32 %v2730_v17, %v7845_v46  ;;  %v2878_v24 = vmax.f32 %v2727_v13, 0.0 }
 0x437   : > { %v2879_v23 = vmax.f32 %v2729_v60, 0.0  ;;  %3755 = vmatpush1.bf16.msra.mxu0 %v6574_v7 }
 0x438   : > { %v2880_v37 = vmax.f32 %v2731_v54, 0.0  ;;  %3756 = vmatprep.subr.bf16.mxu0 %v6579_v16 }
 0x439   : > { %v2939_v4 = vpack.c.bf16 %v2879_v23, %v2877_v22  ;;  %v6577_v22 = vld [vmem:[#allocation7 + $0xd0] ss:$8 sps:$4 sm:$0xff]  }
 0x43a   : > { %v2940_v25 = vpack.c.bf16 %v2880_v37, %v2878_v24  ;;  %v2734_v51 = vpop.f32.mrb[136].mxu0  ;;  %v6582_v37 = vld [vmem:[#allocation7 + $0xe4] ss:$8 sps:$4 sm:$0xff]  }
 0x43b   : > { %v2735_v30 = vadd.f32 %v2734_v51, %v7842_v58  ;;  %v2736_v31 = vpop.f32.mrb[137].mxu0  ;;  %3757 = vmatpush1.bf16.msra.mxu0 %v6577_v22 }
 0x43c   : > { %v2737_v33 = vadd.f32 %v2736_v31, %v7845_v46  ;;  %v2738_v57 = vpop.f32.mrb[138].mxu0  ;;  %3203 = vmatprep.mubr.bf16.mxu1 %v2940_v25  ;;  %v6580_v31 = vld [vmem:[#allocation7 + $0xe0] ss:$8 sps:$4 sm:$0xff]   ;;  %3758 = vmatprep.subr.bf16.mxu0 %v6582_v37 }
 0x43d   : > { %v2739_v34 = vadd.f32 %v2738_v57, %v7842_v58  ;;  %v2740_v35 = vpop.f32.mrb[139].mxu0  ;;  %3204 = vmatmul.mubr.bf16.gmra.mrb[4].mxu1 %v2939_v4  ;;  %v2881_v27 = vmax.f32 %v2735_v30, 0.0 }
 0x43e   : > { %v2741_v38 = vadd.f32 %v2740_v35, %v7845_v46  ;;  %v2882_v41 = vmax.f32 %v2737_v33, 0.0 }
 0x43f   : > { %v2883_v40 = vmax.f32 %v2739_v34, 0.0  ;;  %3759 = vmatpush1.bf16.msra.mxu0 %v6580_v31 }
 0x440   : > { %v2884_v43 = vmax.f32 %v2741_v38, 0.0 }
 0x441   : > { %v2941_v44 = vpack.c.bf16 %v2883_v40, %v2881_v27 }
 0x442   : > { %v2942_v45 = vpack.c.bf16 %v2884_v43, %v2882_v41  ;;  %v2744_v26 = vpop.f32.mrb[140].mxu0 }
 0x443   : > { %v2745_v52 = vadd.f32 %v2744_v26, %v7842_v58  ;;  %v2746_v48 = vpop.f32.mrb[141].mxu0 }
 0x444   : > { %v2747_v49 = vadd.f32 %v2746_v48, %v7845_v46  ;;  %v2748_v50 = vpop.f32.mrb[142].mxu0  ;;  %3213 = vmatprep.mubr.bf16.mxu1 %v2942_v45 }
 0x445   : > { %v2749_v55 = vadd.f32 %v2748_v50, %v7842_v58  ;;  %v2750_v56 = vpop.f32.mrb[143].mxu0  ;;  %3214 = vmatmul.mubr.bf16.gmra.mrb[8].mxu1 %v2941_v44  ;;  %v2885_v1 = vmax.f32 %v2745_v52, 0.0 }
 0x446   : > { %v2751_v62 = vadd.f32 %v2750_v56, %v7845_v46  ;;  %v2886_v32 = vmax.f32 %v2747_v49, 0.0 }
 0x447   : > { %v2887_v2 = vmax.f32 %v2749_v55, 0.0 }
 0x448   : > { %v2888_v3 = vmax.f32 %v2751_v62, 0.0 }
 0x449   : > { %v2943_v59 = vpack.c.bf16 %v2887_v2, %v2885_v1 }
 0x44a   : > { %v2944_v18 = vpack.c.bf16 %v2888_v3, %v2886_v32  ;;  %v2754_v19 = vpop.f32.mrb[144].mxu0 }
 0x44b   : > { %v2755_v6 = vadd.f32 %v2754_v19, %v7842_v58  ;;  %v2756_v47 = vpop.f32.mrb[145].mxu0 }
 0x44c   : > { %v2757_v8 = vadd.f32 %v2756_v47, %v7845_v46  ;;  %v2758_v9 = vpop.f32.mrb[146].mxu0  ;;  %3223 = vmatprep.mubr.bf16.mxu1 %v2944_v18 }
 0x44d   : > { %v2759_v11 = vadd.f32 %v2758_v9, %v7842_v58  ;;  %v2760_v12 = vpop.f32.mrb[147].mxu0  ;;  %3224 = vmatmul.mubr.bf16.gmra.mrb[12].mxu1 %v2943_v59  ;;  %v2889_v60 = vmax.f32 %v2755_v6, 0.0 }
 0x44e   : > { %v2761_v13 = vadd.f32 %v2760_v12, %v7845_v46  ;;  %v2890_v20 = vmax.f32 %v2757_v8, 0.0 }
 0x44f   : > { %v2891_v17 = vmax.f32 %v2759_v11, 0.0 }
 0x450   : > { %v2892_v54 = vmax.f32 %v2761_v13, 0.0 }
 0x451   : > { %v2945_v21 = vpack.c.bf16 %v2891_v17, %v2889_v60 }
 0x452   : > { %v2946_v23 = vpack.c.bf16 %v2892_v54, %v2890_v20  ;;  %v2764_v24 = vpop.f32.mrb[148].mxu0 }
 0x453   : > { %v2765_v4 = vadd.f32 %v2764_v24, %v7842_v58  ;;  %v2766_v5 = vpop.f32.mrb[149].mxu0 }
 0x454   : > { %v2767_v25 = vadd.f32 %v2766_v5, %v7845_v46  ;;  %v2768_v51 = vpop.f32.mrb[150].mxu0  ;;  %3233 = vmatprep.mubr.bf16.mxu1 %v2946_v23 }
 0x455   : > { %v2769_v29 = vadd.f32 %v2768_v51, %v7842_v58  ;;  %v2770_v30 = vpop.f32.mrb[151].mxu0  ;;  %3234 = vmatmul.mubr.bf16.gmra.mrb[16].mxu1 %v2945_v21  ;;  %v2893_v57 = vmax.f32 %v2765_v4, 0.0 }
 0x456   : > { %v2771_v33 = vadd.f32 %v2770_v30, %v7845_v46  ;;  %v2894_v35 = vmax.f32 %v2767_v25, 0.0 }
 0x457   : > { %v2895_v34 = vmax.f32 %v2769_v29, 0.0 }
 0x458   : > { %v2896_v36 = vmax.f32 %v2771_v33, 0.0 }
 0x459   : > { %v2947_v38 = vpack.c.bf16 %v2895_v34, %v2893_v57 }
 0x45a   : > { %v2948_v39 = vpack.c.bf16 %v2896_v36, %v2894_v35  ;;  %v2774_v27 = vpop.f32.mrb[152].mxu0 }
 0x45b   : > { %v2775_v40 = vadd.f32 %v2774_v27, %v7842_v58  ;;  %v2776_v41 = vpop.f32.mrb[153].mxu0 }
 0x45c   : > { %v2777_v43 = vadd.f32 %v2776_v41, %v7845_v46  ;;  %v2778_v44 = vpop.f32.mrb[154].mxu0  ;;  %3243 = vmatprep.mubr.bf16.mxu1 %v2948_v39 }
 0x45d   : > { %v2779_v42 = vadd.f32 %v2778_v44, %v7842_v58  ;;  %v2780_v45 = vpop.f32.mrb[155].mxu0  ;;  %3244 = vmatmul.mubr.bf16.gmra.mrb[20].mxu1 %v2947_v38  ;;  %v2897_v28 = vmax.f32 %v2775_v40, 0.0 }
 0x45e   : > { %v2781_v26 = vadd.f32 %v2780_v45, %v7845_v46  ;;  %v2898_v48 = vmax.f32 %v2777_v43, 0.0 }
 0x45f   : > { %v2899_v52 = vmax.f32 %v2779_v42, 0.0 }
 0x460   : > { %v2900_v49 = vmax.f32 %v2781_v26, 0.0 }
 0x461   : > { %v2949_v50 = vpack.c.bf16 %v2899_v52, %v2897_v28 }
 0x462   : > { %v2950_v55 = vpack.c.bf16 %v2900_v49, %v2898_v48  ;;  %v2784_v56 = vpop.f32.mrb[156].mxu0 }
 0x463   : > { %v2785_v61 = vadd.f32 %v2784_v56, %v7842_v58  ;;  %v2786_v62 = vpop.f32.mrb[157].mxu0 }
 0x464   : > { %v2787_v63 = vadd.f32 %v2786_v62, %v7845_v46  ;;  %v2788_v1 = vpop.f32.mrb[158].mxu0  ;;  %3253 = vmatprep.mubr.bf16.mxu1 %v2950_v55 }
 0x465   : > { %v2789_v2 = vadd.f32 %v2788_v1, %v7842_v58  ;;  %v2790_v32 = vpop.f32.mrb[159].mxu0  ;;  %3254 = vmatmul.mubr.bf16.gmra.mrb[24].mxu1 %v2949_v50  ;;  %v2901_v59 = vmax.f32 %v2785_v61, 0.0 }
 0x466   : > { %v2791_v3 = vadd.f32 %v2790_v32, %v7845_v46  ;;  %v2902_v18 = vmax.f32 %v2787_v63, 0.0 }
 0x467   : > { %v2903_v53 = vmax.f32 %v2789_v2, 0.0 }
 0x468   : > { %v2904_v19 = vmax.f32 %v2791_v3, 0.0 }
 0x469   : > { %v2951_v0 = vpack.c.bf16 %v2903_v53, %v2901_v59 }
 0x46a   : > { %v2952_v6 = vpack.c.bf16 %v2904_v19, %v2902_v18  ;;  %v2794_v47 = vpop.f32.mrb[160].mxu0 }
 0x46b   : > { %v2795_v8 = vadd.f32 %v2794_v47, %v7842_v58  ;;  %v2796_v9 = vpop.f32.mrb[161].mxu0 }
 0x46c   : > { %v2797_v11 = vadd.f32 %v2796_v9, %v7845_v46  ;;  %v2798_v12 = vpop.f32.mrb[162].mxu0  ;;  %3263 = vmatprep.mubr.bf16.mxu1 %v2952_v6 }
 0x46d   : > { %v2799_v7 = vadd.f32 %v2798_v12, %v7842_v58  ;;  %v2800_v13 = vpop.f32.mrb[163].mxu0  ;;  %3264 = vmatmul.mubr.bf16.gmra.mrb[28].mxu1 %v2951_v0  ;;  %v2905_v60 = vmax.f32 %v2795_v8, 0.0  ;;  %v6585_v12 = vld [vmem:[#allocation7 + $0xf4] ss:$8 sps:$4 sm:$0xff]  }
 0x46e   : > { %v2801_v16 = vadd.f32 %v2800_v13, %v7845_v46  ;;  %v2906_v20 = vmax.f32 %v2797_v11, 0.0  ;;  %v6583_v13 = vld [vmem:[#allocation7 + $0xf0] ss:$8 sps:$4 sm:$0xff]   ;;  %3760 = vmatprep.subr.bf16.mxu0 %v6585_v12 }
 0x46f   : > { %v2907_v17 = vmax.f32 %v2799_v7, 0.0  ;;  %3761 = vmatpush1.bf16.msra.mxu0 %v6583_v13  ;;  %v6595_v12 = vld [vmem:[#allocation9 + $0x30] ss:$8 sps:$4 sm:$0xff]  }
 0x470   : > { %v2908_v54 = vmax.f32 %v2801_v16, 0.0 }
 0x471   : > { %v2953_v21 = vpack.c.bf16 %v2907_v17, %v2905_v60 }
 0x472   : > { %v2954_v22 = vpack.c.bf16 %v2908_v54, %v2906_v20  ;;  %v2804_v23 = vpop.f32.mrb[164].mxu0 }
 0x473   : > { %v2805_v24 = vadd.f32 %v2804_v23, %v7842_v58  ;;  %v2806_v37 = vpop.f32.mrb[165].mxu0 }
 0x474   : > { %v2807_v4 = vadd.f32 %v2806_v37, %v7845_v46  ;;  %v2808_v5 = vpop.f32.mrb[166].mxu0  ;;  %3273 = vmatprep.mubr.bf16.mxu1 %v2954_v22 }
 0x475   : > { %v2809_v25 = vadd.f32 %v2808_v5, %v7842_v58  ;;  %v2810_v51 = vpop.f32.mrb[167].mxu0  ;;  %3274 = vmatmul.mubr.bf16.gmra.mrb[32].mxu1 %v2953_v21  ;;  %v2909_v30 = vmax.f32 %v2805_v24, 0.0 }
 0x476   : > { %v2811_v29 = vadd.f32 %v2810_v51, %v7845_v46  ;;  %v2910_v33 = vmax.f32 %v2807_v4, 0.0 }
 0x477   : > { %v2911_v31 = vmax.f32 %v2809_v25, 0.0 }
 0x478   : > { %v2912_v57 = vmax.f32 %v2811_v29, 0.0 }
 0x479   : > { %v2955_v34 = vpack.c.bf16 %v2911_v31, %v2909_v30 }
 0x47a   : > { %v2956_v35 = vpack.c.bf16 %v2912_v57, %v2910_v33  ;;  %v2814_v36 = vpop.f32.mrb[168].mxu0 }
 0x47b   : > { %v2815_v38 = vadd.f32 %v2814_v36, %v7842_v58  ;;  %v2816_v39 = vpop.f32.mrb[169].mxu0 }
 0x47c   : > { %v2817_v27 = vadd.f32 %v2816_v39, %v7845_v46  ;;  %v2818_v40 = vpop.f32.mrb[170].mxu0  ;;  %3283 = vmatprep.mubr.bf16.mxu1 %v2956_v35 }
 0x47d   : > { %v2819_v41 = vadd.f32 %v2818_v40, %v7842_v58  ;;  %v2820_v43 = vpop.f32.mrb[171].mxu0  ;;  %3284 = vmatmul.mubr.bf16.gmra.mrb[36].mxu1 %v2955_v34  ;;  %v2913_v42 = vmax.f32 %v2815_v38, 0.0 }
 0x47e   : > { %v2821_v44 = vadd.f32 %v2820_v43, %v7845_v46  ;;  %v2914_v26 = vmax.f32 %v2817_v27, 0.0 }
 0x47f   : > { %v2915_v45 = vmax.f32 %v2819_v41, 0.0 }
 0x480   : > { %v2916_v28 = vmax.f32 %v2821_v44, 0.0 }
 0x481   : > { %v2957_v52 = vpack.c.bf16 %v2915_v45, %v2913_v42 }
 0x482   : > { %v2958_v48 = vpack.c.bf16 %v2916_v28, %v2914_v26  ;;  %v2824_v49 = vpop.f32.mrb[172].mxu0 }
 0x483   : > { %v2825_v50 = vadd.f32 %v2824_v49, %v7842_v58  ;;  %v2826_v55 = vpop.f32.mrb[173].mxu0 }
 0x484   : > { %v2827_v56 = vadd.f32 %v2826_v55, %v7845_v46  ;;  %v2828_v61 = vpop.f32.mrb[174].mxu0  ;;  %3293 = vmatprep.mubr.bf16.mxu1 %v2958_v48 }
 0x485   : > { %v2829_v62 = vadd.f32 %v2828_v61, %v7842_v58  ;;  %v2830_v63 = vpop.f32.mrb[175].mxu0  ;;  %3294 = vmatmul.mubr.bf16.gmra.mrb[40].mxu1 %v2957_v52  ;;  %v2917_v2 = vmax.f32 %v2825_v50, 0.0 }
 0x486   : > { %v2831_v1 = vadd.f32 %v2830_v63, %v7845_v46  ;;  %v2918_v3 = vmax.f32 %v2827_v56, 0.0 }
 0x487   : > { %v2919_v32 = vmax.f32 %v2829_v62, 0.0 }
 0x488   : > { %v2920_v59 = vmax.f32 %v2831_v1, 0.0 }
 0x489   : > { %v2959_v53 = vpack.c.bf16 %v2919_v32, %v2917_v2 }
 0x48a   : > { %v2960_v18 = vpack.c.bf16 %v2920_v59, %v2918_v3  ;;  %v2834_v19 = vpop.f32.mrb[176].mxu0 }
 0x48b   : > { %v2835_v0 = vadd.f32 %v2834_v19, %v7842_v58  ;;  %v2836_v6 = vpop.f32.mrb[177].mxu0  ;;  %v6588_v19 = vld [vmem:[#allocation9 + $0x4] ss:$8 sps:$4 sm:$0xff]  }
 0x48c   : > { %v2837_v47 = vadd.f32 %v2836_v6, %v7845_v46  ;;  %v2838_v8 = vpop.f32.mrb[178].mxu0  ;;  %3303 = vmatprep.mubr.bf16.mxu1 %v2960_v18  ;;  %v6586_v18 = vld [vmem:[#allocation9] ss:$8 sps:$4 sm:$0xff]   ;;  %4223 = vmatprep.subr.bf16.mxu1 %v6588_v19  ;;  %v6591_v6 = vld [vmem:[#allocation9 + $0x14] ss:$8 sps:$4 sm:$0xff]  }
 0x48d   : > { %v2839_v9 = vadd.f32 %v2838_v8, %v7842_v58  ;;  %v2840_v11 = vpop.f32.mrb[179].mxu0  ;;  %3304 = vmatmul.mubr.bf16.gmra.mrb[44].mxu1 %v2959_v53  ;;  %v2921_v16 = vmax.f32 %v2835_v0, 0.0  ;;  %v6589_v0 = vld [vmem:[#allocation9 + $0x10] ss:$8 sps:$4 sm:$0xff]  }
 0x48e   : > { %v2841_v7 = vadd.f32 %v2840_v11, %v7845_v46  ;;  %v2922_v17 = vmax.f32 %v2837_v47, 0.0  ;;  %4224 = vmatpush1.bf16.msra.mxu1 %v6586_v18  ;;  %v6594_v47 = vld [vmem:[#allocation9 + $0x24] ss:$8 sps:$4 sm:$0xff]  }
 0x48f   : > { %v2923_v60 = vmax.f32 %v2839_v9, 0.0  ;;  %4225 = vmatprep.subr.bf16.mxu1 %v6591_v6 }
 0x490   : > { %v2924_v20 = vmax.f32 %v2841_v7, 0.0  ;;  %v6597_v7 = vld [vmem:[#allocation9 + $0x34] ss:$8 sps:$4 sm:$0xff]  }
 0x491   : > { %v2961_v54 = vpack.c.bf16 %v2923_v60, %v2921_v16 }
 0x492   : > { %v2962_v21 = vpack.c.bf16 %v2924_v20, %v2922_v17  ;;  %v2844_v22 = vpop.f32.mrb[180].mxu0  ;;  %4226 = vmatpush1.bf16.msra.mxu1 %v6589_v0  ;;  %v6613_v0 = vld [vmem:[#allocation9 + $0x90] ss:$8 sps:$4 sm:$0xff]  }
 0x493   : > { %v2845_v23 = vadd.f32 %v2844_v22, %v7842_v58  ;;  %v2846_v24 = vpop.f32.mrb[181].mxu0  ;;  %4227 = vmatprep.subr.bf16.mxu1 %v6594_v47  ;;  %v6600_v22 = vld [vmem:[#allocation9 + $0x44] ss:$8 sps:$4 sm:$0xff]  }
 0x494   : > { %v2847_v37 = vadd.f32 %v2846_v24, %v7845_v46  ;;  %v2848_v4 = vpop.f32.mrb[182].mxu0  ;;  %3313 = vmatprep.mubr.bf16.mxu1 %v2962_v21  ;;  %v6598_v21 = vld [vmem:[#allocation9 + $0x40] ss:$8 sps:$4 sm:$0xff]   ;;  %v6603_v24 = vld [vmem:[#allocation9 + $0x54] ss:$8 sps:$4 sm:$0xff]  }
 0x495   : > { %v2849_v5 = vadd.f32 %v2848_v4, %v7842_v58  ;;  %v2850_v25 = vpop.f32.mrb[183].mxu0  ;;  %3314 = vmatmul.mubr.bf16.gmra.mrb[48].mxu1 %v2961_v54  ;;  %v2925_v29 = vmax.f32 %v2845_v23, 0.0 }
 0x496   : > { %v2851_v51 = vadd.f32 %v2850_v25, %v7845_v46  ;;  %v2926_v31 = vmax.f32 %v2847_v37, 0.0 }
 0x497   : > { %v2927_v30 = vmax.f32 %v2849_v5, 0.0 }
 0x498   : > { %v2928_v33 = vmax.f32 %v2851_v51, 0.0 }
 0x499   : > { %v2963_v57 = vpack.c.bf16 %v2927_v30, %v2925_v29  ;;  %v6601_v29 = vld [vmem:[#allocation9 + $0x50] ss:$8 sps:$4 sm:$0xff]  }
 0x49a   : > { %v2964_v34 = vpack.c.bf16 %v2928_v33, %v2926_v31  ;;  %v2854_v35 = vpop.f32.mrb[184].mxu0  ;;  %v6606_v33 = vld [vmem:[#allocation9 + $0x64] ss:$8 sps:$4 sm:$0xff]  }
 0x49b   : > { %v2855_v36 = vadd.f32 %v2854_v35, %v7842_v58  ;;  %v2856_v38 = vpop.f32.mrb[185].mxu0 }
 0x49c   : > { %v2857_v39 = vadd.f32 %v2856_v38, %v7845_v46  ;;  %v2858_v27 = vpop.f32.mrb[186].mxu0  ;;  %3323 = vmatprep.mubr.bf16.mxu1 %v2964_v34 }
 0x49d   : > { %v2859_v40 = vadd.f32 %v2858_v27, %v7842_v58  ;;  %v2860_v41 = vpop.f32.mrb[187].mxu0  ;;  %3324 = vmatmul.mubr.bf16.gmra.mrb[52].mxu1 %v2963_v57  ;;  %v2929_v44 = vmax.f32 %v2855_v36, 0.0  ;;  %v6604_v27 = vld [vmem:[#allocation9 + $0x60] ss:$8 sps:$4 sm:$0xff]  }
 0x49e   : > { %v2861_v43 = vadd.f32 %v2860_v41, %v7845_v46  ;;  %v2930_v45 = vmax.f32 %v2857_v39, 0.0  ;;  %v6609_v41 = vld [vmem:[#allocation9 + $0x74] ss:$8 sps:$4 sm:$0xff]  }
 0x49f   : > { %v2931_v42 = vmax.f32 %v2859_v40, 0.0 }
 0x4a0   : > { %v2932_v26 = vmax.f32 %v2861_v43, 0.0 }
 0x4a1   : > { %v2965_v28 = vpack.c.bf16 %v2931_v42, %v2929_v44 }
 0x4a2   : > { %v2966_v52 = vpack.c.bf16 %v2932_v26, %v2930_v45  ;;  %v2864_v48 = vpop.f32.mrb[188].mxu0 }
 0x4a3   : > { %v2865_v49 = vadd.f32 %v2864_v48, %v7842_v58  ;;  %v2866_v50 = vpop.f32.mrb[189].mxu0 }
 0x4a4   : > { %v2867_v55 = vadd.f32 %v2866_v50, %v7845_v46  ;;  %v2868_v56 = vpop.f32.mrb[190].mxu0  ;;  %3333 = vmatprep.mubr.bf16.mxu1 %v2966_v52 }
 0x4a5   : > { %v2869_v61 = vadd.f32 %v2868_v56, %v7842_v58  ;;  %v2870_v62 = vpop.f32.mrb[191].mxu0  ;;  %3334 = vmatmul.mubr.bf16.gmra.mrb[56].mxu1 %v2965_v28  ;;  %v2933_v1 = vmax.f32 %v2865_v49, 0.0  ;;  %v3354_v58 = vld [vmem:[%s8555_s10] sm:$0x3]  ;;  %v6607_v28 = vld [vmem:[#allocation9 + $0x70] ss:$8 sps:$4 sm:$0xff]  }
 0x4a6   : > { %v2871_v63 = vadd.f32 %v2870_v62, %v7845_v46  ;;  %v2934_v32 = vmax.f32 %v2867_v55, 0.0  ;;  %v6592_v46 = vld [vmem:[#allocation9 + $0x20] ss:$8 sps:$4 sm:$0xff]   ;;  %v7915_v8 = vrot.slane %v3354_v58, %v7574_v14  ;;  %v7918_v9 = vrot.slane %v3354_v58, %v7581_v15  ;;  %v6612_v49 = vld [vmem:[#allocation9 + $0x84] ss:$8 sps:$4 sm:$0xff]  }
 0x4a7   : > { %v2935_v2 = vmax.f32 %v2869_v61, 0.0  ;;  %4228 = vmatpush1.bf16.msra.mxu1 %v6592_v46  ;;  %v6618_v46 = vld [vmem:[#allocation9 + $0xa4] ss:$8 sps:$4 sm:$0xff]  }
 0x4a8   : > { %v2936_v3 = vmax.f32 %v2871_v63, 0.0  ;;  %4229 = vmatprep.subr.bf16.mxu1 %v6597_v7 }
 0x4a9   : > { %v2967_v59 = vpack.c.bf16 %v2935_v2, %v2933_v1  ;;  %v6610_v1 = vld [vmem:[#allocation9 + $0x80] ss:$8 sps:$4 sm:$0xff]  }
 0x4aa   : > { %v2968_v53 = vpack.c.bf16 %v2936_v3, %v2934_v32  ;;  %v6615_v32 = vld [vmem:[#allocation9 + $0x94] ss:$8 sps:$4 sm:$0xff]  }
 0x4ab   : > { %4230 = vmatpush1.bf16.msra.mxu1 %v6595_v12 }
 0x4ac   : > { %3343 = vmatprep.mubr.bf16.mxu1 %v2968_v53  ;;  %4231 = vmatprep.subr.bf16.mxu1 %v6600_v22 }
 0x4ad   : > { %3344 = vmatmul.mubr.bf16.gmra.mrb[60].mxu1 %v2967_v59 }
 0x4af   : > { %4232 = vmatpush1.bf16.msra.mxu1 %v6598_v21 }
 0x4b0   : > { %4233 = vmatprep.subr.bf16.mxu1 %v6603_v24 }
 0x4b3   : > { %4234 = vmatpush1.bf16.msra.mxu1 %v6601_v29 }
 0x4b4   : > { %4235 = vmatprep.subr.bf16.mxu1 %v6606_v33 }
 0x4b7   : > { %4236 = vmatpush1.bf16.msra.mxu1 %v6604_v27 }
 0x4b8   : > { %4237 = vmatprep.subr.bf16.mxu1 %v6609_v41 }
 0x4bb   : > { %4238 = vmatpush1.bf16.msra.mxu1 %v6607_v28 }
 0x4bc   : > { %4239 = vmatprep.subr.bf16.mxu1 %v6612_v49 }
 0x4bf   : > { %4240 = vmatpush1.bf16.msra.mxu1 %v6610_v1 }
 0x4c0   : > { %4241 = vmatprep.subr.bf16.mxu1 %v6615_v32 }
 0x4c3   : > { %4242 = vmatpush1.bf16.msra.mxu1 %v6613_v0 }
 0x4c4   : > { %4243 = vmatprep.subr.bf16.mxu1 %v6618_v46 }
 0x508   : > { %v3195_v11 = vpop.f32.mrb[0].mxu1 }
 0x509   : > { %v3366_v13 = vadd.f32 %v7915_v8, %v3195_v11  ;;  %v3197_v16 = vpop.f32.mrb[1].mxu1 }
 0x50a   : > { %v3367_v60 = vadd.f32 %v7918_v9, %v3197_v16  ;;  %v3199_v17 = vpop.f32.mrb[2].mxu1 }
 0x50b   : > { %v3368_v20 = vadd.f32 %v7915_v8, %v3199_v17  ;;  %v3201_v54 = vpop.f32.mrb[3].mxu1  ;;  %v3430_v37 = vmax.f32 %v3366_v13, 0.0 }
 0x50c   : > { %v3369_v23 = vadd.f32 %v7918_v9, %v3201_v54  ;;  %v3431_v5 = vmax.f32 %v3367_v60, 0.0  ;;  %v6616_v60 = vld [vmem:[#allocation9 + $0xa0] ss:$8 sps:$4 sm:$0xff]  }
 0x50d   : > { %v3432_v4 = vmax.f32 %v3368_v20, 0.0  ;;  %v6621_v20 = vld [vmem:[#allocation9 + $0xb4] ss:$8 sps:$4 sm:$0xff]   ;;  %4244 = vmatpush1.bf16.msra.mxu1 %v6616_v60 }
 0x50e   : > { %v3433_v25 = vmax.f32 %v3369_v23, 0.0  ;;  %4245 = vmatprep.subr.bf16.mxu1 %v6621_v20 }
 0x50f   : > { %v3494_v51 = vpack.c.bf16 %v3432_v4, %v3430_v37  ;;  %v6619_v37 = vld [vmem:[#allocation9 + $0xb0] ss:$8 sps:$4 sm:$0xff]  }
 0x510   : > { %v3495_v30 = vpack.c.bf16 %v3433_v25, %v3431_v5  ;;  %v3205_v31 = vpop.f32.mrb[4].mxu1  ;;  %v6624_v25 = vld [vmem:[#allocation9 + $0xc4] ss:$8 sps:$4 sm:$0xff]  }
 0x511   : > { %v3370_v57 = vadd.f32 %v7915_v8, %v3205_v31  ;;  %v3207_v34 = vpop.f32.mrb[5].mxu1  ;;  %4246 = vmatpush1.bf16.msra.mxu1 %v6619_v37 }
 0x512   : > { %v3371_v35 = vadd.f32 %v7918_v9, %v3207_v34  ;;  %v3209_v36 = vpop.f32.mrb[6].mxu1  ;;  %3762 = vmatprep.mubr.bf16.mxu0 %v3495_v30  ;;  %v6622_v34 = vld [vmem:[#allocation9 + $0xc0] ss:$8 sps:$4 sm:$0xff]   ;;  %4247 = vmatprep.subr.bf16.mxu1 %v6624_v25 }
 0x513   : > { %v3372_v38 = vadd.f32 %v7915_v8, %v3209_v36  ;;  %v3211_v39 = vpop.f32.mrb[7].mxu1  ;;  %3763 = vmatmul.mubr.bf16.vlgmr.msra.gmra.mrb[192].mxu0 %v3494_v51  ;;  %v3434_v43 = vmax.f32 %v3370_v57, 0.0  ;;  %v6627_v36 = vld [vmem:[#allocation9 + $0xd4] ss:$8 sps:$4 sm:$0xff]  }
 0x514   : > { %v3373_v40 = vadd.f32 %v7918_v9, %v3211_v39  ;;  %v3435_v42 = vmax.f32 %v3371_v35, 0.0 }
 0x515   : > { %v3436_v44 = vmax.f32 %v3372_v38, 0.0  ;;  %4248 = vmatpush1.bf16.msra.mxu1 %v6622_v34 }
 0x516   : > { %v3437_v45 = vmax.f32 %v3373_v40, 0.0  ;;  %4249 = vmatprep.subr.bf16.mxu1 %v6627_v36 }
 0x517   : > { %v3496_v26 = vpack.c.bf16 %v3436_v44, %v3434_v43  ;;  %v6625_v43 = vld [vmem:[#allocation9 + $0xd0] ss:$8 sps:$4 sm:$0xff]  }
 0x518   : > { %v3497_v52 = vpack.c.bf16 %v3437_v45, %v3435_v42  ;;  %v3215_v48 = vpop.f32.mrb[8].mxu1  ;;  %v6630_v45 = vld [vmem:[#allocation9 + $0xe4] ss:$8 sps:$4 sm:$0xff]  }
 0x519   : > { %v3374_v50 = vadd.f32 %v7915_v8, %v3215_v48  ;;  %v3217_v55 = vpop.f32.mrb[9].mxu1  ;;  %4250 = vmatpush1.bf16.msra.mxu1 %v6625_v43 }
 0x51a   : > { %v3375_v56 = vadd.f32 %v7918_v9, %v3217_v55  ;;  %v3219_v61 = vpop.f32.mrb[10].mxu1  ;;  %3772 = vmatprep.mubr.bf16.mxu0 %v3497_v52  ;;  %v6628_v55 = vld [vmem:[#allocation9 + $0xe0] ss:$8 sps:$4 sm:$0xff]   ;;  %4251 = vmatprep.subr.bf16.mxu1 %v6630_v45 }
 0x51b   : > { %v3376_v62 = vadd.f32 %v7915_v8, %v3219_v61  ;;  %v3221_v63 = vpop.f32.mrb[11].mxu1  ;;  %3773 = vmatmul.mubr.bf16.gmra.mrb[196].mxu0 %v3496_v26  ;;  %v3438_v3 = vmax.f32 %v3374_v50, 0.0 }
 0x51c   : > { %v3377_v2 = vadd.f32 %v7918_v9, %v3221_v63  ;;  %v3439_v53 = vmax.f32 %v3375_v56, 0.0 }
 0x51d   : > { %v3440_v59 = vmax.f32 %v3376_v62, 0.0  ;;  %4252 = vmatpush1.bf16.msra.mxu1 %v6628_v55 }
 0x51e   : > { %v3441_v18 = vmax.f32 %v3377_v2, 0.0 }
 0x51f   : > { %v3498_v19 = vpack.c.bf16 %v3440_v59, %v3438_v3 }
 0x520   : > { %v3499_v6 = vpack.c.bf16 %v3441_v18, %v3439_v53  ;;  %v3225_v58 = vpop.f32.mrb[12].mxu1 }
 0x521   : > { %v3378_v47 = vadd.f32 %v7915_v8, %v3225_v58  ;;  %v3227_v11 = vpop.f32.mrb[13].mxu1 }
 0x522   : > { %v3379_v12 = vadd.f32 %v7918_v9, %v3227_v11  ;;  %v3229_v7 = vpop.f32.mrb[14].mxu1  ;;  %3782 = vmatprep.mubr.bf16.mxu0 %v3499_v6 }
 0x523   : > { %v3380_v13 = vadd.f32 %v7915_v8, %v3229_v7  ;;  %v3231_v16 = vpop.f32.mrb[15].mxu1  ;;  %3783 = vmatmul.mubr.bf16.gmra.mrb[200].mxu0 %v3498_v19  ;;  %v3442_v54 = vmax.f32 %v3378_v47, 0.0 }
 0x524   : > { %v3381_v17 = vadd.f32 %v7918_v9, %v3231_v16  ;;  %v3443_v22 = vmax.f32 %v3379_v12, 0.0 }
 0x525   : > { %v3444_v21 = vmax.f32 %v3380_v13, 0.0 }
 0x526   : > { %v3445_v23 = vmax.f32 %v3381_v17, 0.0 }
 0x527   : > { %v3500_v24 = vpack.c.bf16 %v3444_v21, %v3442_v54 }
 0x528   : > { %v3501_v4 = vpack.c.bf16 %v3445_v23, %v3443_v22  ;;  %v3235_v5 = vpop.f32.mrb[16].mxu1 }
 0x529   : > { %v3382_v51 = vadd.f32 %v7915_v8, %v3235_v5  ;;  %v3237_v29 = vpop.f32.mrb[17].mxu1 }
 0x52a   : > { %v3383_v30 = vadd.f32 %v7918_v9, %v3237_v29  ;;  %v3239_v31 = vpop.f32.mrb[18].mxu1  ;;  %3792 = vmatprep.mubr.bf16.mxu0 %v3501_v4 }
 0x52b   : > { %v3384_v33 = vadd.f32 %v7915_v8, %v3239_v31  ;;  %v3241_v57 = vpop.f32.mrb[19].mxu1  ;;  %3793 = vmatmul.mubr.bf16.gmra.mrb[204].mxu0 %v3500_v24  ;;  %v3446_v38 = vmax.f32 %v3382_v51, 0.0 }
 0x52c   : > { %v3385_v35 = vadd.f32 %v7918_v9, %v3241_v57  ;;  %v3447_v27 = vmax.f32 %v3383_v30, 0.0 }
 0x52d   : > { %v3448_v39 = vmax.f32 %v3384_v33, 0.0 }
 0x52e   : > { %v3449_v40 = vmax.f32 %v3385_v35, 0.0 }
 0x52f   : > { %v3502_v41 = vpack.c.bf16 %v3448_v39, %v3446_v38 }
 0x530   : > { %v3503_v44 = vpack.c.bf16 %v3449_v40, %v3447_v27  ;;  %v3245_v42 = vpop.f32.mrb[20].mxu1 }
 0x531   : > { %v3386_v26 = vadd.f32 %v7915_v8, %v3245_v42  ;;  %v3247_v28 = vpop.f32.mrb[21].mxu1 }
 0x532   : > { %v3387_v52 = vadd.f32 %v7918_v9, %v3247_v28  ;;  %v3249_v48 = vpop.f32.mrb[22].mxu1  ;;  %3802 = vmatprep.mubr.bf16.mxu0 %v3503_v44 }
 0x533   : > { %v3388_v49 = vadd.f32 %v7915_v8, %v3249_v48  ;;  %v3251_v50 = vpop.f32.mrb[23].mxu1  ;;  %3803 = vmatmul.mubr.bf16.gmra.mrb[208].mxu0 %v3502_v41  ;;  %v3450_v61 = vmax.f32 %v3386_v26, 0.0 }
 0x534   : > { %v3389_v56 = vadd.f32 %v7918_v9, %v3251_v50  ;;  %v3451_v63 = vmax.f32 %v3387_v52, 0.0 }
 0x535   : > { %v3452_v62 = vmax.f32 %v3388_v49, 0.0 }
 0x536   : > { %v3453_v1 = vmax.f32 %v3389_v56, 0.0 }
 0x537   : > { %v3504_v2 = vpack.c.bf16 %v3452_v62, %v3450_v61 }
 0x538   : > { %v3505_v32 = vpack.c.bf16 %v3453_v1, %v3451_v63  ;;  %v3255_v3 = vpop.f32.mrb[24].mxu1 }
 0x539   : > { %v3390_v59 = vadd.f32 %v7915_v8, %v3255_v3  ;;  %v3257_v53 = vpop.f32.mrb[25].mxu1 }
 0x53a   : > { %v3391_v18 = vadd.f32 %v7918_v9, %v3257_v53  ;;  %v3259_v19 = vpop.f32.mrb[26].mxu1  ;;  %3812 = vmatprep.mubr.bf16.mxu0 %v3505_v32 }
 0x53b   : > { %v3392_v0 = vadd.f32 %v7915_v8, %v3259_v19  ;;  %v3261_v6 = vpop.f32.mrb[27].mxu1  ;;  %3813 = vmatmul.mubr.bf16.gmra.mrb[212].mxu0 %v3504_v2  ;;  %v3454_v46 = vmax.f32 %v3390_v59, 0.0 }
 0x53c   : > { %v3393_v58 = vadd.f32 %v7918_v9, %v3261_v6  ;;  %v3455_v11 = vmax.f32 %v3391_v18, 0.0 }
 0x53d   : > { %v3456_v47 = vmax.f32 %v3392_v0, 0.0 }
 0x53e   : > { %v3457_v12 = vmax.f32 %v3393_v58, 0.0 }
 0x53f   : > { %v3506_v7 = vpack.c.bf16 %v3456_v47, %v3454_v46 }
 0x540   : > { %v3507_v13 = vpack.c.bf16 %v3457_v12, %v3455_v11  ;;  %v3265_v16 = vpop.f32.mrb[28].mxu1 }
 0x541   : > { %v3394_v60 = vadd.f32 %v7915_v8, %v3265_v16  ;;  %v3267_v17 = vpop.f32.mrb[29].mxu1 }
 0x542   : > { %v3395_v20 = vadd.f32 %v7918_v9, %v3267_v17  ;;  %v3269_v54 = vpop.f32.mrb[30].mxu1  ;;  %3822 = vmatprep.mubr.bf16.mxu0 %v3507_v13 }
 0x543   : > { %v3396_v21 = vadd.f32 %v7915_v8, %v3269_v54  ;;  %v3271_v22 = vpop.f32.mrb[31].mxu1  ;;  %3823 = vmatmul.mubr.bf16.gmra.mrb[216].mxu0 %v3506_v7  ;;  %v3458_v24 = vmax.f32 %v3394_v60, 0.0 }
 0x544   : > { %v3397_v23 = vadd.f32 %v7918_v9, %v3271_v22  ;;  %v3459_v4 = vmax.f32 %v3395_v20, 0.0 }
 0x545   : > { %v3460_v37 = vmax.f32 %v3396_v21, 0.0 }
 0x546   : > { %v3461_v5 = vmax.f32 %v3397_v23, 0.0 }
 0x547   : > { %v3508_v25 = vpack.c.bf16 %v3460_v37, %v3458_v24 }
 0x548   : > { %v3509_v51 = vpack.c.bf16 %v3461_v5, %v3459_v4  ;;  %v3275_v29 = vpop.f32.mrb[32].mxu1 }
 0x549   : > { %v3398_v30 = vadd.f32 %v7915_v8, %v3275_v29  ;;  %v3277_v31 = vpop.f32.mrb[33].mxu1 }
 0x54a   : > { %v3399_v33 = vadd.f32 %v7918_v9, %v3277_v31  ;;  %v3279_v57 = vpop.f32.mrb[34].mxu1  ;;  %3832 = vmatprep.mubr.bf16.mxu0 %v3509_v51 }
 0x54b   : > { %v3400_v34 = vadd.f32 %v7915_v8, %v3279_v57  ;;  %v3281_v35 = vpop.f32.mrb[35].mxu1  ;;  %3833 = vmatmul.mubr.bf16.gmra.mrb[220].mxu0 %v3508_v25  ;;  %v3462_v38 = vmax.f32 %v3398_v30, 0.0  ;;  %v6633_v57 = vld [vmem:[#allocation9 + $0xf4] ss:$8 sps:$4 sm:$0xff]  }
 0x54c   : > { %v3401_v36 = vadd.f32 %v7918_v9, %v3281_v35  ;;  %v3463_v27 = vmax.f32 %v3399_v33, 0.0  ;;  %v6631_v35 = vld [vmem:[#allocation9 + $0xf0] ss:$8 sps:$4 sm:$0xff]   ;;  %4253 = vmatprep.subr.bf16.mxu1 %v6633_v57 }
 0x54d   : > { %v3464_v39 = vmax.f32 %v3400_v34, 0.0  ;;  %4254 = vmatpush1.bf16.msra.mxu1 %v6631_v35  ;;  %v6643_v57 = vld [vmem:[#allocation10 + $0x30] ss:$8 sps:$4 sm:$0xff]  }
 0x54e   : > { %v3465_v40 = vmax.f32 %v3401_v36, 0.0 }
 0x54f   : > { %v3510_v41 = vpack.c.bf16 %v3464_v39, %v3462_v38 }
 0x550   : > { %v3511_v43 = vpack.c.bf16 %v3465_v40, %v3463_v27  ;;  %v3285_v44 = vpop.f32.mrb[36].mxu1 }
 0x551   : > { %v3402_v42 = vadd.f32 %v7915_v8, %v3285_v44  ;;  %v3287_v45 = vpop.f32.mrb[37].mxu1 }
 0x552   : > { %v3403_v26 = vadd.f32 %v7918_v9, %v3287_v45  ;;  %v3289_v28 = vpop.f32.mrb[38].mxu1  ;;  %3842 = vmatprep.mubr.bf16.mxu0 %v3511_v43 }
 0x553   : > { %v3404_v52 = vadd.f32 %v7915_v8, %v3289_v28  ;;  %v3291_v48 = vpop.f32.mrb[39].mxu1  ;;  %3843 = vmatmul.mubr.bf16.gmra.mrb[224].mxu0 %v3510_v41  ;;  %v3466_v50 = vmax.f32 %v3402_v42, 0.0 }
 0x554   : > { %v3405_v49 = vadd.f32 %v7918_v9, %v3291_v48  ;;  %v3467_v56 = vmax.f32 %v3403_v26, 0.0 }
 0x555   : > { %v3468_v55 = vmax.f32 %v3404_v52, 0.0 }
 0x556   : > { %v3469_v61 = vmax.f32 %v3405_v49, 0.0 }
 0x557   : > { %v3512_v62 = vpack.c.bf16 %v3468_v55, %v3466_v50 }
 0x558   : > { %v3513_v63 = vpack.c.bf16 %v3469_v61, %v3467_v56  ;;  %v3295_v1 = vpop.f32.mrb[40].mxu1 }
 0x559   : > { %v3406_v2 = vadd.f32 %v7915_v8, %v3295_v1  ;;  %v3297_v32 = vpop.f32.mrb[41].mxu1 }
 0x55a   : > { %v3407_v3 = vadd.f32 %v7918_v9, %v3297_v32  ;;  %v3299_v59 = vpop.f32.mrb[42].mxu1  ;;  %3852 = vmatprep.mubr.bf16.mxu0 %v3513_v63 }
 0x55b   : > { %v3408_v53 = vadd.f32 %v7915_v8, %v3299_v59  ;;  %v3301_v18 = vpop.f32.mrb[43].mxu1  ;;  %3853 = vmatmul.mubr.bf16.gmra.mrb[228].mxu0 %v3512_v62  ;;  %v3470_v0 = vmax.f32 %v3406_v2, 0.0 }
 0x55c   : > { %v3409_v19 = vadd.f32 %v7918_v9, %v3301_v18  ;;  %v3471_v58 = vmax.f32 %v3407_v3, 0.0 }
 0x55d   : > { %v3472_v6 = vmax.f32 %v3408_v53, 0.0 }
 0x55e   : > { %v3473_v46 = vmax.f32 %v3409_v19, 0.0 }
 0x55f   : > { %v3514_v47 = vpack.c.bf16 %v3472_v6, %v3470_v0 }
 0x560   : > { %v3515_v11 = vpack.c.bf16 %v3473_v46, %v3471_v58  ;;  %v3305_v12 = vpop.f32.mrb[44].mxu1 }
 0x561   : > { %v3410_v7 = vadd.f32 %v7915_v8, %v3305_v12  ;;  %v3307_v13 = vpop.f32.mrb[45].mxu1 }
 0x562   : > { %v3411_v16 = vadd.f32 %v7918_v9, %v3307_v13  ;;  %v3309_v60 = vpop.f32.mrb[46].mxu1  ;;  %3862 = vmatprep.mubr.bf16.mxu0 %v3515_v11 }
 0x563   : > { %v3412_v17 = vadd.f32 %v7915_v8, %v3309_v60  ;;  %v3311_v20 = vpop.f32.mrb[47].mxu1  ;;  %3863 = vmatmul.mubr.bf16.gmra.mrb[232].mxu0 %v3514_v47  ;;  %v3474_v21 = vmax.f32 %v3410_v7, 0.0 }
 0x564   : > { %v3413_v54 = vadd.f32 %v7918_v9, %v3311_v20  ;;  %v3475_v23 = vmax.f32 %v3411_v16, 0.0 }
 0x565   : > { %v3476_v22 = vmax.f32 %v3412_v17, 0.0 }
 0x566   : > { %v3477_v24 = vmax.f32 %v3413_v54, 0.0 }
 0x567   : > { %v3516_v37 = vpack.c.bf16 %v3476_v22, %v3474_v21 }
 0x568   : > { %v3517_v4 = vpack.c.bf16 %v3477_v24, %v3475_v23  ;;  %v3315_v5 = vpop.f32.mrb[48].mxu1 }
 0x569   : > { %v3414_v25 = vadd.f32 %v7915_v8, %v3315_v5  ;;  %v3317_v51 = vpop.f32.mrb[49].mxu1  ;;  %v6636_v5 = vld [vmem:[#allocation10 + $0x4] ss:$8 sps:$4 sm:$0xff]  }
 0x56a   : > { %v3415_v29 = vadd.f32 %v7918_v9, %v3317_v51  ;;  %v3319_v30 = vpop.f32.mrb[50].mxu1  ;;  %3872 = vmatprep.mubr.bf16.mxu0 %v3517_v4  ;;  %v6634_v4 = vld [vmem:[#allocation10] ss:$8 sps:$4 sm:$0xff]   ;;  %4716 = vmatprep.subr.bf16.mxu0 %v6636_v5  ;;  %v6639_v51 = vld [vmem:[#allocation10 + $0x14] ss:$8 sps:$4 sm:$0xff]  }
 0x56b   : > { %v3416_v31 = vadd.f32 %v7915_v8, %v3319_v30  ;;  %v3321_v33 = vpop.f32.mrb[51].mxu1  ;;  %3873 = vmatmul.mubr.bf16.gmra.mrb[236].mxu0 %v3516_v37  ;;  %v3478_v36 = vmax.f32 %v3414_v25, 0.0  ;;  %v6637_v25 = vld [vmem:[#allocation10 + $0x10] ss:$8 sps:$4 sm:$0xff]  }
 0x56c   : > { %v3417_v34 = vadd.f32 %v7918_v9, %v3321_v33  ;;  %v3479_v39 = vmax.f32 %v3415_v29, 0.0  ;;  %4717 = vmatpush1.bf16.msra.mxu0 %v6634_v4  ;;  %v6642_v29 = vld [vmem:[#allocation10 + $0x24] ss:$8 sps:$4 sm:$0xff]  }
 0x56d   : > { %v3480_v38 = vmax.f32 %v3416_v31, 0.0  ;;  %4718 = vmatprep.subr.bf16.mxu0 %v6639_v51 }
 0x56e   : > { %v3481_v27 = vmax.f32 %v3417_v34, 0.0  ;;  %v6645_v34 = vld [vmem:[#allocation10 + $0x34] ss:$8 sps:$4 sm:$0xff]  }
 0x56f   : > { %v3518_v40 = vpack.c.bf16 %v3480_v38, %v3478_v36 }
 0x570   : > { %v3519_v41 = vpack.c.bf16 %v3481_v27, %v3479_v39  ;;  %v3325_v43 = vpop.f32.mrb[52].mxu1  ;;  %4719 = vmatpush1.bf16.msra.mxu0 %v6637_v25  ;;  %v6661_v25 = vld [vmem:[#allocation10 + $0x90] ss:$8 sps:$4 sm:$0xff]  }
 0x571   : > { %v3418_v44 = vadd.f32 %v7915_v8, %v3325_v43  ;;  %v3327_v42 = vpop.f32.mrb[53].mxu1  ;;  %4720 = vmatprep.subr.bf16.mxu0 %v6642_v29  ;;  %v6648_v43 = vld [vmem:[#allocation10 + $0x44] ss:$8 sps:$4 sm:$0xff]  }
 0x572   : > { %v3419_v45 = vadd.f32 %v7918_v9, %v3327_v42  ;;  %v3329_v26 = vpop.f32.mrb[54].mxu1  ;;  %3882 = vmatprep.mubr.bf16.mxu0 %v3519_v41  ;;  %v6646_v41 = vld [vmem:[#allocation10 + $0x40] ss:$8 sps:$4 sm:$0xff]   ;;  %v6651_v42 = vld [vmem:[#allocation10 + $0x54] ss:$8 sps:$4 sm:$0xff]  }
 0x573   : > { %v3420_v28 = vadd.f32 %v7915_v8, %v3329_v26  ;;  %v3331_v52 = vpop.f32.mrb[55].mxu1  ;;  %3883 = vmatmul.mubr.bf16.gmra.mrb[240].mxu0 %v3518_v40  ;;  %v3482_v49 = vmax.f32 %v3418_v44, 0.0 }
 0x574   : > { %v3421_v48 = vadd.f32 %v7918_v9, %v3331_v52  ;;  %v3483_v55 = vmax.f32 %v3419_v45, 0.0 }
 0x575   : > { %v3484_v50 = vmax.f32 %v3420_v28, 0.0 }
 0x576   : > { %v3485_v56 = vmax.f32 %v3421_v48, 0.0 }
 0x577   : > { %v3520_v61 = vpack.c.bf16 %v3484_v50, %v3482_v49  ;;  %v6649_v49 = vld [vmem:[#allocation10 + $0x50] ss:$8 sps:$4 sm:$0xff]  }
 0x578   : > { %v3521_v62 = vpack.c.bf16 %v3485_v56, %v3483_v55  ;;  %v3335_v63 = vpop.f32.mrb[56].mxu1  ;;  %v6654_v56 = vld [vmem:[#allocation10 + $0x64] ss:$8 sps:$4 sm:$0xff]  }
 0x579   : > { %v3422_v1 = vadd.f32 %v7915_v8, %v3335_v63  ;;  %v3337_v2 = vpop.f32.mrb[57].mxu1 }
 0x57a   : > { %v3423_v32 = vadd.f32 %v7918_v9, %v3337_v2  ;;  %v3339_v3 = vpop.f32.mrb[58].mxu1  ;;  %3892 = vmatprep.mubr.bf16.mxu0 %v3521_v62 }
 0x57b   : > { %v3424_v59 = vadd.f32 %v7915_v8, %v3339_v3  ;;  %v3341_v53 = vpop.f32.mrb[59].mxu1  ;;  %3893 = vmatmul.mubr.bf16.gmra.mrb[244].mxu0 %v3520_v61  ;;  %v3486_v19 = vmax.f32 %v3422_v1, 0.0  ;;  %v6652_v3 = vld [vmem:[#allocation10 + $0x60] ss:$8 sps:$4 sm:$0xff]  }
 0x57c   : > { %v3425_v18 = vadd.f32 %v7918_v9, %v3341_v53  ;;  %v3487_v6 = vmax.f32 %v3423_v32, 0.0  ;;  %v6657_v53 = vld [vmem:[#allocation10 + $0x74] ss:$8 sps:$4 sm:$0xff]  }
 0x57d   : > { %v3488_v0 = vmax.f32 %v3424_v59, 0.0 }
 0x57e   : > { %v3489_v58 = vmax.f32 %v3425_v18, 0.0 }
 0x57f   : > { %v3522_v46 = vpack.c.bf16 %v3488_v0, %v3486_v19 }
 0x580   : > { %v3523_v47 = vpack.c.bf16 %v3489_v58, %v3487_v6  ;;  %v3345_v11 = vpop.f32.mrb[60].mxu1 }
 0x581   : > { %v3426_v12 = vadd.f32 %v7915_v8, %v3345_v11  ;;  %v3347_v7 = vpop.f32.mrb[61].mxu1 }
 0x582   : > { %v3427_v13 = vadd.f32 %v7918_v9, %v3347_v7  ;;  %v3349_v16 = vpop.f32.mrb[62].mxu1  ;;  %3902 = vmatprep.mubr.bf16.mxu0 %v3523_v47 }
 0x583   : > { %v3428_v60 = vadd.f32 %v7915_v8, %v3349_v16  ;;  %v3351_v17 = vpop.f32.mrb[63].mxu1  ;;  %3903 = vmatmul.mubr.bf16.gmra.mrb[248].mxu0 %v3522_v46  ;;  %v3490_v54 = vmax.f32 %v3426_v12, 0.0  ;;  %v3558_v8 = vld [vmem:[%s8557_s12] sm:$0x3]  ;;  %v6655_v46 = vld [vmem:[#allocation10 + $0x70] ss:$8 sps:$4 sm:$0xff]  }
 0x584   : > { %v3429_v20 = vadd.f32 %v7918_v9, %v3351_v17  ;;  %v3491_v22 = vmax.f32 %v3427_v13, 0.0  ;;  %v6640_v9 = vld [vmem:[#allocation10 + $0x20] ss:$8 sps:$4 sm:$0xff]   ;;  %v7988_v30 = vrot.slane %v3558_v8, %v7574_v14  ;;  %v7991_v31 = vrot.slane %v3558_v8, %v7581_v15  ;;  %v6660_v12 = vld [vmem:[#allocation10 + $0x84] ss:$8 sps:$4 sm:$0xff]  }
 0x585   : > { %v3492_v21 = vmax.f32 %v3428_v60, 0.0  ;;  %4721 = vmatpush1.bf16.msra.mxu0 %v6640_v9  ;;  %v6666_v9 = vld [vmem:[#allocation10 + $0xa4] ss:$8 sps:$4 sm:$0xff]  }
 0x586   : > { %v3493_v23 = vmax.f32 %v3429_v20, 0.0  ;;  %4722 = vmatprep.subr.bf16.mxu0 %v6645_v34 }
 0x587   : > { %v3524_v24 = vpack.c.bf16 %v3492_v21, %v3490_v54  ;;  %v6658_v54 = vld [vmem:[#allocation10 + $0x80] ss:$8 sps:$4 sm:$0xff]  }
 0x588   : > { %v3525_v37 = vpack.c.bf16 %v3493_v23, %v3491_v22  ;;  %v6663_v22 = vld [vmem:[#allocation10 + $0x94] ss:$8 sps:$4 sm:$0xff]  }
 0x589   : > { %4723 = vmatpush1.bf16.msra.mxu0 %v6643_v57 }
 0x58a   : > { %3912 = vmatprep.mubr.bf16.mxu0 %v3525_v37  ;;  %4724 = vmatprep.subr.bf16.mxu0 %v6648_v43 }
 0x58b   : > { %3913 = vmatmul.mubr.bf16.gmra.mrb[252].mxu0 %v3524_v24 }
 0x58d   : > { %4725 = vmatpush1.bf16.msra.mxu0 %v6646_v41 }
 0x58e   : > { %4726 = vmatprep.subr.bf16.mxu0 %v6651_v42 }
 0x591   : > { %4727 = vmatpush1.bf16.msra.mxu0 %v6649_v49 }
 0x592   : > { %4728 = vmatprep.subr.bf16.mxu0 %v6654_v56 }
 0x595   : > { %4729 = vmatpush1.bf16.msra.mxu0 %v6652_v3 }
 0x596   : > { %4730 = vmatprep.subr.bf16.mxu0 %v6657_v53 }
 0x599   : > { %4731 = vmatpush1.bf16.msra.mxu0 %v6655_v46 }
 0x59a   : > { %4732 = vmatprep.subr.bf16.mxu0 %v6660_v12 }
 0x59d   : > { %4733 = vmatpush1.bf16.msra.mxu0 %v6658_v54 }
 0x59e   : > { %4734 = vmatprep.subr.bf16.mxu0 %v6663_v22 }
 0x5a1   : > { %4735 = vmatpush1.bf16.msra.mxu0 %v6661_v25 }
 0x5a2   : > { %4736 = vmatprep.subr.bf16.mxu0 %v6666_v9 }
 0x5e6   : > { %v3764_v33 = vpop.f32.mrb[192].mxu0 }
 0x5e7   : > { %v3765_v35 = vadd.f32 %v3764_v33, %v7988_v30  ;;  %v3766_v36 = vpop.f32.mrb[193].mxu0 }
 0x5e8   : > { %v3767_v38 = vadd.f32 %v3766_v36, %v7991_v31  ;;  %v3768_v39 = vpop.f32.mrb[194].mxu0 }
 0x5e9   : > { %v3769_v27 = vadd.f32 %v3768_v39, %v7988_v30  ;;  %v3770_v40 = vpop.f32.mrb[195].mxu0  ;;  %v3923_v45 = vmax.f32 %v3765_v35, 0.0 }
 0x5ea   : > { %v3771_v44 = vadd.f32 %v3770_v40, %v7991_v31  ;;  %v3924_v28 = vmax.f32 %v3767_v38, 0.0  ;;  %v6664_v38 = vld [vmem:[#allocation10 + $0xa0] ss:$8 sps:$4 sm:$0xff]  }
 0x5eb   : > { %v3925_v26 = vmax.f32 %v3769_v27, 0.0  ;;  %v6669_v27 = vld [vmem:[#allocation10 + $0xb4] ss:$8 sps:$4 sm:$0xff]   ;;  %4737 = vmatpush1.bf16.msra.mxu0 %v6664_v38 }
 0x5ec   : > { %v3926_v52 = vmax.f32 %v3771_v44, 0.0  ;;  %4738 = vmatprep.subr.bf16.mxu0 %v6669_v27 }
 0x5ed   : > { %v3987_v48 = vpack.c.bf16 %v3925_v26, %v3923_v45  ;;  %v6667_v45 = vld [vmem:[#allocation10 + $0xb0] ss:$8 sps:$4 sm:$0xff]  }
 0x5ee   : > { %v3988_v50 = vpack.c.bf16 %v3926_v52, %v3924_v28  ;;  %v3774_v55 = vpop.f32.mrb[196].mxu0  ;;  %v6672_v52 = vld [vmem:[#allocation10 + $0xc4] ss:$8 sps:$4 sm:$0xff]  }
 0x5ef   : > { %v3775_v61 = vadd.f32 %v3774_v55, %v7988_v30  ;;  %v3776_v62 = vpop.f32.mrb[197].mxu0  ;;  %4739 = vmatpush1.bf16.msra.mxu0 %v6667_v45 }
 0x5f0   : > { %v3777_v63 = vadd.f32 %v3776_v62, %v7991_v31  ;;  %v3778_v1 = vpop.f32.mrb[198].mxu0  ;;  %4255 = vmatprep.mubr.bf16.mxu1 %v3988_v50  ;;  %v6670_v62 = vld [vmem:[#allocation10 + $0xc0] ss:$8 sps:$4 sm:$0xff]   ;;  %4740 = vmatprep.subr.bf16.mxu0 %v6672_v52 }
 0x5f1   : > { %v3779_v2 = vadd.f32 %v3778_v1, %v7988_v30  ;;  %v3780_v32 = vpop.f32.mrb[199].mxu0  ;;  %4256 = vmatmul.mubr.bf16.vlgmr.msra.gmra.mrb[128].mxu1 %v3987_v48  ;;  %v3927_v18 = vmax.f32 %v3775_v61, 0.0  ;;  %v6675_v1 = vld [vmem:[#allocation10 + $0xd4] ss:$8 sps:$4 sm:$0xff]  }
 0x5f2   : > { %v3781_v59 = vadd.f32 %v3780_v32, %v7991_v31  ;;  %v3928_v0 = vmax.f32 %v3777_v63, 0.0 }
 0x5f3   : > { %v3929_v19 = vmax.f32 %v3779_v2, 0.0  ;;  %4741 = vmatpush1.bf16.msra.mxu0 %v6670_v62 }
 0x5f4   : > { %v3930_v6 = vmax.f32 %v3781_v59, 0.0  ;;  %4742 = vmatprep.subr.bf16.mxu0 %v6675_v1 }
 0x5f5   : > { %v3989_v58 = vpack.c.bf16 %v3929_v19, %v3927_v18  ;;  %v6673_v18 = vld [vmem:[#allocation10 + $0xd0] ss:$8 sps:$4 sm:$0xff]  }
 0x5f6   : > { %v3990_v47 = vpack.c.bf16 %v3930_v6, %v3928_v0  ;;  %v3784_v11 = vpop.f32.mrb[200].mxu0  ;;  %v6678_v6 = vld [vmem:[#allocation10 + $0xe4] ss:$8 sps:$4 sm:$0xff]  }
 0x5f7   : > { %v3785_v7 = vadd.f32 %v3784_v11, %v7988_v30  ;;  %v3786_v13 = vpop.f32.mrb[201].mxu0  ;;  %4743 = vmatpush1.bf16.msra.mxu0 %v6673_v18 }
 0x5f8   : > { %v3787_v16 = vadd.f32 %v3786_v13, %v7991_v31  ;;  %v3788_v60 = vpop.f32.mrb[202].mxu0  ;;  %4265 = vmatprep.mubr.bf16.mxu1 %v3990_v47  ;;  %v6676_v13 = vld [vmem:[#allocation10 + $0xe0] ss:$8 sps:$4 sm:$0xff]   ;;  %4744 = vmatprep.subr.bf16.mxu0 %v6678_v6 }
 0x5f9   : > { %v3789_v17 = vadd.f32 %v3788_v60, %v7988_v30  ;;  %v3790_v20 = vpop.f32.mrb[203].mxu0  ;;  %4266 = vmatmul.mubr.bf16.gmra.mrb[132].mxu1 %v3989_v58  ;;  %v3931_v23 = vmax.f32 %v3785_v7, 0.0 }
 0x5fa   : > { %v3791_v21 = vadd.f32 %v3790_v20, %v7991_v31  ;;  %v3932_v37 = vmax.f32 %v3787_v16, 0.0 }
 0x5fb   : > { %v3933_v24 = vmax.f32 %v3789_v17, 0.0  ;;  %4745 = vmatpush1.bf16.msra.mxu0 %v6676_v13 }
 0x5fc   : > { %v3934_v4 = vmax.f32 %v3791_v21, 0.0 }
 0x5fd   : > { %v3991_v5 = vpack.c.bf16 %v3933_v24, %v3931_v23 }
 0x5fe   : > { %v3992_v51 = vpack.c.bf16 %v3934_v4, %v3932_v37  ;;  %v3794_v8 = vpop.f32.mrb[204].mxu0 }
 0x5ff   : > { %v3795_v29 = vadd.f32 %v3794_v8, %v7988_v30  ;;  %v3796_v33 = vpop.f32.mrb[205].mxu0 }
 0x600   : > { %v3797_v57 = vadd.f32 %v3796_v33, %v7991_v31  ;;  %v3798_v34 = vpop.f32.mrb[206].mxu0  ;;  %4275 = vmatprep.mubr.bf16.mxu1 %v3992_v51 }
 0x601   : > { %v3799_v35 = vadd.f32 %v3798_v34, %v7988_v30  ;;  %v3800_v36 = vpop.f32.mrb[207].mxu0  ;;  %4276 = vmatmul.mubr.bf16.gmra.mrb[136].mxu1 %v3991_v5  ;;  %v3935_v40 = vmax.f32 %v3795_v29, 0.0 }
 0x602   : > { %v3801_v39 = vadd.f32 %v3800_v36, %v7991_v31  ;;  %v3936_v43 = vmax.f32 %v3797_v57, 0.0 }
 0x603   : > { %v3937_v41 = vmax.f32 %v3799_v35, 0.0 }
 0x604   : > { %v3938_v44 = vmax.f32 %v3801_v39, 0.0 }
 0x605   : > { %v3993_v42 = vpack.c.bf16 %v3937_v41, %v3935_v40 }
 0x606   : > { %v3994_v26 = vpack.c.bf16 %v3938_v44, %v3936_v43  ;;  %v3804_v28 = vpop.f32.mrb[208].mxu0 }
 0x607   : > { %v3805_v48 = vadd.f32 %v3804_v28, %v7988_v30  ;;  %v3806_v49 = vpop.f32.mrb[209].mxu0 }
 0x608   : > { %v3807_v50 = vadd.f32 %v3806_v49, %v7991_v31  ;;  %v3808_v55 = vpop.f32.mrb[210].mxu0  ;;  %4285 = vmatprep.mubr.bf16.mxu1 %v3994_v26 }
 0x609   : > { %v3809_v56 = vadd.f32 %v3808_v55, %v7988_v30  ;;  %v3810_v61 = vpop.f32.mrb[211].mxu0  ;;  %4286 = vmatmul.mubr.bf16.gmra.mrb[140].mxu1 %v3993_v42  ;;  %v3939_v2 = vmax.f32 %v3805_v48, 0.0 }
 0x60a   : > { %v3811_v63 = vadd.f32 %v3810_v61, %v7991_v31  ;;  %v3940_v3 = vmax.f32 %v3807_v50, 0.0 }
 0x60b   : > { %v3941_v32 = vmax.f32 %v3809_v56, 0.0 }
 0x60c   : > { %v3942_v59 = vmax.f32 %v3811_v63, 0.0 }
 0x60d   : > { %v3995_v53 = vpack.c.bf16 %v3941_v32, %v3939_v2 }
 0x60e   : > { %v3996_v19 = vpack.c.bf16 %v3942_v59, %v3940_v3  ;;  %v3814_v0 = vpop.f32.mrb[212].mxu0 }
 0x60f   : > { %v3815_v58 = vadd.f32 %v3814_v0, %v7988_v30  ;;  %v3816_v46 = vpop.f32.mrb[213].mxu0 }
 0x610   : > { %v3817_v47 = vadd.f32 %v3816_v46, %v7991_v31  ;;  %v3818_v11 = vpop.f32.mrb[214].mxu0  ;;  %4295 = vmatprep.mubr.bf16.mxu1 %v3996_v19 }
 0x611   : > { %v3819_v12 = vadd.f32 %v3818_v11, %v7988_v30  ;;  %v3820_v7 = vpop.f32.mrb[215].mxu0  ;;  %4296 = vmatmul.mubr.bf16.gmra.mrb[144].mxu1 %v3995_v53  ;;  %v3943_v60 = vmax.f32 %v3815_v58, 0.0 }
 0x612   : > { %v3821_v16 = vadd.f32 %v3820_v7, %v7991_v31  ;;  %v3944_v20 = vmax.f32 %v3817_v47, 0.0 }
 0x613   : > { %v3945_v17 = vmax.f32 %v3819_v12, 0.0 }
 0x614   : > { %v3946_v54 = vmax.f32 %v3821_v16, 0.0 }
 0x615   : > { %v3997_v21 = vpack.c.bf16 %v3945_v17, %v3943_v60 }
 0x616   : > { %v3998_v22 = vpack.c.bf16 %v3946_v54, %v3944_v20  ;;  %v3824_v23 = vpop.f32.mrb[216].mxu0 }
 0x617   : > { %v3825_v24 = vadd.f32 %v3824_v23, %v7988_v30  ;;  %v3826_v37 = vpop.f32.mrb[217].mxu0 }
 0x618   : > { %v3827_v4 = vadd.f32 %v3826_v37, %v7991_v31  ;;  %v3828_v5 = vpop.f32.mrb[218].mxu0  ;;  %4305 = vmatprep.mubr.bf16.mxu1 %v3998_v22 }
 0x619   : > { %v3829_v25 = vadd.f32 %v3828_v5, %v7988_v30  ;;  %v3830_v51 = vpop.f32.mrb[219].mxu0  ;;  %4306 = vmatmul.mubr.bf16.gmra.mrb[148].mxu1 %v3997_v21  ;;  %v3947_v9 = vmax.f32 %v3825_v24, 0.0 }
 0x61a   : > { %v3831_v8 = vadd.f32 %v3830_v51, %v7991_v31  ;;  %v3948_v33 = vmax.f32 %v3827_v4, 0.0 }
 0x61b   : > { %v3949_v29 = vmax.f32 %v3829_v25, 0.0 }
 0x61c   : > { %v3950_v57 = vmax.f32 %v3831_v8, 0.0 }
 0x61d   : > { %v3999_v34 = vpack.c.bf16 %v3949_v29, %v3947_v9 }
 0x61e   : > { %v4000_v35 = vpack.c.bf16 %v3950_v57, %v3948_v33  ;;  %v3834_v36 = vpop.f32.mrb[220].mxu0 }
 0x61f   : > { %v3835_v38 = vadd.f32 %v3834_v36, %v7988_v30  ;;  %v3836_v39 = vpop.f32.mrb[221].mxu0 }
 0x620   : > { %v3837_v27 = vadd.f32 %v3836_v39, %v7991_v31  ;;  %v3838_v40 = vpop.f32.mrb[222].mxu0  ;;  %4315 = vmatprep.mubr.bf16.mxu1 %v4000_v35 }
 0x621   : > { %v3839_v41 = vadd.f32 %v3838_v40, %v7988_v30  ;;  %v3840_v43 = vpop.f32.mrb[223].mxu0  ;;  %4316 = vmatmul.mubr.bf16.gmra.mrb[152].mxu1 %v3999_v34  ;;  %v3951_v42 = vmax.f32 %v3835_v38, 0.0 }
 0x622   : > { %v3841_v44 = vadd.f32 %v3840_v43, %v7991_v31  ;;  %v3952_v26 = vmax.f32 %v3837_v27, 0.0 }
 0x623   : > { %v3953_v45 = vmax.f32 %v3839_v41, 0.0 }
 0x624   : > { %v3954_v28 = vmax.f32 %v3841_v44, 0.0 }
 0x625   : > { %v4001_v52 = vpack.c.bf16 %v3953_v45, %v3951_v42 }
 0x626   : > { %v4002_v48 = vpack.c.bf16 %v3954_v28, %v3952_v26  ;;  %v3844_v49 = vpop.f32.mrb[224].mxu0 }
 0x627   : > { %v3845_v50 = vadd.f32 %v3844_v49, %v7988_v30  ;;  %v3846_v55 = vpop.f32.mrb[225].mxu0 }
 0x628   : > { %v3847_v56 = vadd.f32 %v3846_v55, %v7991_v31  ;;  %v3848_v61 = vpop.f32.mrb[226].mxu0  ;;  %4325 = vmatprep.mubr.bf16.mxu1 %v4002_v48 }
 0x629   : > { %v3849_v62 = vadd.f32 %v3848_v61, %v7988_v30  ;;  %v3850_v63 = vpop.f32.mrb[227].mxu0  ;;  %4326 = vmatmul.mubr.bf16.gmra.mrb[156].mxu1 %v4001_v52  ;;  %v3955_v2 = vmax.f32 %v3845_v50, 0.0  ;;  %v6681_v61 = vld [vmem:[#allocation10 + $0xf4] ss:$8 sps:$4 sm:$0xff]  }
 0x62a   : > { %v3851_v1 = vadd.f32 %v3850_v63, %v7991_v31  ;;  %v3956_v3 = vmax.f32 %v3847_v56, 0.0  ;;  %v6679_v63 = vld [vmem:[#allocation10 + $0xf0] ss:$8 sps:$4 sm:$0xff]   ;;  %4746 = vmatprep.subr.bf16.mxu0 %v6681_v61 }
 0x62b   : > { %v3957_v32 = vmax.f32 %v3849_v62, 0.0  ;;  %4747 = vmatpush1.bf16.msra.mxu0 %v6679_v63 }
 0x62c   : > { %v3958_v59 = vmax.f32 %v3851_v1, 0.0 }
 0x62d   : > { %v4003_v53 = vpack.c.bf16 %v3957_v32, %v3955_v2 }
 0x62e   : > { %v4004_v18 = vpack.c.bf16 %v3958_v59, %v3956_v3  ;;  %v3854_v19 = vpop.f32.mrb[228].mxu0 }
 0x62f   : > { %v3855_v0 = vadd.f32 %v3854_v19, %v7988_v30  ;;  %v3856_v6 = vpop.f32.mrb[229].mxu0 }
 0x630   : > { %v3857_v58 = vadd.f32 %v3856_v6, %v7991_v31  ;;  %v3858_v46 = vpop.f32.mrb[230].mxu0  ;;  %4335 = vmatprep.mubr.bf16.mxu1 %v4004_v18 }
 0x631   : > { %v3859_v47 = vadd.f32 %v3858_v46, %v7988_v30  ;;  %v3860_v11 = vpop.f32.mrb[231].mxu0  ;;  %4336 = vmatmul.mubr.bf16.gmra.mrb[160].mxu1 %v4003_v53  ;;  %v3959_v7 = vmax.f32 %v3855_v0, 0.0 }
 0x632   : > { %v3861_v12 = vadd.f32 %v3860_v11, %v7991_v31  ;;  %v3960_v16 = vmax.f32 %v3857_v58, 0.0 }
 0x633   : > { %v3961_v13 = vmax.f32 %v3859_v47, 0.0 }
 0x634   : > { %v3962_v60 = vmax.f32 %v3861_v12, 0.0 }
 0x635   : > { %v4005_v17 = vpack.c.bf16 %v3961_v13, %v3959_v7 }
 0x636   : > { %v4006_v20 = vpack.c.bf16 %v3962_v60, %v3960_v16  ;;  %v3864_v54 = vpop.f32.mrb[232].mxu0 }
 0x637   : > { %v3865_v21 = vadd.f32 %v3864_v54, %v7988_v30  ;;  %v3866_v22 = vpop.f32.mrb[233].mxu0 }
 0x638   : > { %v3867_v23 = vadd.f32 %v3866_v22, %v7991_v31  ;;  %v3868_v24 = vpop.f32.mrb[234].mxu0  ;;  %4345 = vmatprep.mubr.bf16.mxu1 %v4006_v20 }
 0x639   : > { %v3869_v37 = vadd.f32 %v3868_v24, %v7988_v30  ;;  %v3870_v4 = vpop.f32.mrb[235].mxu0  ;;  %4346 = vmatmul.mubr.bf16.gmra.mrb[164].mxu1 %v4005_v17  ;;  %v3963_v25 = vmax.f32 %v3865_v21, 0.0 }
 0x63a   : > { %v3871_v5 = vadd.f32 %v3870_v4, %v7991_v31  ;;  %v3964_v8 = vmax.f32 %v3867_v23, 0.0 }
 0x63b   : > { %v3965_v51 = vmax.f32 %v3869_v37, 0.0 }
 0x63c   : > { %v3966_v9 = vmax.f32 %v3871_v5, 0.0 }
 0x63d   : > { %v4007_v29 = vpack.c.bf16 %v3965_v51, %v3963_v25 }
 0x63e   : > { %v4008_v33 = vpack.c.bf16 %v3966_v9, %v3964_v8  ;;  %v3874_v57 = vpop.f32.mrb[236].mxu0 }
 0x63f   : > { %v3875_v34 = vadd.f32 %v3874_v57, %v7988_v30  ;;  %v3876_v35 = vpop.f32.mrb[237].mxu0 }
 0x640   : > { %v3877_v36 = vadd.f32 %v3876_v35, %v7991_v31  ;;  %v3878_v38 = vpop.f32.mrb[238].mxu0  ;;  %4355 = vmatprep.mubr.bf16.mxu1 %v4008_v33 }
 0x641   : > { %v3879_v39 = vadd.f32 %v3878_v38, %v7988_v30  ;;  %v3880_v27 = vpop.f32.mrb[239].mxu0  ;;  %4356 = vmatmul.mubr.bf16.gmra.mrb[168].mxu1 %v4007_v29  ;;  %v3967_v41 = vmax.f32 %v3875_v34, 0.0 }
 0x642   : > { %v3881_v40 = vadd.f32 %v3880_v27, %v7991_v31  ;;  %v3968_v44 = vmax.f32 %v3877_v36, 0.0 }
 0x643   : > { %v3969_v43 = vmax.f32 %v3879_v39, 0.0 }
 0x644   : > { %v3970_v42 = vmax.f32 %v3881_v40, 0.0 }
 0x645   : > { %v4009_v45 = vpack.c.bf16 %v3969_v43, %v3967_v41 }
 0x646   : > { %v4010_v26 = vpack.c.bf16 %v3970_v42, %v3968_v44  ;;  %v3884_v28 = vpop.f32.mrb[240].mxu0 }
 0x647   : > { %v3885_v52 = vadd.f32 %v3884_v28, %v7988_v30  ;;  %v3886_v48 = vpop.f32.mrb[241].mxu0  ;;  %v6684_v28 = vld [vmem:[%s8592_s26 + $0x48] sm:$0xff]  }
 0x648   : > { %v3887_v49 = vadd.f32 %v3886_v48, %v7991_v31  ;;  %v3888_v50 = vpop.f32.mrb[242].mxu0  ;;  %4365 = vmatprep.mubr.bf16.mxu1 %v4010_v26  ;;  %v6682_v26 = vld [vmem:[%s8592_s26 + $0x40] sm:$0xff]  }
 0x649   : > { %v3889_v55 = vadd.f32 %v3888_v50, %v7988_v30  ;;  %v3890_v56 = vpop.f32.mrb[243].mxu0  ;;  %4366 = vmatmul.mubr.bf16.gmra.mrb[172].mxu1 %v4009_v45  ;;  %v3971_v1 = vmax.f32 %v3885_v52, 0.0  ;;  %6065 = vmatprep.subr.bf16.mxu1 %v6682_v26  ;;  %v6685_v52 = vld [vmem:[%s8592_s26 + $0x8] sm:$0xff]  }
 0x64a   : > { %v3891_v62 = vadd.f32 %v3890_v56, %v7991_v31  ;;  %v3972_v32 = vmax.f32 %v3887_v49, 0.0 }
 0x64b   : > { %v3973_v2 = vmax.f32 %v3889_v55, 0.0 }
 0x64c   : > { %v3974_v3 = vmax.f32 %v3891_v62, 0.0 }
 0x64d   : > { %v4011_v59 = vpack.c.bf16 %v3973_v2, %v3971_v1  ;;  %v6686_v2 = vld [vmem:[%s8592_s26 + $0x50] sm:$0xff]  }
 0x64e   : > { %v4012_v53 = vpack.c.bf16 %v3974_v3, %v3972_v32  ;;  %v3894_v18 = vpop.f32.mrb[244].mxu0  ;;  %v6687_v32 = vld [vmem:[%s8592_s26 + $0x10] sm:$0xff]   ;;  %v6688_v3 = vld [vmem:[%s8592_s26 + $0x58] sm:$0xff]  }
 0x64f   : > { %v3895_v19 = vadd.f32 %v3894_v18, %v7988_v30  ;;  %v3896_v0 = vpop.f32.mrb[245].mxu0 }
 0x650   : > { %v3897_v6 = vadd.f32 %v3896_v0, %v7991_v31  ;;  %v3898_v58 = vpop.f32.mrb[246].mxu0  ;;  %4375 = vmatprep.mubr.bf16.mxu1 %v4012_v53 }
 0x651   : > { %v3899_v46 = vadd.f32 %v3898_v58, %v7988_v30  ;;  %v3900_v47 = vpop.f32.mrb[247].mxu0  ;;  %4376 = vmatmul.mubr.bf16.gmra.mrb[176].mxu1 %v4011_v59  ;;  %v3975_v12 = vmax.f32 %v3895_v19, 0.0 }
 0x652   : > { %v3901_v11 = vadd.f32 %v3900_v47, %v7991_v31  ;;  %v3976_v13 = vmax.f32 %v3897_v6, 0.0  ;;  %v6689_v6 = vld [vmem:[%s8592_s26 + $0x18] sm:$0xff]  }
 0x653   : > { %v3977_v7 = vmax.f32 %v3899_v46, 0.0  ;;  %v6690_v46 = vld [vmem:[%s8592_s26 + $0x60] sm:$0xff]  }
 0x654   : > { %v3978_v16 = vmax.f32 %v3901_v11, 0.0 }
 0x655   : > { %v4013_v60 = vpack.c.bf16 %v3977_v7, %v3975_v12 }
 0x656   : > { %v4014_v17 = vpack.c.bf16 %v3978_v16, %v3976_v13  ;;  %v3904_v20 = vpop.f32.mrb[248].mxu0 }
 0x657   : > { %v3905_v54 = vadd.f32 %v3904_v20, %v7988_v30  ;;  %v3906_v21 = vpop.f32.mrb[249].mxu0 }
 0x658   : > { %v3907_v22 = vadd.f32 %v3906_v21, %v7991_v31  ;;  %v3908_v23 = vpop.f32.mrb[250].mxu0  ;;  %4385 = vmatprep.mubr.bf16.mxu1 %v4014_v17 }
 0x659   : > { %v3909_v24 = vadd.f32 %v3908_v23, %v7988_v30  ;;  %v3910_v37 = vpop.f32.mrb[251].mxu0  ;;  %4386 = vmatmul.mubr.bf16.gmra.mrb[180].mxu1 %v4013_v60  ;;  %v3979_v5 = vmax.f32 %v3905_v54, 0.0  ;;  %v6691_v60 = vld [vmem:[%s8592_s26 + $0x20] sm:$0xff]   ;;  %v6692_v54 = vld [vmem:[%s8592_s26 + $0x68] sm:$0xff]  }
 0x65a   : > { %v3911_v4 = vadd.f32 %v3910_v37, %v7991_v31  ;;  %v3980_v51 = vmax.f32 %v3907_v22, 0.0 }
 0x65b   : > { %v3981_v25 = vmax.f32 %v3909_v24, 0.0 }
 0x65c   : > { %v3982_v8 = vmax.f32 %v3911_v4, 0.0  ;;  %v6693_v4 = vld [vmem:[%s8592_s26 + $0x28] sm:$0xff]  }
 0x65d   : > { %v4015_v9 = vpack.c.bf16 %v3981_v25, %v3979_v5  ;;  %v6694_v25 = vld [vmem:[%s8592_s26 + $0x70] sm:$0xff]  }
 0x65e   : > { %v4016_v29 = vpack.c.bf16 %v3982_v8, %v3980_v51  ;;  %v3914_v33 = vpop.f32.mrb[252].mxu0 }
 0x65f   : > { %v3915_v57 = vadd.f32 %v3914_v33, %v7988_v30  ;;  %v3916_v34 = vpop.f32.mrb[253].mxu0 }
 0x660   : > { %v3917_v35 = vadd.f32 %v3916_v34, %v7991_v31  ;;  %v3918_v36 = vpop.f32.mrb[254].mxu0  ;;  %4395 = vmatprep.mubr.bf16.mxu1 %v4016_v29  ;;  %v6695_v34 = vld [vmem:[%s8592_s26 + $0x30] sm:$0xff]  }
 0x661   : > { %v3919_v38 = vadd.f32 %v3918_v36, %v7988_v30  ;;  %v3920_v39 = vpop.f32.mrb[255].mxu0  ;;  %4396 = vmatmul.mubr.bf16.gmra.mrb[184].mxu1 %v4015_v9  ;;  %v3983_v40 = vmax.f32 %v3915_v57, 0.0  ;;  %v6683_v30 = vld [vmem:[%s8592_s26] sm:$0xff]  }
 0x662   : > { %v3921_v27 = vadd.f32 %v3920_v39, %v7991_v31  ;;  %v3984_v43 = vmax.f32 %v3917_v35, 0.0  ;;  %6066 = vmatpush3.bf16.msra.mxu1 %v6683_v30  ;;  %v4051_v31 = vld [vmem:[%s8593_s28] sm:$0x3] }
 0x663   : > { %v3985_v41 = vmax.f32 %v3919_v38, 0.0  ;;  %v8073_v48 = vrot.slane %v4051_v31, %v7574_v14  ;;  %6067 = vmatprep.subr.bf16.mxu1 %v6684_v28  ;;  %v8076_v49 = vrot.slane %v4051_v31, %v7581_v15  ;;  %v6696_v38 = vld [vmem:[%s8592_s26 + $0x78] sm:$0xff]  }
 0x664   : > { %v3986_v44 = vmax.f32 %v3921_v27, 0.0 }
 0x665   : > { %v4017_v42 = vpack.c.bf16 %v3985_v41, %v3983_v40 }
 0x666   : > { %v4018_v45 = vpack.c.bf16 %v3986_v44, %v3984_v43  ;;  %6068 = vmatpush3.bf16.msra.mxu1 %v6685_v52  ;;  %v6697_v44 = vld [vmem:[%s8592_s26 + $0x38] sm:$0xff]  }
 0x667   : > { %6069 = vmatprep.subr.bf16.mxu1 %v6686_v2 }
 0x668   : > { %4405 = vmatprep.mubr.bf16.mxu1 %v4018_v45 }
 0x669   : > { %4406 = vmatmul.mubr.bf16.gmra.mrb[188].mxu1 %v4017_v42 }
 0x66a   : > { %6070 = vmatpush3.bf16.msra.mxu1 %v6687_v32 }
 0x66b   : > { %6071 = vmatprep.subr.bf16.mxu1 %v6688_v3 }
 0x66e   : > { %6072 = vmatpush3.bf16.msra.mxu1 %v6689_v6 }
 0x66f   : > { %6073 = vmatprep.subr.bf16.mxu1 %v6690_v46 }
 0x672   : > { %6074 = vmatpush3.bf16.msra.mxu1 %v6691_v60 }
 0x673   : > { %6075 = vmatprep.subr.bf16.mxu1 %v6692_v54 }
 0x676   : > { %6076 = vmatpush3.bf16.msra.mxu1 %v6693_v4 }
 0x677   : > { %6077 = vmatprep.subr.bf16.mxu1 %v6694_v25 }
 0x67a   : > { %6078 = vmatpush3.bf16.msra.mxu1 %v6695_v34 }
 0x67b   : > { %6079 = vmatprep.subr.bf16.mxu1 %v6696_v38 }
 0x67e   : > { %6080 = vmatpush3.bf16.msra.mxu1 %v6697_v44 }
 0x6c4   : > { %v4257_v50 = vpop.f32.mrb[128].mxu1 }
 0x6c5   : > { %v4258_v55 = vadd.f32 %v4257_v50, %v8073_v48  ;;  %v4259_v56 = vpop.f32.mrb[129].mxu1 }
 0x6c6   : > { %v4260_v61 = vadd.f32 %v4259_v56, %v8076_v49  ;;  %v4261_v62 = vpop.f32.mrb[130].mxu1 }
 0x6c7   : > { %v4262_v63 = vadd.f32 %v4261_v62, %v8073_v48  ;;  %v4263_v1 = vpop.f32.mrb[131].mxu1  ;;  %v4416_v53 = vmax.f32 %v4258_v55, 0.0 }
 0x6c8   : > { %v4264_v59 = vadd.f32 %v4263_v1, %v8076_v49  ;;  %v4417_v19 = vmax.f32 %v4260_v61, 0.0 }
 0x6c9   : > { %v4418_v18 = vmax.f32 %v4262_v63, 0.0 }
 0x6ca   : > { %v4419_v0 = vmax.f32 %v4264_v59, 0.0 }
 0x6cb   : > { %v4480_v58 = vpack.c.bf16 %v4418_v18, %v4416_v53 }
 0x6cc   : > { %v4481_v47 = vpack.c.bf16 %v4419_v0, %v4417_v19  ;;  %v4267_v11 = vpop.f32.mrb[132].mxu1 }
 0x6cd   : > { %v4268_v12 = vadd.f32 %v4267_v11, %v8073_v48  ;;  %v4269_v7 = vpop.f32.mrb[133].mxu1 }
 0x6ce   : > { %v4270_v13 = vadd.f32 %v4269_v7, %v8076_v49  ;;  %v4271_v16 = vpop.f32.mrb[134].mxu1  ;;  %4748 = vmatprep.mubr.bf16.mxu0 %v4481_v47 }
 0x6cf   : > { %v4272_v17 = vadd.f32 %v4271_v16, %v8073_v48  ;;  %v4273_v20 = vpop.f32.mrb[135].mxu1  ;;  %4749 = vmatmul.mubr.bf16.vlgmr.msra.gmra.mrb[0].mxu0 %v4480_v58  ;;  %v4420_v22 = vmax.f32 %v4268_v12, 0.0 }
 0x6d0   : > { %v4274_v21 = vadd.f32 %v4273_v20, %v8076_v49  ;;  %v4421_v24 = vmax.f32 %v4270_v13, 0.0 }
 0x6d1   : > { %v4422_v23 = vmax.f32 %v4272_v17, 0.0 }
 0x6d2   : > { %v4423_v37 = vmax.f32 %v4274_v21, 0.0 }
 0x6d3   : > { %v4482_v5 = vpack.c.bf16 %v4422_v23, %v4420_v22 }
 0x6d4   : > { %v4483_v51 = vpack.c.bf16 %v4423_v37, %v4421_v24  ;;  %v4277_v8 = vpop.f32.mrb[136].mxu1 }
 0x6d5   : > { %v4278_v9 = vadd.f32 %v4277_v8, %v8073_v48  ;;  %v4279_v29 = vpop.f32.mrb[137].mxu1 }
 0x6d6   : > { %v4280_v33 = vadd.f32 %v4279_v29, %v8076_v49  ;;  %v4281_v57 = vpop.f32.mrb[138].mxu1  ;;  %4758 = vmatprep.mubr.bf16.mxu0 %v4483_v51 }
 0x6d7   : > { %v4282_v35 = vadd.f32 %v4281_v57, %v8073_v48  ;;  %v4283_v36 = vpop.f32.mrb[139].mxu1  ;;  %4759 = vmatmul.mubr.bf16.gmra.mrb[4].mxu0 %v4482_v5  ;;  %v4424_v27 = vmax.f32 %v4278_v9, 0.0 }
 0x6d8   : > { %v4284_v39 = vadd.f32 %v4283_v36, %v8076_v49  ;;  %v4425_v41 = vmax.f32 %v4280_v33, 0.0 }
 0x6d9   : > { %v4426_v40 = vmax.f32 %v4282_v35, 0.0 }
 0x6da   : > { %v4427_v43 = vmax.f32 %v4284_v39, 0.0 }
 0x6db   : > { %v4484_v42 = vpack.c.bf16 %v4426_v40, %v4424_v27 }
 0x6dc   : > { %v4485_v45 = vpack.c.bf16 %v4427_v43, %v4425_v41  ;;  %v4287_v26 = vpop.f32.mrb[140].mxu1 }
 0x6dd   : > { %v4288_v30 = vadd.f32 %v4287_v26, %v8073_v48  ;;  %v4289_v31 = vpop.f32.mrb[141].mxu1 }
 0x6de   : > { %v4290_v28 = vadd.f32 %v4289_v31, %v8076_v49  ;;  %v4291_v52 = vpop.f32.mrb[142].mxu1  ;;  %4768 = vmatprep.mubr.bf16.mxu0 %v4485_v45 }
 0x6df   : > { %v4292_v50 = vadd.f32 %v4291_v52, %v8073_v48  ;;  %v4293_v55 = vpop.f32.mrb[143].mxu1  ;;  %4769 = vmatmul.mubr.bf16.gmra.mrb[8].mxu0 %v4484_v42  ;;  %v4428_v61 = vmax.f32 %v4288_v30, 0.0 }
 0x6e0   : > { %v4294_v56 = vadd.f32 %v4293_v55, %v8076_v49  ;;  %v4429_v63 = vmax.f32 %v4290_v28, 0.0 }
 0x6e1   : > { %v4430_v62 = vmax.f32 %v4292_v50, 0.0 }
 0x6e2   : > { %v4431_v1 = vmax.f32 %v4294_v56, 0.0 }
 0x6e3   : > { %v4486_v2 = vpack.c.bf16 %v4430_v62, %v4428_v61 }
 0x6e4   : > { %v4487_v32 = vpack.c.bf16 %v4431_v1, %v4429_v63  ;;  %v4297_v3 = vpop.f32.mrb[144].mxu1 }
 0x6e5   : > { %v4298_v59 = vadd.f32 %v4297_v3, %v8073_v48  ;;  %v4299_v53 = vpop.f32.mrb[145].mxu1 }
 0x6e6   : > { %v4300_v18 = vadd.f32 %v4299_v53, %v8076_v49  ;;  %v4301_v19 = vpop.f32.mrb[146].mxu1  ;;  %4778 = vmatprep.mubr.bf16.mxu0 %v4487_v32 }
 0x6e7   : > { %v4302_v0 = vadd.f32 %v4301_v19, %v8073_v48  ;;  %v4303_v6 = vpop.f32.mrb[147].mxu1  ;;  %4779 = vmatmul.mubr.bf16.gmra.mrb[12].mxu0 %v4486_v2  ;;  %v4432_v46 = vmax.f32 %v4298_v59, 0.0 }
 0x6e8   : > { %v4304_v58 = vadd.f32 %v4303_v6, %v8076_v49  ;;  %v4433_v11 = vmax.f32 %v4300_v18, 0.0 }
 0x6e9   : > { %v4434_v47 = vmax.f32 %v4302_v0, 0.0 }
 0x6ea   : > { %v4435_v12 = vmax.f32 %v4304_v58, 0.0 }
 0x6eb   : > { %v4488_v7 = vpack.c.bf16 %v4434_v47, %v4432_v46 }
 0x6ec   : > { %v4489_v13 = vpack.c.bf16 %v4435_v12, %v4433_v11  ;;  %v4307_v16 = vpop.f32.mrb[148].mxu1 }
 0x6ed   : > { %v4308_v60 = vadd.f32 %v4307_v16, %v8073_v48  ;;  %v4309_v17 = vpop.f32.mrb[149].mxu1 }
 0x6ee   : > { %v4310_v20 = vadd.f32 %v4309_v17, %v8076_v49  ;;  %v4311_v54 = vpop.f32.mrb[150].mxu1  ;;  %4788 = vmatprep.mubr.bf16.mxu0 %v4489_v13 }
 0x6ef   : > { %v4312_v21 = vadd.f32 %v4311_v54, %v8073_v48  ;;  %v4313_v22 = vpop.f32.mrb[151].mxu1  ;;  %4789 = vmatmul.mubr.bf16.gmra.mrb[16].mxu0 %v4488_v7  ;;  %v4436_v24 = vmax.f32 %v4308_v60, 0.0 }
 0x6f0   : > { %v4314_v23 = vadd.f32 %v4313_v22, %v8076_v49  ;;  %v4437_v4 = vmax.f32 %v4310_v20, 0.0 }
 0x6f1   : > { %v4438_v37 = vmax.f32 %v4312_v21, 0.0 }
 0x6f2   : > { %v4439_v5 = vmax.f32 %v4314_v23, 0.0 }
 0x6f3   : > { %v4490_v25 = vpack.c.bf16 %v4438_v37, %v4436_v24 }
 0x6f4   : > { %v4491_v51 = vpack.c.bf16 %v4439_v5, %v4437_v4  ;;  %v4317_v8 = vpop.f32.mrb[152].mxu1 }
 0x6f5   : > { %v4318_v9 = vadd.f32 %v4317_v8, %v8073_v48  ;;  %v4319_v29 = vpop.f32.mrb[153].mxu1 }
 0x6f6   : > { %v4320_v33 = vadd.f32 %v4319_v29, %v8076_v49  ;;  %v4321_v57 = vpop.f32.mrb[154].mxu1  ;;  %4798 = vmatprep.mubr.bf16.mxu0 %v4491_v51 }
 0x6f7   : > { %v4322_v34 = vadd.f32 %v4321_v57, %v8073_v48  ;;  %v4323_v35 = vpop.f32.mrb[155].mxu1  ;;  %4799 = vmatmul.mubr.bf16.gmra.mrb[20].mxu0 %v4490_v25  ;;  %v4440_v38 = vmax.f32 %v4318_v9, 0.0 }
 0x6f8   : > { %v4324_v36 = vadd.f32 %v4323_v35, %v8076_v49  ;;  %v4441_v27 = vmax.f32 %v4320_v33, 0.0 }
 0x6f9   : > { %v4442_v39 = vmax.f32 %v4322_v34, 0.0 }
 0x6fa   : > { %v4443_v40 = vmax.f32 %v4324_v36, 0.0 }
 0x6fb   : > { %v4492_v41 = vpack.c.bf16 %v4442_v39, %v4440_v38 }
 0x6fc   : > { %v4493_v43 = vpack.c.bf16 %v4443_v40, %v4441_v27  ;;  %v4327_v44 = vpop.f32.mrb[156].mxu1 }
 0x6fd   : > { %v4328_v42 = vadd.f32 %v4327_v44, %v8073_v48  ;;  %v4329_v45 = vpop.f32.mrb[157].mxu1 }
 0x6fe   : > { %v4330_v26 = vadd.f32 %v4329_v45, %v8076_v49  ;;  %v4331_v30 = vpop.f32.mrb[158].mxu1  ;;  %4808 = vmatprep.mubr.bf16.mxu0 %v4493_v43 }
 0x6ff   : > { %v4332_v31 = vadd.f32 %v4331_v30, %v8073_v48  ;;  %v4333_v28 = vpop.f32.mrb[159].mxu1  ;;  %4809 = vmatmul.mubr.bf16.gmra.mrb[24].mxu0 %v4492_v41  ;;  %v4444_v50 = vmax.f32 %v4328_v42, 0.0 }
 0x700   : > { %v4334_v52 = vadd.f32 %v4333_v28, %v8076_v49  ;;  %v4445_v56 = vmax.f32 %v4330_v26, 0.0 }
 0x701   : > { %v4446_v55 = vmax.f32 %v4332_v31, 0.0 }
 0x702   : > { %v4447_v61 = vmax.f32 %v4334_v52, 0.0 }
 0x703   : > { %v4494_v62 = vpack.c.bf16 %v4446_v55, %v4444_v50 }
 0x704   : > { %v4495_v63 = vpack.c.bf16 %v4447_v61, %v4445_v56  ;;  %v4337_v1 = vpop.f32.mrb[160].mxu1 }
 0x705   : > { %v4338_v2 = vadd.f32 %v4337_v1, %v8073_v48  ;;  %v4339_v32 = vpop.f32.mrb[161].mxu1 }
 0x706   : > { %v4340_v3 = vadd.f32 %v4339_v32, %v8076_v49  ;;  %v4341_v59 = vpop.f32.mrb[162].mxu1  ;;  %4818 = vmatprep.mubr.bf16.mxu0 %v4495_v63 }
 0x707   : > { %v4342_v53 = vadd.f32 %v4341_v59, %v8073_v48  ;;  %v4343_v18 = vpop.f32.mrb[163].mxu1  ;;  %4819 = vmatmul.mubr.bf16.gmra.mrb[28].mxu0 %v4494_v62  ;;  %v4448_v0 = vmax.f32 %v4338_v2, 0.0 }
 0x708   : > { %v4344_v19 = vadd.f32 %v4343_v18, %v8076_v49  ;;  %v4449_v58 = vmax.f32 %v4340_v3, 0.0 }
 0x709   : > { %v4450_v6 = vmax.f32 %v4342_v53, 0.0 }
 0x70a   : > { %v4451_v46 = vmax.f32 %v4344_v19, 0.0 }
 0x70b   : > { %v4496_v47 = vpack.c.bf16 %v4450_v6, %v4448_v0 }
 0x70c   : > { %v4497_v11 = vpack.c.bf16 %v4451_v46, %v4449_v58  ;;  %v4347_v12 = vpop.f32.mrb[164].mxu1 }
 0x70d   : > { %v4348_v7 = vadd.f32 %v4347_v12, %v8073_v48  ;;  %v4349_v13 = vpop.f32.mrb[165].mxu1 }
 0x70e   : > { %v4350_v16 = vadd.f32 %v4349_v13, %v8076_v49  ;;  %v4351_v60 = vpop.f32.mrb[166].mxu1  ;;  %4828 = vmatprep.mubr.bf16.mxu0 %v4497_v11 }
 0x70f   : > { %v4352_v17 = vadd.f32 %v4351_v60, %v8073_v48  ;;  %v4353_v20 = vpop.f32.mrb[167].mxu1  ;;  %4829 = vmatmul.mubr.bf16.gmra.mrb[32].mxu0 %v4496_v47  ;;  %v4452_v21 = vmax.f32 %v4348_v7, 0.0 }
 0x710   : > { %v4354_v54 = vadd.f32 %v4353_v20, %v8076_v49  ;;  %v4453_v23 = vmax.f32 %v4350_v16, 0.0 }
 0x711   : > { %v4454_v22 = vmax.f32 %v4352_v17, 0.0 }
 0x712   : > { %v4455_v24 = vmax.f32 %v4354_v54, 0.0 }
 0x713   : > { %v4498_v37 = vpack.c.bf16 %v4454_v22, %v4452_v21 }
 0x714   : > { %v4499_v4 = vpack.c.bf16 %v4455_v24, %v4453_v23  ;;  %v4357_v5 = vpop.f32.mrb[168].mxu1 }
 0x715   : > { %v4358_v25 = vadd.f32 %v4357_v5, %v8073_v48  ;;  %v4359_v51 = vpop.f32.mrb[169].mxu1 }
 0x716   : > { %v4360_v8 = vadd.f32 %v4359_v51, %v8076_v49  ;;  %v4361_v9 = vpop.f32.mrb[170].mxu1  ;;  %4838 = vmatprep.mubr.bf16.mxu0 %v4499_v4 }
 0x717   : > { %v4362_v29 = vadd.f32 %v4361_v9, %v8073_v48  ;;  %v4363_v33 = vpop.f32.mrb[171].mxu1  ;;  %4839 = vmatmul.mubr.bf16.gmra.mrb[36].mxu0 %v4498_v37  ;;  %v4456_v34 = vmax.f32 %v4358_v25, 0.0 }
 0x718   : > { %v4364_v57 = vadd.f32 %v4363_v33, %v8076_v49  ;;  %v4457_v36 = vmax.f32 %v4360_v8, 0.0 }
 0x719   : > { %v4458_v35 = vmax.f32 %v4362_v29, 0.0 }
 0x71a   : > { %v4459_v38 = vmax.f32 %v4364_v57, 0.0 }
 0x71b   : > { %v4500_v39 = vpack.c.bf16 %v4458_v35, %v4456_v34 }
 0x71c   : > { %v4501_v27 = vpack.c.bf16 %v4459_v38, %v4457_v36  ;;  %v4367_v40 = vpop.f32.mrb[172].mxu1 }
 0x71d   : > { %v4368_v41 = vadd.f32 %v4367_v40, %v8073_v48  ;;  %v4369_v43 = vpop.f32.mrb[173].mxu1 }
 0x71e   : > { %v4370_v44 = vadd.f32 %v4369_v43, %v8076_v49  ;;  %v4371_v42 = vpop.f32.mrb[174].mxu1  ;;  %4848 = vmatprep.mubr.bf16.mxu0 %v4501_v27 }
 0x71f   : > { %v4372_v45 = vadd.f32 %v4371_v42, %v8073_v48  ;;  %v4373_v26 = vpop.f32.mrb[175].mxu1  ;;  %4849 = vmatmul.mubr.bf16.gmra.mrb[40].mxu0 %v4500_v39  ;;  %v4460_v31 = vmax.f32 %v4368_v41, 0.0 }
 0x720   : > { %v4374_v30 = vadd.f32 %v4373_v26, %v8076_v49  ;;  %v4461_v52 = vmax.f32 %v4370_v44, 0.0 }
 0x721   : > { %v4462_v28 = vmax.f32 %v4372_v45, 0.0 }
 0x722   : > { %v4463_v50 = vmax.f32 %v4374_v30, 0.0 }
 0x723   : > { %v4502_v55 = vpack.c.bf16 %v4462_v28, %v4460_v31 }
 0x724   : > { %v4503_v56 = vpack.c.bf16 %v4463_v50, %v4461_v52  ;;  %v4377_v61 = vpop.f32.mrb[176].mxu1  ;;  %v4544_v50 = vld [vmem:[%s8594_s20] sm:$0x3] }
 0x725   : > { %v4378_v62 = vadd.f32 %v4377_v61, %v8073_v48  ;;  %v4379_v63 = vpop.f32.mrb[177].mxu1 }
 0x726   : > { %v4380_v1 = vadd.f32 %v4379_v63, %v8076_v49  ;;  %v4381_v2 = vpop.f32.mrb[178].mxu1  ;;  %4858 = vmatprep.mubr.bf16.mxu0 %v4503_v56 }
 0x727   : > { %v4382_v32 = vadd.f32 %v4381_v2, %v8073_v48  ;;  %v4383_v3 = vpop.f32.mrb[179].mxu1  ;;  %4859 = vmatmul.mubr.bf16.gmra.mrb[44].mxu0 %v4502_v55  ;;  %v4464_v53 = vmax.f32 %v4378_v62, 0.0  ;;  %v8182_v55 = vrot.slane %v4544_v50, %v7574_v14 }
 0x728   : > { %v4384_v59 = vadd.f32 %v4383_v3, %v8076_v49  ;;  %v4465_v19 = vmax.f32 %v4380_v1, 0.0 }
 0x729   : > { %v4466_v18 = vmax.f32 %v4382_v32, 0.0 }
 0x72a   : > { %v4467_v0 = vmax.f32 %v4384_v59, 0.0 }
 0x72b   : > { %v4504_v6 = vpack.c.bf16 %v4466_v18, %v4464_v53 }
 0x72c   : > { %v4505_v58 = vpack.c.bf16 %v4467_v0, %v4465_v19  ;;  %v4387_v46 = vpop.f32.mrb[180].mxu1 }
 0x72d   : > { %v4388_v47 = vadd.f32 %v4387_v46, %v8073_v48  ;;  %v4389_v11 = vpop.f32.mrb[181].mxu1 }
 0x72e   : > { %v4390_v12 = vadd.f32 %v4389_v11, %v8076_v49  ;;  %v4391_v7 = vpop.f32.mrb[182].mxu1  ;;  %4868 = vmatprep.mubr.bf16.mxu0 %v4505_v58 }
 0x72f   : > { %v4392_v13 = vadd.f32 %v4391_v7, %v8073_v48  ;;  %v4393_v16 = vpop.f32.mrb[183].mxu1  ;;  %4869 = vmatmul.mubr.bf16.gmra.mrb[48].mxu0 %v4504_v6  ;;  %v4468_v17 = vmax.f32 %v4388_v47, 0.0 }
 0x730   : > { %v4394_v60 = vadd.f32 %v4393_v16, %v8076_v49  ;;  %v4469_v54 = vmax.f32 %v4390_v12, 0.0 }
 0x731   : > { %v4470_v20 = vmax.f32 %v4392_v13, 0.0 }
 0x732   : > { %v4471_v21 = vmax.f32 %v4394_v60, 0.0 }
 0x733   : > { %v4506_v22 = vpack.c.bf16 %v4470_v20, %v4468_v17 }
 0x734   : > { %v4507_v23 = vpack.c.bf16 %v4471_v21, %v4469_v54  ;;  %v4397_v24 = vpop.f32.mrb[184].mxu1 }
 0x735   : > { %v4398_v37 = vadd.f32 %v4397_v24, %v8073_v48  ;;  %v4399_v4 = vpop.f32.mrb[185].mxu1 }
 0x736   : > { %v4400_v5 = vadd.f32 %v4399_v4, %v8076_v49  ;;  %v4401_v25 = vpop.f32.mrb[186].mxu1  ;;  %4878 = vmatprep.mubr.bf16.mxu0 %v4507_v23 }
 0x737   : > { %v4402_v51 = vadd.f32 %v4401_v25, %v8073_v48  ;;  %v4403_v8 = vpop.f32.mrb[187].mxu1  ;;  %4879 = vmatmul.mubr.bf16.gmra.mrb[52].mxu0 %v4506_v22  ;;  %v4472_v29 = vmax.f32 %v4398_v37, 0.0 }
 0x738   : > { %v4404_v9 = vadd.f32 %v4403_v8, %v8076_v49  ;;  %v4473_v57 = vmax.f32 %v4400_v5, 0.0 }
 0x739   : > { %v4474_v33 = vmax.f32 %v4402_v51, 0.0 }
 0x73a   : > { %v4475_v34 = vmax.f32 %v4404_v9, 0.0 }
 0x73b   : > { %v4508_v35 = vpack.c.bf16 %v4474_v33, %v4472_v29 }
 0x73c   : > { %v4509_v36 = vpack.c.bf16 %v4475_v34, %v4473_v57  ;;  %v4407_v38 = vpop.f32.mrb[188].mxu1 }
 0x73d   : > { %v4408_v39 = vadd.f32 %v4407_v38, %v8073_v48  ;;  %v4409_v27 = vpop.f32.mrb[189].mxu1 }
 0x73e   : > { %v4410_v40 = vadd.f32 %v4409_v27, %v8076_v49  ;;  %v4411_v41 = vpop.f32.mrb[190].mxu1  ;;  %4888 = vmatprep.mubr.bf16.mxu0 %v4509_v36 }
 0x73f   : > { %v4412_v43 = vadd.f32 %v4411_v41, %v8073_v48  ;;  %v4413_v44 = vpop.f32.mrb[191].mxu1  ;;  %4889 = vmatmul.mubr.bf16.gmra.mrb[56].mxu0 %v4508_v35  ;;  %v4476_v45 = vmax.f32 %v4408_v39, 0.0  ;;  %v8185_v48 = vrot.slane %v4544_v50, %v7581_v15 }
 0x740   : > { %v4414_v42 = vadd.f32 %v4413_v44, %v8076_v49  ;;  %v4477_v30 = vmax.f32 %v4410_v40, 0.0 }
 0x741   : > { %v4478_v26 = vmax.f32 %v4412_v43, 0.0 }
 0x742   : > { %v4479_v31 = vmax.f32 %v4414_v42, 0.0 }
 0x743   : > { %v4510_v28 = vpack.c.bf16 %v4478_v26, %v4476_v45 }
 0x744   : > { %v4511_v52 = vpack.c.bf16 %v4479_v31, %v4477_v30 }
 0x746   : > { %4898 = vmatprep.mubr.bf16.mxu0 %v4511_v52 }
 0x747   : > { %4899 = vmatmul.mubr.bf16.gmra.mrb[60].mxu0 %v4510_v28 }
 0x7a2   : > { %v4750_v56 = vpop.f32.mrb[0].mxu0 }
 0x7a3   : > { %v4751_v49 = vadd.f32 %v4750_v56, %v8182_v55  ;;  %v4752_v61 = vpop.f32.mrb[1].mxu0 }
 0x7a4   : > { %v4753_v62 = vadd.f32 %v4752_v61, %v8185_v48  ;;  %v4754_v63 = vpop.f32.mrb[2].mxu0 }
 0x7a5   : > { %v4755_v1 = vadd.f32 %v4754_v63, %v8182_v55  ;;  %v4756_v2 = vpop.f32.mrb[3].mxu0  ;;  %v4909_v3 = vmax.f32 %v4751_v49, 0.0 }
 0x7a6   : > { %v4757_v32 = vadd.f32 %v4756_v2, %v8185_v48  ;;  %v4910_v53 = vmax.f32 %v4753_v62, 0.0 }
 0x7a7   : > { %v4911_v59 = vmax.f32 %v4755_v1, 0.0 }
 0x7a8   : > { %v4912_v14 = vmax.f32 %v4757_v32, 0.0 }
 0x7a9   : > { %v4973_v18 = vpack.c.bf16 %v4911_v59, %v4909_v3 }
 0x7aa   : > { %v4974_v19 = vpack.c.bf16 %v4912_v14, %v4910_v53  ;;  %v4760_v15 = vpop.f32.mrb[4].mxu0 }
 0x7ab   : > { %v4761_v0 = vadd.f32 %v4760_v15, %v8182_v55  ;;  %v4762_v6 = vpop.f32.mrb[5].mxu0 }
 0x7ac   : > { %v4763_v58 = vadd.f32 %v4762_v6, %v8185_v48  ;;  %v4764_v46 = vpop.f32.mrb[6].mxu0  ;;  %5172 = vmatprep.mubr.bf16.mxu1 %v4974_v19 }
 0x7ad   : > { %v4765_v47 = vadd.f32 %v4764_v46, %v8182_v55  ;;  %v4766_v11 = vpop.f32.mrb[7].mxu0  ;;  %5173 = vmatmul.mubr.bf16.vlgmr.msra.gmra.mrb[192].mxu1 %v4973_v18  ;;  %v4913_v7 = vmax.f32 %v4761_v0, 0.0 }
 0x7ae   : > { %v4767_v12 = vadd.f32 %v4766_v11, %v8185_v48  ;;  %v4914_v16 = vmax.f32 %v4763_v58, 0.0 }
 0x7af   : > { %v4915_v13 = vmax.f32 %v4765_v47, 0.0 }
 0x7b0   : > { %v4916_v60 = vmax.f32 %v4767_v12, 0.0 }
 0x7b1   : > { %v4975_v17 = vpack.c.bf16 %v4915_v13, %v4913_v7 }
 0x7b2   : > { %v4976_v20 = vpack.c.bf16 %v4916_v60, %v4914_v16  ;;  %v4770_v54 = vpop.f32.mrb[8].mxu0 }
 0x7b3   : > { %v4771_v21 = vadd.f32 %v4770_v54, %v8182_v55  ;;  %v4772_v22 = vpop.f32.mrb[9].mxu0 }
 0x7b4   : > { %v4773_v23 = vadd.f32 %v4772_v22, %v8185_v48  ;;  %v4774_v24 = vpop.f32.mrb[10].mxu0  ;;  %5180 = vmatprep.mubr.bf16.mxu1 %v4976_v20 }
 0x7b5   : > { %v4775_v37 = vadd.f32 %v4774_v24, %v8182_v55  ;;  %v4776_v4 = vpop.f32.mrb[11].mxu0  ;;  %5181 = vmatmul.mubr.bf16.gmra.mrb[196].mxu1 %v4975_v17  ;;  %v4917_v25 = vmax.f32 %v4771_v21, 0.0 }
 0x7b6   : > { %v4777_v5 = vadd.f32 %v4776_v4, %v8185_v48  ;;  %v4918_v8 = vmax.f32 %v4773_v23, 0.0 }
 0x7b7   : > { %v4919_v51 = vmax.f32 %v4775_v37, 0.0 }
 0x7b8   : > { %v4920_v9 = vmax.f32 %v4777_v5, 0.0 }
 0x7b9   : > { %v4977_v29 = vpack.c.bf16 %v4919_v51, %v4917_v25 }
 0x7ba   : > { %v4978_v33 = vpack.c.bf16 %v4920_v9, %v4918_v8  ;;  %v4780_v57 = vpop.f32.mrb[12].mxu0 }
 0x7bb   : > { %v4781_v34 = vadd.f32 %v4780_v57, %v8182_v55  ;;  %v4782_v35 = vpop.f32.mrb[13].mxu0 }
 0x7bc   : > { %v4783_v36 = vadd.f32 %v4782_v35, %v8185_v48  ;;  %v4784_v38 = vpop.f32.mrb[14].mxu0  ;;  %5188 = vmatprep.mubr.bf16.mxu1 %v4978_v33 }
 0x7bd   : > { %v4785_v39 = vadd.f32 %v4784_v38, %v8182_v55  ;;  %v4786_v27 = vpop.f32.mrb[15].mxu0  ;;  %5189 = vmatmul.mubr.bf16.gmra.mrb[200].mxu1 %v4977_v29  ;;  %v4921_v41 = vmax.f32 %v4781_v34, 0.0 }
 0x7be   : > { %v4787_v40 = vadd.f32 %v4786_v27, %v8185_v48  ;;  %v4922_v44 = vmax.f32 %v4783_v36, 0.0 }
 0x7bf   : > { %v4923_v43 = vmax.f32 %v4785_v39, 0.0 }
 0x7c0   : > { %v4924_v42 = vmax.f32 %v4787_v40, 0.0 }
 0x7c1   : > { %v4979_v45 = vpack.c.bf16 %v4923_v43, %v4921_v41 }
 0x7c2   : > { %v4980_v26 = vpack.c.bf16 %v4924_v42, %v4922_v44  ;;  %v4790_v30 = vpop.f32.mrb[16].mxu0 }
 0x7c3   : > { %v4791_v31 = vadd.f32 %v4790_v30, %v8182_v55  ;;  %v4792_v28 = vpop.f32.mrb[17].mxu0 }
 0x7c4   : > { %v4793_v52 = vadd.f32 %v4792_v28, %v8185_v48  ;;  %v4794_v50 = vpop.f32.mrb[18].mxu0  ;;  %5196 = vmatprep.mubr.bf16.mxu1 %v4980_v26 }
 0x7c5   : > { %v4795_v56 = vadd.f32 %v4794_v50, %v8182_v55  ;;  %v4796_v49 = vpop.f32.mrb[19].mxu0  ;;  %5197 = vmatmul.mubr.bf16.gmra.mrb[204].mxu1 %v4979_v45  ;;  %v4925_v62 = vmax.f32 %v4791_v31, 0.0 }
 0x7c6   : > { %v4797_v61 = vadd.f32 %v4796_v49, %v8185_v48  ;;  %v4926_v1 = vmax.f32 %v4793_v52, 0.0 }
 0x7c7   : > { %v4927_v63 = vmax.f32 %v4795_v56, 0.0 }
 0x7c8   : > { %v4928_v2 = vmax.f32 %v4797_v61, 0.0 }
 0x7c9   : > { %v4981_v32 = vpack.c.bf16 %v4927_v63, %v4925_v62 }
 0x7ca   : > { %v4982_v3 = vpack.c.bf16 %v4928_v2, %v4926_v1  ;;  %v4800_v59 = vpop.f32.mrb[20].mxu0 }
 0x7cb   : > { %v4801_v53 = vadd.f32 %v4800_v59, %v8182_v55  ;;  %v4802_v14 = vpop.f32.mrb[21].mxu0 }
 0x7cc   : > { %v4803_v18 = vadd.f32 %v4802_v14, %v8185_v48  ;;  %v4804_v19 = vpop.f32.mrb[22].mxu0  ;;  %5204 = vmatprep.mubr.bf16.mxu1 %v4982_v3 }
 0x7cd   : > { %v4805_v15 = vadd.f32 %v4804_v19, %v8182_v55  ;;  %v4806_v0 = vpop.f32.mrb[23].mxu0  ;;  %5205 = vmatmul.mubr.bf16.gmra.mrb[208].mxu1 %v4981_v32  ;;  %v4929_v58 = vmax.f32 %v4801_v53, 0.0 }
 0x7ce   : > { %v4807_v6 = vadd.f32 %v4806_v0, %v8185_v48  ;;  %v4930_v47 = vmax.f32 %v4803_v18, 0.0 }
 0x7cf   : > { %v4931_v46 = vmax.f32 %v4805_v15, 0.0 }
 0x7d0   : > { %v4932_v11 = vmax.f32 %v4807_v6, 0.0 }
 0x7d1   : > { %v4983_v12 = vpack.c.bf16 %v4931_v46, %v4929_v58 }
 0x7d2   : > { %v4984_v7 = vpack.c.bf16 %v4932_v11, %v4930_v47  ;;  %v4810_v13 = vpop.f32.mrb[24].mxu0 }
 0x7d3   : > { %v4811_v16 = vadd.f32 %v4810_v13, %v8182_v55  ;;  %v4812_v60 = vpop.f32.mrb[25].mxu0 }
 0x7d4   : > { %v4813_v17 = vadd.f32 %v4812_v60, %v8185_v48  ;;  %v4814_v20 = vpop.f32.mrb[26].mxu0  ;;  %5212 = vmatprep.mubr.bf16.mxu1 %v4984_v7 }
 0x7d5   : > { %v4815_v54 = vadd.f32 %v4814_v20, %v8182_v55  ;;  %v4816_v21 = vpop.f32.mrb[27].mxu0  ;;  %5213 = vmatmul.mubr.bf16.gmra.mrb[212].mxu1 %v4983_v12  ;;  %v4933_v23 = vmax.f32 %v4811_v16, 0.0 }
 0x7d6   : > { %v4817_v22 = vadd.f32 %v4816_v21, %v8185_v48  ;;  %v4934_v37 = vmax.f32 %v4813_v17, 0.0 }
 0x7d7   : > { %v4935_v24 = vmax.f32 %v4815_v54, 0.0 }
 0x7d8   : > { %v4936_v4 = vmax.f32 %v4817_v22, 0.0 }
 0x7d9   : > { %v4985_v5 = vpack.c.bf16 %v4935_v24, %v4933_v23 }
 0x7da   : > { %v4986_v25 = vpack.c.bf16 %v4936_v4, %v4934_v37  ;;  %v4820_v51 = vpop.f32.mrb[28].mxu0 }
 0x7db   : > { %v4821_v8 = vadd.f32 %v4820_v51, %v8182_v55  ;;  %v4822_v9 = vpop.f32.mrb[29].mxu0 }
 0x7dc   : > { %v4823_v29 = vadd.f32 %v4822_v9, %v8185_v48  ;;  %v4824_v33 = vpop.f32.mrb[30].mxu0  ;;  %5220 = vmatprep.mubr.bf16.mxu1 %v4986_v25 }
 0x7dd   : > { %v4825_v57 = vadd.f32 %v4824_v33, %v8182_v55  ;;  %v4826_v34 = vpop.f32.mrb[31].mxu0  ;;  %5221 = vmatmul.mubr.bf16.gmra.mrb[216].mxu1 %v4985_v5  ;;  %v4937_v36 = vmax.f32 %v4821_v8, 0.0 }
 0x7de   : > { %v4827_v35 = vadd.f32 %v4826_v34, %v8185_v48  ;;  %v4938_v39 = vmax.f32 %v4823_v29, 0.0 }
 0x7df   : > { %v4939_v38 = vmax.f32 %v4825_v57, 0.0 }
 0x7e0   : > { %v4940_v27 = vmax.f32 %v4827_v35, 0.0 }
 0x7e1   : > { %v4987_v40 = vpack.c.bf16 %v4939_v38, %v4937_v36 }
 0x7e2   : > { %v4988_v41 = vpack.c.bf16 %v4940_v27, %v4938_v39  ;;  %v4830_v43 = vpop.f32.mrb[32].mxu0 }
 0x7e3   : > { %v4831_v44 = vadd.f32 %v4830_v43, %v8182_v55  ;;  %v4832_v42 = vpop.f32.mrb[33].mxu0 }
 0x7e4   : > { %v4833_v45 = vadd.f32 %v4832_v42, %v8185_v48  ;;  %v4834_v26 = vpop.f32.mrb[34].mxu0  ;;  %5228 = vmatprep.mubr.bf16.mxu1 %v4988_v41 }
 0x7e5   : > { %v4835_v30 = vadd.f32 %v4834_v26, %v8182_v55  ;;  %v4836_v31 = vpop.f32.mrb[35].mxu0  ;;  %5229 = vmatmul.mubr.bf16.gmra.mrb[220].mxu1 %v4987_v40  ;;  %v4941_v52 = vmax.f32 %v4831_v44, 0.0 }
 0x7e6   : > { %v4837_v28 = vadd.f32 %v4836_v31, %v8185_v48  ;;  %v4942_v56 = vmax.f32 %v4833_v45, 0.0 }
 0x7e7   : > { %v4943_v50 = vmax.f32 %v4835_v30, 0.0 }
 0x7e8   : > { %v4944_v49 = vmax.f32 %v4837_v28, 0.0 }
 0x7e9   : > { %v4989_v61 = vpack.c.bf16 %v4943_v50, %v4941_v52 }
 0x7ea   : > { %v4990_v62 = vpack.c.bf16 %v4944_v49, %v4942_v56  ;;  %v4840_v63 = vpop.f32.mrb[36].mxu0 }
 0x7eb   : > { %v4841_v1 = vadd.f32 %v4840_v63, %v8182_v55  ;;  %v4842_v2 = vpop.f32.mrb[37].mxu0 }
 0x7ec   : > { %v4843_v32 = vadd.f32 %v4842_v2, %v8185_v48  ;;  %v4844_v3 = vpop.f32.mrb[38].mxu0  ;;  %5236 = vmatprep.mubr.bf16.mxu1 %v4990_v62 }
 0x7ed   : > { %v4845_v59 = vadd.f32 %v4844_v3, %v8182_v55  ;;  %v4846_v53 = vpop.f32.mrb[39].mxu0  ;;  %5237 = vmatmul.mubr.bf16.gmra.mrb[224].mxu1 %v4989_v61  ;;  %v4945_v18 = vmax.f32 %v4841_v1, 0.0 }
 0x7ee   : > { %v4847_v14 = vadd.f32 %v4846_v53, %v8185_v48  ;;  %v4946_v15 = vmax.f32 %v4843_v32, 0.0 }
 0x7ef   : > { %v4947_v19 = vmax.f32 %v4845_v59, 0.0 }
 0x7f0   : > { %v4948_v0 = vmax.f32 %v4847_v14, 0.0 }
 0x7f1   : > { %v4991_v6 = vpack.c.bf16 %v4947_v19, %v4945_v18 }
 0x7f2   : > { %v4992_v58 = vpack.c.bf16 %v4948_v0, %v4946_v15  ;;  %v4850_v46 = vpop.f32.mrb[40].mxu0 }
 0x7f3   : > { %v4851_v47 = vadd.f32 %v4850_v46, %v8182_v55  ;;  %v4852_v11 = vpop.f32.mrb[41].mxu0 }
 0x7f4   : > { %v4853_v12 = vadd.f32 %v4852_v11, %v8185_v48  ;;  %v4854_v7 = vpop.f32.mrb[42].mxu0  ;;  %5244 = vmatprep.mubr.bf16.mxu1 %v4992_v58 }
 0x7f5   : > { %v4855_v13 = vadd.f32 %v4854_v7, %v8182_v55  ;;  %v4856_v16 = vpop.f32.mrb[43].mxu0  ;;  %5245 = vmatmul.mubr.bf16.gmra.mrb[228].mxu1 %v4991_v6  ;;  %v4949_v17 = vmax.f32 %v4851_v47, 0.0 }
 0x7f6   : > { %v4857_v60 = vadd.f32 %v4856_v16, %v8185_v48  ;;  %v4950_v54 = vmax.f32 %v4853_v12, 0.0 }
 0x7f7   : > { %v4951_v20 = vmax.f32 %v4855_v13, 0.0 }
 0x7f8   : > { %v4952_v21 = vmax.f32 %v4857_v60, 0.0 }
 0x7f9   : > { %v4993_v22 = vpack.c.bf16 %v4951_v20, %v4949_v17 }
 0x7fa   : > { %v4994_v23 = vpack.c.bf16 %v4952_v21, %v4950_v54  ;;  %v4860_v24 = vpop.f32.mrb[44].mxu0 }
 0x7fb   : > { %v4861_v37 = vadd.f32 %v4860_v24, %v8182_v55  ;;  %v4862_v4 = vpop.f32.mrb[45].mxu0 }
 0x7fc   : > { %v4863_v5 = vadd.f32 %v4862_v4, %v8185_v48  ;;  %v4864_v25 = vpop.f32.mrb[46].mxu0  ;;  %5252 = vmatprep.mubr.bf16.mxu1 %v4994_v23 }
 0x7fd   : > { %v4865_v51 = vadd.f32 %v4864_v25, %v8182_v55  ;;  %v4866_v8 = vpop.f32.mrb[47].mxu0  ;;  %5253 = vmatmul.mubr.bf16.gmra.mrb[232].mxu1 %v4993_v22  ;;  %v4953_v29 = vmax.f32 %v4861_v37, 0.0 }
 0x7fe   : > { %v4867_v9 = vadd.f32 %v4866_v8, %v8185_v48  ;;  %v4954_v57 = vmax.f32 %v4863_v5, 0.0 }
 0x7ff   : > { %v4955_v33 = vmax.f32 %v4865_v51, 0.0 }
 0x800   : > { %v4956_v34 = vmax.f32 %v4867_v9, 0.0 }
 0x801   : > { %v4995_v35 = vpack.c.bf16 %v4955_v33, %v4953_v29 }
 0x802   : > { %v4996_v36 = vpack.c.bf16 %v4956_v34, %v4954_v57  ;;  %v4870_v38 = vpop.f32.mrb[48].mxu0  ;;  %v8254_v57 = vld [vmem:[%s8595_s22] ss:$0 sm:$0xff] }
 0x803   : > { %v4871_v39 = vadd.f32 %v4870_v38, %v8182_v55  ;;  %v4872_v27 = vpop.f32.mrb[49].mxu0 }
 0x804   : > { %v4873_v40 = vadd.f32 %v4872_v27, %v8185_v48  ;;  %v4874_v41 = vpop.f32.mrb[50].mxu0  ;;  %5260 = vmatprep.mubr.bf16.mxu1 %v4996_v36 }
 0x805   : > { %v4875_v43 = vadd.f32 %v4874_v41, %v8182_v55  ;;  %v4876_v44 = vpop.f32.mrb[51].mxu0  ;;  %5261 = vmatmul.mubr.bf16.gmra.mrb[236].mxu1 %v4995_v35  ;;  %v4957_v45 = vmax.f32 %v4871_v39, 0.0 }
 0x806   : > { %v4877_v42 = vadd.f32 %v4876_v44, %v8185_v48  ;;  %v4958_v30 = vmax.f32 %v4873_v40, 0.0 }
 0x807   : > { %v4959_v26 = vmax.f32 %v4875_v43, 0.0 }
 0x808   : > { %v4960_v31 = vmax.f32 %v4877_v42, 0.0 }
 0x809   : > { %v4997_v28 = vpack.c.bf16 %v4959_v26, %v4957_v45 }
 0x80a   : > { %v4998_v52 = vpack.c.bf16 %v4960_v31, %v4958_v30  ;;  %v4880_v50 = vpop.f32.mrb[52].mxu0 }
 0x80b   : > { %v4881_v56 = vadd.f32 %v4880_v50, %v8182_v55  ;;  %v4882_v49 = vpop.f32.mrb[53].mxu0 }
 0x80c   : > { %v4883_v61 = vadd.f32 %v4882_v49, %v8185_v48  ;;  %v4884_v62 = vpop.f32.mrb[54].mxu0  ;;  %5268 = vmatprep.mubr.bf16.mxu1 %v4998_v52 }
 0x80d   : > { %v4885_v63 = vadd.f32 %v4884_v62, %v8182_v55  ;;  %v4886_v1 = vpop.f32.mrb[55].mxu0  ;;  %5269 = vmatmul.mubr.bf16.gmra.mrb[240].mxu1 %v4997_v28  ;;  %v4961_v32 = vmax.f32 %v4881_v56, 0.0 }
 0x80e   : > { %v4887_v2 = vadd.f32 %v4886_v1, %v8185_v48  ;;  %v4962_v59 = vmax.f32 %v4883_v61, 0.0 }
 0x80f   : > { %v4963_v3 = vmax.f32 %v4885_v63, 0.0 }
 0x810   : > { %v4964_v53 = vmax.f32 %v4887_v2, 0.0 }
 0x811   : > { %v4999_v14 = vpack.c.bf16 %v4963_v3, %v4961_v32 }
 0x812   : > { %v5000_v18 = vpack.c.bf16 %v4964_v53, %v4962_v59  ;;  %v4890_v19 = vpop.f32.mrb[56].mxu0 }
 0x813   : > { %v4891_v15 = vadd.f32 %v4890_v19, %v8182_v55  ;;  %v4892_v0 = vpop.f32.mrb[57].mxu0 }
 0x814   : > { %v4893_v6 = vadd.f32 %v4892_v0, %v8185_v48  ;;  %v4894_v58 = vpop.f32.mrb[58].mxu0  ;;  %5276 = vmatprep.mubr.bf16.mxu1 %v5000_v18 }
 0x815   : > { %v4895_v46 = vadd.f32 %v4894_v58, %v8182_v55  ;;  %v4896_v47 = vpop.f32.mrb[59].mxu0  ;;  %5277 = vmatmul.mubr.bf16.gmra.mrb[244].mxu1 %v4999_v14  ;;  %v4965_v12 = vmax.f32 %v4891_v15, 0.0  ;;  %v8278_v15 = vand.u32 127, %v1320_v10 }
 0x816   : > { %v4897_v11 = vadd.f32 %v4896_v47, %v8185_v48  ;;  %v4966_v13 = vmax.f32 %v4893_v6, 0.0 }
 0x817   : > { %v4967_v7 = vmax.f32 %v4895_v46, 0.0  ;;  %vm5303_vm3 = vcmp.eq.s32.totalorder %v8278_v15, 3 }
 0x818   : > { %v4968_v16 = vmax.f32 %v4897_v11, 0.0 }
 0x819   : > { %v5001_v60 = vpack.c.bf16 %v4967_v7, %v4965_v12 }
 0x81a   : > { %v5002_v17 = vpack.c.bf16 %v4968_v16, %v4966_v13  ;;  %v4900_v20 = vpop.f32.mrb[60].mxu0 }
 0x81b   : > { %v4901_v54 = vadd.f32 %v4900_v20, %v8182_v55  ;;  %v4902_v21 = vpop.f32.mrb[61].mxu0 }
 0x81c   : > { %v4903_v22 = vadd.f32 %v4902_v21, %v8185_v48  ;;  %v4904_v23 = vpop.f32.mrb[62].mxu0  ;;  %5284 = vmatprep.mubr.bf16.mxu1 %v5002_v17 }
 0x81d   : > { %v4905_v24 = vadd.f32 %v4904_v23, %v8182_v55  ;;  %v4906_v37 = vpop.f32.mrb[63].mxu0  ;;  %5285 = vmatmul.mubr.bf16.gmra.mrb[248].mxu1 %v5001_v60  ;;  %v4969_v5 = vmax.f32 %v4901_v54, 0.0 }
 0x81e   : > { %v4907_v4 = vadd.f32 %v4906_v37, %v8185_v48  ;;  %v4970_v51 = vmax.f32 %v4903_v22, 0.0 }
 0x81f   : > { %v4971_v25 = vmax.f32 %v4905_v24, 0.0 }
 0x820   : > { %v4972_v8 = vmax.f32 %v4907_v4, 0.0 }
 0x821   : > { %v5003_v9 = vpack.c.bf16 %v4971_v25, %v4969_v5 }
 0x822   : > { %v5004_v29 = vpack.c.bf16 %v4972_v8, %v4970_v51 }
 0x824   : > { %5292 = vmatprep.mubr.bf16.mxu1 %v5004_v29 }
 0x825   : > { %5293 = vmatmul.mubr.bf16.gmra.mrb[252].mxu1 %v5003_v9 }
 0x880   : > { %v6081_v33 = vpop.f32.mrb[192].mxu1 }
 0x881   : > { %v6082_v34 = vpop.f32.mrb[193].mxu1 }
 0x882   : > { %v6083_v55 = vadd.f32 %v6082_v34, %v6081_v33  ;;  %v6084_v35 = vpop.f32.mrb[194].mxu1 }
 0x883   : > { %v6085_v36 = vpop.f32.mrb[195].mxu1 }
 0x884   : > { %v5175_v48 = vadd.f32 %v6083_v55, %v8254_v57  ;;  %v6086_v38 = vadd.f32 %v6085_v36, %v6084_v35 }
 0x886   : > { %v6031_v39 = vmul.f32 -1.442695, %v5175_v48  ;;  %v8258_v27 = vadd.f32 %v6086_v38, %v8254_v57  ;;  %v5304_v10 = vmax.f32 %v5175_v48, 0.0 }
 0x888   : > { %6698 = vpow2.f32 %v6031_v39  ;;  %v6032_v40 = vmul.f32 -1.442695, %v8258_v27  ;;  %v6087_v41 = vpop.f32.mrb[196].mxu1  ;;  %v5305_v21 = vmax.f32 %v8258_v27, 0.0 }
 0x889   : > { %v6088_v43 = vpop.f32.mrb[197].mxu1 }
 0x88a   : > { %6700 = vpow2.f32 %v6032_v40  ;;  %v6089_v44 = vadd.f32 %v6088_v43, %v6087_v41  ;;  %v6090_v42 = vpop.f32.mrb[198].mxu1 }
 0x88b   : > { %v6091_v45 = vpop.f32.mrb[199].mxu1 }
 0x88c   : > { %v8262_v26 = vadd.f32 %v6089_v44, %v8254_v57  ;;  %v6092_v30 = vadd.f32 %v6091_v45, %v6090_v42 }
 0x88e   : > { %v6033_v31 = vmul.f32 -1.442695, %v8262_v26  ;;  %v8266_v28 = vadd.f32 %v6092_v30, %v8254_v57  ;;  %v5306_v35 = vmax.f32 %v8262_v26, 0.0 }
 0x890   : > { %6702 = vpow2.f32 %v6033_v31  ;;  %v6034_v52 = vmul.f32 -1.442695, %v8266_v28  ;;  %v6093_v50 = vpop.f32.mrb[200].mxu1  ;;  %v5307_v27 = vmax.f32 %v8266_v28, 0.0 }
 0x891   : > { %v6094_v56 = vpop.f32.mrb[201].mxu1 }
 0x892   : > { %v6699_v49 = vpop.eup %6698  ;;  %6704 = vpow2.f32 %v6034_v52  ;;  %v6095_v61 = vadd.f32 %v6094_v56, %v6093_v50  ;;  %v6096_v62 = vpop.f32.mrb[202].mxu1 }
 0x893   : > { %v5432_v63 = vadd.f32 1.0, %v6699_v49  ;;  %v6097_v1 = vpop.f32.mrb[203].mxu1 }
 0x894   : > { %v6701_v2 = vpop.eup %6700  ;;  %v8270_v32 = vadd.f32 %v6095_v61, %v8254_v57  ;;  %v6098_v3 = vadd.f32 %v6097_v1, %v6096_v62 }
 0x895   : > { %6706 = vrcp.f32 %v5432_v63  ;;  %v5433_v59 = vadd.f32 1.0, %v6701_v2 }
 0x896   : > { %v6035_v53 = vmul.f32 -1.442695, %v8270_v32  ;;  %v8274_v14 = vadd.f32 %v6098_v3, %v8254_v57  ;;  %v5308_v61 = vmax.f32 %v8270_v32, 0.0 }
 0x897   : > { %6708 = vrcp.f32 %v5433_v59 }
 0x898   : > { %6710 = vpow2.f32 %v6035_v53  ;;  %v6036_v18 = vmul.f32 -1.442695, %v8274_v14  ;;  %v6099_v19 = vpop.f32.mrb[204].mxu1  ;;  %v5309_v3 = vmax.f32 %v8274_v14, 0.0 }
 0x899   : > { %v6100_v0 = vpop.f32.mrb[205].mxu1 }
 0x89a   : > { %v6703_v6 = vpop.eup %6702  ;;  %6712 = vpow2.f32 %v6036_v18  ;;  %v6101_v58 = vadd.f32 %v6100_v0, %v6099_v19  ;;  %v6102_v46 = vpop.f32.mrb[206].mxu1 }
 0x89b   : > { %v5434_v47 = vadd.f32 1.0, %v6703_v6  ;;  %v6103_v11 = vpop.f32.mrb[207].mxu1 }
 0x89c   : > { %v6705_v12 = vpop.eup %6704  ;;  %v8282_v7 = vadd.f32 %v6101_v58, %v8254_v57  ;;  %v6104_v13 = vadd.f32 %v6103_v11, %v6102_v46 }
 0x89d   : > { %6714 = vrcp.f32 %v5434_v47  ;;  %v5435_v16 = vadd.f32 1.0, %v6705_v12 }
 0x89e   : > { %v6037_v60 = vmul.f32 -1.442695, %v8282_v7  ;;  %v8292_v17 = vadd.f32 %v6104_v13, %v8254_v57 }
 0x89f   : > { %v6707_v20 = vpop.eup %6706  ;;  %6716 = vrcp.f32 %v5435_v16  ;;  %v5310_v16 = vmax.f32 %v8282_v7, 0.0 }
 0x8a0   : > { %v5528_v54 = vsel %vm5303_vm3, %v5304_v10, %v6707_v20  ;;  %6718 = vpow2.f32 %v6037_v60  ;;  %v6038_v22 = vmul.f32 -1.442695, %v8292_v17  ;;  %v6105_v23 = vpop.f32.mrb[208].mxu1 }
 0x8a1   : > { %v6709_v24 = vpop.eup %6708  ;;  %5561 = vst.msk [vmem:[%s8288_s30] sm:$0xff] %vm5560_vm4, %v5528_v54  ;;  %v6106_v37 = vpop.f32.mrb[209].mxu1 }
 0x8a2   : > { %v6711_v4 = vpop.eup %6710  ;;  %v5529_v5 = vsel %vm5303_vm3, %v5305_v21, %v6709_v24  ;;  %6720 = vpow2.f32 %v6038_v22  ;;  %v6107_v25 = vadd.f32 %v6106_v37, %v6105_v23  ;;  %v6108_v51 = vpop.f32.mrb[210].mxu1  ;;  %v5311_v21 = vmax.f32 %v8292_v17, 0.0 }
 0x8a3   : > { %5562 = vst.msk [vmem:[%s8288_s30 + $0x8] sm:$0xff] %vm5560_vm4, %v5529_v5  ;;  %v5436_v8 = vadd.f32 1.0, %v6711_v4  ;;  %v6109_v9 = vpop.f32.mrb[211].mxu1 }
 0x8a4   : > { %v6713_v29 = vpop.eup %6712  ;;  %v8305_v33 = vadd.f32 %v6107_v25, %v8254_v57  ;;  %v6110_v34 = vadd.f32 %v6109_v9, %v6108_v51 }
 0x8a5   : > { %6722 = vrcp.f32 %v5436_v8  ;;  %v5437_v55 = vadd.f32 1.0, %v6713_v29 }
 0x8a6   : > { %v6039_v36 = vmul.f32 -1.442695, %v8305_v33  ;;  %v8310_v48 = vadd.f32 %v6110_v34, %v8254_v57 }
 0x8a7   : > { %v6715_v38 = vpop.eup %6714  ;;  %6724 = vrcp.f32 %v5437_v55  ;;  %v5312_v55 = vmax.f32 %v8305_v33, 0.0 }
 0x8a8   : > { %v5530_v39 = vsel %vm5303_vm3, %v5306_v35, %v6715_v38  ;;  %6726 = vpow2.f32 %v6039_v36  ;;  %v6040_v40 = vmul.f32 -1.442695, %v8310_v48  ;;  %v6111_v41 = vpop.f32.mrb[212].mxu1 }
 0x8a9   : > { %v6717_v43 = vpop.eup %6716  ;;  %5563 = vst.msk [vmem:[%s8288_s30 + $0x10] sm:$0xff] %vm5560_vm4, %v5530_v39  ;;  %v6112_v44 = vpop.f32.mrb[213].mxu1 }
 0x8aa   : > { %v6719_v42 = vpop.eup %6718  ;;  %v5531_v45 = vsel %vm5303_vm3, %v5307_v27, %v6717_v43  ;;  %6728 = vpow2.f32 %v6040_v40  ;;  %v6113_v26 = vadd.f32 %v6112_v44, %v6111_v41  ;;  %v6114_v30 = vpop.f32.mrb[214].mxu1  ;;  %v5313_v27 = vmax.f32 %v8310_v48, 0.0 }
 0x8ab   : > { %5564 = vst.msk [vmem:[%s8288_s30 + $0x18] sm:$0xff] %vm5560_vm4, %v5531_v45  ;;  %v5438_v31 = vadd.f32 1.0, %v6719_v42  ;;  %v6115_v52 = vpop.f32.mrb[215].mxu1 }
 0x8ac   : > { %v6721_v28 = vpop.eup %6720  ;;  %v8323_v50 = vadd.f32 %v6113_v26, %v8254_v57  ;;  %v6116_v56 = vadd.f32 %v6115_v52, %v6114_v30 }
 0x8ad   : > { %6730 = vrcp.f32 %v5438_v31  ;;  %v5439_v49 = vadd.f32 1.0, %v6721_v28 }
 0x8ae   : > { %v6041_v62 = vmul.f32 -1.442695, %v8323_v50  ;;  %v8328_v63 = vadd.f32 %v6116_v56, %v8254_v57 }
 0x8af   : > { %v6723_v1 = vpop.eup %6722  ;;  %6732 = vrcp.f32 %v5439_v49  ;;  %v5314_v49 = vmax.f32 %v8323_v50, 0.0 }
 0x8b0   : > { %v5532_v2 = vsel %vm5303_vm3, %v5308_v61, %v6723_v1  ;;  %6734 = vpow2.f32 %v6041_v62  ;;  %v6042_v59 = vmul.f32 -1.442695, %v8328_v63  ;;  %v6117_v53 = vpop.f32.mrb[216].mxu1 }
 0x8b1   : > { %v6725_v18 = vpop.eup %6724  ;;  %5565 = vst.msk [vmem:[%s8288_s30 + $0x20] sm:$0xff] %vm5560_vm4, %v5532_v2  ;;  %v6118_v32 = vpop.f32.mrb[217].mxu1 }
 0x8b2   : > { %v6727_v19 = vpop.eup %6726  ;;  %v5533_v0 = vsel %vm5303_vm3, %v5309_v3, %v6725_v18  ;;  %6736 = vpow2.f32 %v6042_v59  ;;  %v6119_v6 = vadd.f32 %v6118_v32, %v6117_v53  ;;  %v6120_v58 = vpop.f32.mrb[218].mxu1  ;;  %v5315_v3 = vmax.f32 %v8328_v63, 0.0 }
 0x8b3   : > { %5566 = vst.msk [vmem:[%s8288_s30 + $0x28] sm:$0xff] %vm5560_vm4, %v5533_v0  ;;  %v5440_v46 = vadd.f32 1.0, %v6727_v19  ;;  %v6121_v47 = vpop.f32.mrb[219].mxu1 }
 0x8b4   : > { %v6729_v14 = vpop.eup %6728  ;;  %v8341_v11 = vadd.f32 %v6119_v6, %v8254_v57  ;;  %v6122_v12 = vadd.f32 %v6121_v47, %v6120_v58 }
 0x8b5   : > { %6738 = vrcp.f32 %v5440_v46  ;;  %v5441_v13 = vadd.f32 1.0, %v6729_v14 }
 0x8b6   : > { %v6043_v10 = vmul.f32 -1.442695, %v8341_v11  ;;  %v8346_v60 = vadd.f32 %v6122_v12, %v8254_v57 }
 0x8b7   : > { %v6731_v20 = vpop.eup %6730  ;;  %6740 = vrcp.f32 %v5441_v13  ;;  %v5316_v13 = vmax.f32 %v8341_v11, 0.0 }
 0x8b8   : > { %v5534_v54 = vsel %vm5303_vm3, %v5310_v16, %v6731_v20  ;;  %6742 = vpow2.f32 %v6043_v10  ;;  %v6044_v22 = vmul.f32 -1.442695, %v8346_v60  ;;  %v6123_v23 = vpop.f32.mrb[220].mxu1 }
 0x8b9   : > { %v6733_v24 = vpop.eup %6732  ;;  %5567 = vst.msk [vmem:[%s8288_s30 + $0x30] sm:$0xff] %vm5560_vm4, %v5534_v54  ;;  %v6124_v7 = vpop.f32.mrb[221].mxu1 }
 0x8ba   : > { %v6735_v37 = vpop.eup %6734  ;;  %v5535_v4 = vsel %vm5303_vm3, %v5311_v21, %v6733_v24  ;;  %6744 = vpow2.f32 %v6044_v22  ;;  %v6125_v5 = vadd.f32 %v6124_v7, %v6123_v23  ;;  %v6126_v25 = vpop.f32.mrb[222].mxu1  ;;  %v5317_v21 = vmax.f32 %v8346_v60, 0.0 }
 0x8bb   : > { %5568 = vst.msk [vmem:[%s8288_s30 + $0x38] sm:$0xff] %vm5560_vm4, %v5535_v4  ;;  %v5442_v51 = vadd.f32 1.0, %v6735_v37  ;;  %v6127_v8 = vpop.f32.mrb[223].mxu1 }
 0x8bc   : > { %v6737_v17 = vpop.eup %6736  ;;  %v8359_v9 = vadd.f32 %v6125_v5, %v8254_v57  ;;  %v6128_v29 = vadd.f32 %v6127_v8, %v6126_v25 }
 0x8bd   : > { %6746 = vrcp.f32 %v5442_v51  ;;  %v5443_v34 = vadd.f32 1.0, %v6737_v17 }
 0x8be   : > { %v6045_v35 = vmul.f32 -1.442695, %v8359_v9  ;;  %v8364_v36 = vadd.f32 %v6128_v29, %v8254_v57 }
 0x8bf   : > { %v6739_v38 = vpop.eup %6738  ;;  %6748 = vrcp.f32 %v5443_v34  ;;  %v5318_v34 = vmax.f32 %v8359_v9, 0.0 }
 0x8c0   : > { %v5536_v39 = vsel %vm5303_vm3, %v5312_v55, %v6739_v38  ;;  %6750 = vpow2.f32 %v6045_v35  ;;  %v6046_v40 = vmul.f32 -1.442695, %v8364_v36  ;;  %v6129_v41 = vpop.f32.mrb[224].mxu1 }
 0x8c1   : > { %v6741_v43 = vpop.eup %6740  ;;  %5569 = vst.msk [vmem:[%s8288_s30 + $0x40] sm:$0xff] %vm5560_vm4, %v5536_v39  ;;  %v6130_v33 = vpop.f32.mrb[225].mxu1 }
 0x8c2   : > { %v6743_v44 = vpop.eup %6742  ;;  %v5537_v42 = vsel %vm5303_vm3, %v5313_v27, %v6741_v43  ;;  %6752 = vpow2.f32 %v6046_v40  ;;  %v6131_v45 = vadd.f32 %v6130_v33, %v6129_v41  ;;  %v6132_v26 = vpop.f32.mrb[226].mxu1  ;;  %v5319_v27 = vmax.f32 %v8364_v36, 0.0 }
 0x8c3   : > { %5570 = vst.msk [vmem:[%s8288_s30 + $0x48] sm:$0xff] %vm5560_vm4, %v5537_v42  ;;  %v5444_v30 = vadd.f32 1.0, %v6743_v44  ;;  %v6133_v31 = vpop.f32.mrb[227].mxu1 }
 0x8c4   : > { %v6745_v48 = vpop.eup %6744  ;;  %v8377_v52 = vadd.f32 %v6131_v45, %v8254_v57  ;;  %v6134_v28 = vadd.f32 %v6133_v31, %v6132_v26 }
 0x8c5   : > { %6754 = vrcp.f32 %v5444_v30  ;;  %v5445_v56 = vadd.f32 1.0, %v6745_v48 }
 0x8c6   : > { %v6047_v61 = vmul.f32 -1.442695, %v8377_v52  ;;  %v8382_v62 = vadd.f32 %v6134_v28, %v8254_v57 }
 0x8c7   : > { %v6747_v1 = vpop.eup %6746  ;;  %6756 = vrcp.f32 %v5445_v56  ;;  %v5320_v56 = vmax.f32 %v8377_v52, 0.0 }
 0x8c8   : > { %v5538_v2 = vsel %vm5303_vm3, %v5314_v49, %v6747_v1  ;;  %6758 = vpow2.f32 %v6047_v61  ;;  %v6048_v59 = vmul.f32 -1.442695, %v8382_v62  ;;  %v6135_v53 = vpop.f32.mrb[228].mxu1 }
 0x8c9   : > { %v6749_v18 = vpop.eup %6748  ;;  %5571 = vst.msk [vmem:[%s8288_s30 + $0x50] sm:$0xff] %vm5560_vm4, %v5538_v2  ;;  %v6136_v50 = vpop.f32.mrb[229].mxu1 }
 0x8ca   : > { %v6751_v32 = vpop.eup %6750  ;;  %v5539_v19 = vsel %vm5303_vm3, %v5315_v3, %v6749_v18  ;;  %6760 = vpow2.f32 %v6048_v59  ;;  %v6137_v0 = vadd.f32 %v6136_v50, %v6135_v53  ;;  %v6138_v6 = vpop.f32.mrb[230].mxu1  ;;  %v5321_v3 = vmax.f32 %v8382_v62, 0.0 }
 0x8cb   : > { %5572 = vst.msk [vmem:[%s8288_s30 + $0x58] sm:$0xff] %vm5560_vm4, %v5539_v19  ;;  %v5446_v58 = vadd.f32 1.0, %v6751_v32  ;;  %v6139_v46 = vpop.f32.mrb[231].mxu1 }
 0x8cc   : > { %v6753_v63 = vpop.eup %6752  ;;  %v8395_v47 = vadd.f32 %v6137_v0, %v8254_v57  ;;  %v6140_v14 = vadd.f32 %v6139_v46, %v6138_v6 }
 0x8cd   : > { %6762 = vrcp.f32 %v5446_v58  ;;  %v5447_v12 = vadd.f32 1.0, %v6753_v63 }
 0x8ce   : > { %v6049_v16 = vmul.f32 -1.442695, %v8395_v47  ;;  %v8400_v10 = vadd.f32 %v6140_v14, %v8254_v57 }
 0x8cf   : > { %v6755_v20 = vpop.eup %6754  ;;  %6764 = vrcp.f32 %v5447_v12  ;;  %v5322_v12 = vmax.f32 %v8395_v47, 0.0 }
 0x8d0   : > { %v5540_v54 = vsel %vm5303_vm3, %v5316_v13, %v6755_v20  ;;  %6766 = vpow2.f32 %v6049_v16  ;;  %v6050_v22 = vmul.f32 -1.442695, %v8400_v10  ;;  %v6141_v23 = vpop.f32.mrb[232].mxu1 }
 0x8d1   : > { %v6757_v24 = vpop.eup %6756  ;;  %5573 = vst.msk [vmem:[%s8288_s30 + $0x60] sm:$0xff] %vm5560_vm4, %v5540_v54  ;;  %v6142_v11 = vpop.f32.mrb[233].mxu1 }
 0x8d2   : > { %v6759_v7 = vpop.eup %6758  ;;  %v5541_v37 = vsel %vm5303_vm3, %v5317_v21, %v6757_v24  ;;  %6768 = vpow2.f32 %v6050_v22  ;;  %v6143_v4 = vadd.f32 %v6142_v11, %v6141_v23  ;;  %v6144_v5 = vpop.f32.mrb[234].mxu1  ;;  %v5323_v21 = vmax.f32 %v8400_v10, 0.0 }
 0x8d3   : > { %5574 = vst.msk [vmem:[%s8288_s30 + $0x68] sm:$0xff] %vm5560_vm4, %v5541_v37  ;;  %v5448_v25 = vadd.f32 1.0, %v6759_v7  ;;  %v6145_v51 = vpop.f32.mrb[235].mxu1 }
 0x8d4   : > { %v6761_v60 = vpop.eup %6760  ;;  %v8413_v8 = vadd.f32 %v6143_v4, %v8254_v57  ;;  %v6146_v17 = vadd.f32 %v6145_v51, %v6144_v5 }
 0x8d5   : > { %6770 = vrcp.f32 %v5448_v25  ;;  %v5449_v29 = vadd.f32 1.0, %v6761_v60 }
 0x8d6   : > { %v6051_v55 = vmul.f32 -1.442695, %v8413_v8  ;;  %v8418_v35 = vadd.f32 %v6146_v17, %v8254_v57 }
 0x8d7   : > { %v6763_v38 = vpop.eup %6762  ;;  %6772 = vrcp.f32 %v5449_v29  ;;  %v5324_v29 = vmax.f32 %v8413_v8, 0.0 }
 0x8d8   : > { %v5542_v39 = vsel %vm5303_vm3, %v5318_v34, %v6763_v38  ;;  %6774 = vpow2.f32 %v6051_v55  ;;  %v6052_v40 = vmul.f32 -1.442695, %v8418_v35  ;;  %v6147_v41 = vpop.f32.mrb[236].mxu1 }
 0x8d9   : > { %v6765_v43 = vpop.eup %6764  ;;  %5575 = vst.msk [vmem:[%s8288_s30 + $0x70] sm:$0xff] %vm5560_vm4, %v5542_v39  ;;  %v6148_v9 = vpop.f32.mrb[237].mxu1 }
 0x8da   : > { %v6767_v33 = vpop.eup %6766  ;;  %v5543_v44 = vsel %vm5303_vm3, %v5319_v27, %v6765_v43  ;;  %6776 = vpow2.f32 %v6052_v40  ;;  %v6149_v42 = vadd.f32 %v6148_v9, %v6147_v41  ;;  %v6150_v45 = vpop.f32.mrb[238].mxu1  ;;  %v5325_v27 = vmax.f32 %v8418_v35, 0.0 }
 0x8db   : > { %5576 = vst.msk [vmem:[%s8288_s30 + $0x78] sm:$0xff] %vm5560_vm4, %v5543_v44  ;;  %v5450_v26 = vadd.f32 1.0, %v6767_v33  ;;  %v6151_v30 = vpop.f32.mrb[239].mxu1 }
 0x8dc   : > { %v6769_v36 = vpop.eup %6768  ;;  %v8431_v31 = vadd.f32 %v6149_v42, %v8254_v57  ;;  %v6152_v48 = vadd.f32 %v6151_v30, %v6150_v45 }
 0x8dd   : > { %6778 = vrcp.f32 %v5450_v26  ;;  %v5451_v28 = vadd.f32 1.0, %v6769_v36 }
 0x8de   : > { %v6053_v49 = vmul.f32 -1.442695, %v8431_v31  ;;  %v8436_v61 = vadd.f32 %v6152_v48, %v8254_v57 }
 0x8df   : > { %v6771_v1 = vpop.eup %6770  ;;  %6780 = vrcp.f32 %v5451_v28  ;;  %v5326_v28 = vmax.f32 %v8431_v31, 0.0 }
 0x8e0   : > { %v5544_v2 = vsel %vm5303_vm3, %v5320_v56, %v6771_v1  ;;  %6782 = vpow2.f32 %v6053_v49  ;;  %v6054_v59 = vmul.f32 -1.442695, %v8436_v61  ;;  %v6153_v53 = vpop.f32.mrb[240].mxu1 }
 0x8e1   : > { %v6773_v18 = vpop.eup %6772  ;;  %5577 = vst.msk [vmem:[%s8288_s30 + $0x80] sm:$0xff] %vm5560_vm4, %v5544_v2  ;;  %v6154_v52 = vpop.f32.mrb[241].mxu1 }
 0x8e2   : > { %v6775_v50 = vpop.eup %6774  ;;  %v5545_v32 = vsel %vm5303_vm3, %v5321_v3, %v6773_v18  ;;  %6784 = vpow2.f32 %v6054_v59  ;;  %v6155_v19 = vadd.f32 %v6154_v52, %v6153_v53  ;;  %v6156_v0 = vpop.f32.mrb[242].mxu1  ;;  %v5327_v3 = vmax.f32 %v8436_v61, 0.0 }
 0x8e3   : > { %5578 = vst.msk [vmem:[%s8288_s30 + $0x88] sm:$0xff] %vm5560_vm4, %v5545_v32  ;;  %v5452_v6 = vadd.f32 1.0, %v6775_v50  ;;  %v6157_v58 = vpop.f32.mrb[243].mxu1 }
 0x8e4   : > { %v6777_v62 = vpop.eup %6776  ;;  %v8449_v46 = vadd.f32 %v6155_v19, %v8254_v57  ;;  %v6158_v63 = vadd.f32 %v6157_v58, %v6156_v0 }
 0x8e5   : > { %6786 = vrcp.f32 %v5452_v6  ;;  %v5453_v14 = vadd.f32 1.0, %v6777_v62 }
 0x8e6   : > { %v6055_v13 = vmul.f32 -1.442695, %v8449_v46  ;;  %v8454_v16 = vadd.f32 %v6158_v63, %v8254_v57 }
 0x8e7   : > { %v6779_v20 = vpop.eup %6778  ;;  %6788 = vrcp.f32 %v5453_v14  ;;  %v5328_v14 = vmax.f32 %v8449_v46, 0.0 }
 0x8e8   : > { %v5546_v54 = vsel %vm5303_vm3, %v5322_v12, %v6779_v20  ;;  %6790 = vpow2.f32 %v6055_v13  ;;  %v6056_v22 = vmul.f32 -1.442695, %v8454_v16  ;;  %v6159_v23 = vpop.f32.mrb[244].mxu1 }
 0x8e9   : > { %v6781_v24 = vpop.eup %6780  ;;  %5579 = vst.msk [vmem:[%s8288_s30 + $0x90] sm:$0xff] %vm5560_vm4, %v5546_v54  ;;  %v6160_v47 = vpop.f32.mrb[245].mxu1 }
 0x8ea   : > { %v6783_v11 = vpop.eup %6782  ;;  %v5547_v7 = vsel %vm5303_vm3, %v5323_v21, %v6781_v24  ;;  %6792 = vpow2.f32 %v6056_v22  ;;  %v6161_v37 = vadd.f32 %v6160_v47, %v6159_v23  ;;  %v6162_v4 = vpop.f32.mrb[246].mxu1  ;;  %v5329_v21 = vmax.f32 %v8454_v16, 0.0 }
 0x8eb   : > { %5580 = vst.msk [vmem:[%s8288_s30 + $0x98] sm:$0xff] %vm5560_vm4, %v5547_v7  ;;  %v5454_v5 = vadd.f32 1.0, %v6783_v11  ;;  %v6163_v25 = vpop.f32.mrb[247].mxu1 }
 0x8ec   : > { %v6785_v10 = vpop.eup %6784  ;;  %v8467_v51 = vadd.f32 %v6161_v37, %v8254_v57  ;;  %v6164_v60 = vadd.f32 %v6163_v25, %v6162_v4 }
 0x8ed   : > { %6794 = vrcp.f32 %v5454_v5  ;;  %v5455_v17 = vadd.f32 1.0, %v6785_v10 }
 0x8ee   : > { %v6057_v34 = vmul.f32 -1.442695, %v8467_v51  ;;  %v8472_v55 = vadd.f32 %v6164_v60, %v8254_v57  ;;  %v5330_v16 = vmax.f32 %v8467_v51, 0.0 }
 0x8ef   : > { %v6787_v38 = vpop.eup %6786  ;;  %6796 = vrcp.f32 %v5455_v17 }
 0x8f0   : > { %v5548_v39 = vsel %vm5303_vm3, %v5324_v29, %v6787_v38  ;;  %6798 = vpow2.f32 %v6057_v34  ;;  %v6058_v40 = vmul.f32 -1.442695, %v8472_v55  ;;  %v6165_v41 = vpop.f32.mrb[248].mxu1  ;;  %v5331_v4 = vmax.f32 %v8472_v55, 0.0 }
 0x8f1   : > { %v6789_v43 = vpop.eup %6788  ;;  %5581 = vst.msk [vmem:[%s8288_s30 + $0xa0] sm:$0xff] %vm5560_vm4, %v5548_v39  ;;  %v6166_v8 = vpop.f32.mrb[249].mxu1 }
 0x8f2   : > { %v6791_v9 = vpop.eup %6790  ;;  %v5549_v33 = vsel %vm5303_vm3, %v5325_v27, %v6789_v43  ;;  %6800 = vpow2.f32 %v6058_v40  ;;  %v6167_v44 = vadd.f32 %v6166_v8, %v6165_v41  ;;  %v6168_v42 = vpop.f32.mrb[250].mxu1 }
 0x8f3   : > { %5582 = vst.msk [vmem:[%s8288_s30 + $0xa8] sm:$0xff] %vm5560_vm4, %v5549_v33  ;;  %v5456_v45 = vadd.f32 1.0, %v6791_v9  ;;  %v6169_v26 = vpop.f32.mrb[251].mxu1 }
 0x8f4   : > { %v6793_v35 = vpop.eup %6792  ;;  %v8485_v30 = vadd.f32 %v6167_v44, %v8254_v57  ;;  %v6170_v36 = vadd.f32 %v6169_v26, %v6168_v42 }
 0x8f5   : > { %6802 = vrcp.f32 %v5456_v45  ;;  %v5457_v48 = vadd.f32 1.0, %v6793_v35 }
 0x8f6   : > { %v6059_v56 = vmul.f32 -1.442695, %v8485_v30  ;;  %v8490_v49 = vadd.f32 %v6170_v36, %v8254_v57  ;;  %v5332_v29 = vmax.f32 %v8485_v30, 0.0 }
 0x8f7   : > { %v6795_v1 = vpop.eup %6794  ;;  %6804 = vrcp.f32 %v5457_v48 }
 0x8f8   : > { %v5550_v2 = vsel %vm5303_vm3, %v5326_v28, %v6795_v1  ;;  %6806 = vpow2.f32 %v6059_v56  ;;  %v6060_v59 = vmul.f32 -1.442695, %v8490_v49  ;;  %v6171_v53 = vpop.f32.mrb[252].mxu1  ;;  %v5333_v38 = vmax.f32 %v8490_v49, 0.0 }
 0x8f9   : > { %v6797_v18 = vpop.eup %6796  ;;  %5583 = vst.msk [vmem:[%s8288_s30 + $0xb0] sm:$0xff] %vm5560_vm4, %v5550_v2  ;;  %v6172_v31 = vpop.f32.mrb[253].mxu1 }
 0x8fa   : > { %v6799_v52 = vpop.eup %6798  ;;  %v5551_v50 = vsel %vm5303_vm3, %v5327_v3, %v6797_v18  ;;  %6808 = vpow2.f32 %v6060_v59  ;;  %v6173_v32 = vadd.f32 %v6172_v31, %v6171_v53  ;;  %v6174_v19 = vpop.f32.mrb[254].mxu1 }
 0x8fb   : > { %5584 = vst.msk [vmem:[%s8288_s30 + $0xb8] sm:$0xff] %vm5560_vm4, %v5551_v50  ;;  %v5458_v0 = vadd.f32 1.0, %v6799_v52  ;;  %v6175_v6 = vpop.f32.mrb[255].mxu1 }
 0x8fc   : > { %v6801_v61 = vpop.eup %6800  ;;  %v5295_v58 = vadd.f32 %v6173_v32, %v8254_v57  ;;  %v6176_v62 = vadd.f32 %v6175_v6, %v6174_v19 }
 0x8fd   : > { %6810 = vrcp.f32 %v5458_v0  ;;  %v5459_v63 = vadd.f32 1.0, %v6801_v61 }
 0x8fe   : > { %v6061_v12 = vmul.f32 -1.442695, %v5295_v58  ;;  %v5298_v13 = vadd.f32 %v6176_v62, %v8254_v57  ;;  %v5334_v40 = vmax.f32 %v5295_v58, 0.0 }
 0x8ff   : > { %v6803_v20 = vpop.eup %6802  ;;  %6812 = vrcp.f32 %v5459_v63 }
 0x900   : > { %v5552_v54 = vsel %vm5303_vm3, %v5328_v14, %v6803_v20  ;;  %6814 = vpow2.f32 %v6061_v12  ;;  %v6062_v22 = vmul.f32 -1.442695, %v5298_v13  ;;  %v5335_v8 = vmax.f32 %v5298_v13, 0.0 }
 0x901   : > { %v6805_v23 = vpop.eup %6804  ;;  %5585 = vst.msk [vmem:[%s8288_s30 + $0xc0] sm:$0xff] %vm5560_vm4, %v5552_v54 }
 0x902   : > { %v6807_v24 = vpop.eup %6806  ;;  %v5553_v46 = vsel %vm5303_vm3, %v5329_v21, %v6805_v23  ;;  %6816 = vpow2.f32 %v6062_v22 }
 0x903   : > { %5586 = vst.msk [vmem:[%s8288_s30 + $0xc8] sm:$0xff] %vm5560_vm4, %v5553_v46  ;;  %v5460_v57 = vadd.f32 1.0, %v6807_v24 }
 0x904   : > { %v6809_v47 = vpop.eup %6808 }
 0x905   : > { %6818 = vrcp.f32 %v5460_v57  ;;  %v5461_v11 = vadd.f32 1.0, %v6809_v47 }
 0x907   : > { %v6811_v7 = vpop.eup %6810  ;;  %6820 = vrcp.f32 %v5461_v11 }
 0x908   : > { %v5554_v37 = vsel %vm5303_vm3, %v5330_v16, %v6811_v7 }
 0x909   : > { %v6813_v5 = vpop.eup %6812  ;;  %5587 = vst.msk [vmem:[%s8288_s30 + $0xd0] sm:$0xff] %vm5560_vm4, %v5554_v37 }
 0x90a   : > { %v6815_v25 = vpop.eup %6814  ;;  %v5555_v10 = vsel %vm5303_vm3, %v5331_v4, %v6813_v5 }
 0x90b   : > { %5588 = vst.msk [vmem:[%s8288_s30 + $0xd8] sm:$0xff] %vm5560_vm4, %v5555_v10  ;;  %v5462_v60 = vadd.f32 1.0, %v6815_v25 }
 0x90c   : > { %v6817_v51 = vpop.eup %6816 }
 0x90d   : > { %6822 = vrcp.f32 %v5462_v60  ;;  %v5463_v17 = vadd.f32 1.0, %v6817_v51 }
 0x90f   : > { %v6819_v34 = vpop.eup %6818  ;;  %6824 = vrcp.f32 %v5463_v17 }
 0x910   : > { %v5556_v55 = vsel %vm5303_vm3, %v5332_v29, %v6819_v34 }
 0x911   : > { %v6821_v39 = vpop.eup %6820  ;;  %5589 = vst.msk [vmem:[%s8288_s30 + $0xe0] sm:$0xff] %vm5560_vm4, %v5556_v55 }
 0x912   : > { %v5557_v27 = vsel %vm5303_vm3, %v5333_v38, %v6821_v39 }
 0x913   : > { %5590 = vst.msk [vmem:[%s8288_s30 + $0xe8] sm:$0xff] %vm5560_vm4, %v5557_v27 }
 0x917   : > { %v6823_v41 = vpop.eup %6822 }
 0x918   : > { %v5558_v43 = vsel %vm5303_vm3, %v5334_v40, %v6823_v41 }
 0x919   : > { %v6825_v9 = vpop.eup %6824  ;;  %5591 = vst.msk [vmem:[%s8288_s30 + $0xf0] sm:$0xff] %vm5560_vm4, %v5558_v43 }
 0x91a   : > { %v5559_v33 = vsel %vm5303_vm3, %v5335_v8, %v6825_v9 }
 0x91b   : > { %5592 = vst.msk [vmem:[%s8288_s30 + $0xf8] sm:$0xff] %vm5560_vm4, %v5559_v33 }
 0x91c PF: > { %s33_s0 = sadd.s32 1, %s7016_s0  }
 0x91d   : > { %p30_p3 = scmp.ge.s32.totalorder %s33_s0, 4  }
 0x91f   :  { %32 = sbr.rel (!%p30_p3) target bundleno = 14 (0xe), region = 151 }
 0x926   :  { %5615 = vsyncpa [#allocation3], 1 }
 0x927   :  { %5617 = vsyncpa [#allocation3 + $0x1], 1 }
 0x928   :  { %5618 = vsyncpa [#allocation5], 1 }
 0x929   :  { %5619 = vsyncpa [#allocation8], 1 }
 0x92a   :  { %5620 = vsyncpa [#allocation11], 1 }

</bundles_post_ra>
